<compile_context>
chip_gen: v6e
topology: v6e:2x2x1
jax: 0.10.0
libtpu: 0.0.40
codegen_flags: <defaults>
</compile_context>

<pallas_src>
import jax
import jax.numpy as jnp
from jax.experimental import pallas as pl
from jax.experimental.pallas import tpu as pltpu


# ----------------------------------------------------------------------------
# Fused teacher kernel: one batch element per grid step, both layers in-kernel.
# ----------------------------------------------------------------------------
def _teacher_fused_kernel(x_ref, w1_ref, s1_ref, b1_ref, w2_ref, s2_ref,
                          b2_ref, o1_ref, o2_ref, xp1_ref, xp2_ref):
    # x_ref : (1, H, W, Cin)          one sample, NHWC
    # w*_ref: (9*Cin_l, Cout_l)       im2col-ordered weights (kh, kw, ci)
    # s*/b* : (1, Cout_l)             folded BN scale / shift
    # o1_ref: (1, H/2, (W/2)*C1)      lane-dense pooled layer-1 features
    # o2_ref: (1, H/4, (W/4)*C2)      lane-dense pooled layer-2 features
    # xp*   : VMEM scratch, zero-padded (halo) inputs of each conv
    _, H, W, Cin = x_ref.shape
    C1 = s1_ref.shape[-1]
    C2 = s2_ref.shape[-1]
    H1, W1 = H // 2, W // 2
    H2, W2 = H1 // 2, W1 // 2

    def conv_bn_relu_pool(xp_ref, x_val, Hc, Wc, Cc, w_ref, s_ref, b_ref, Co):
        # Halo padding inside the kernel: zero the (Hc+2, Wc+2, Cc) scratch,
        # then write the interior (both are tiny; the zero fill is a handful
        # of vector stores per grid step).
        xp_ref[...] = jnp.zeros_like(xp_ref)
        xp_ref[1:Hc + 1, 1:Wc + 1, :] = x_val
        xp = xp_ref[...]

        # im2col: concatenate the 9 shifted taps along the channel (lane)
        # axis while still 3-D, then a single sublane-merge reshape to the
        # (Hc*Wc, 9*Cc) patch matrix, then ONE MXU matmul with the
        # (9*Cc, Co) weight slab.
        taps = [xp[kh:kh + Hc, kw:kw + Wc, :]
                for kh in range(3) for kw in range(3)]
        pm = jnp.concatenate(taps, axis=-1).reshape(Hc * Wc, 9 * Cc)
        y = jnp.dot(pm, w_ref[...], preferred_element_type=jnp.float32)

        # Folded BatchNorm (affine) + ReLU, kept in f32 (v5e-friendly).
        y = jnp.maximum(y * s_ref[0] + b_ref[0], 0.0)

        # Fused 2x2 max-pool (stride 2).  Rows of y are m = h*Wc + w.
        y = jnp.max(y.reshape(Hc * Wc // 2, 2, Co), axis=1)      # pool w-pairs
        y = jnp.max(y.reshape(Hc // 2, 2, Wc // 2, Co), axis=1)  # pool h-pairs
        return y                                                 # (Hc/2, Wc/2, Co)

    f1 = conv_bn_relu_pool(xp1_ref, x_ref[0], H, W, Cin,
                           w1_ref, s1_ref, b1_ref, C1)
    o1_ref[0] = f1.reshape(H1, W1 * C1)            # lane-dense (x128) store

    f2 = conv_bn_relu_pool(xp2_ref, f1, H1, W1, C1,
                           w2_ref, s2_ref, b2_ref, C2)
    o2_ref[0] = f2.reshape(H2, W2 * C2)            # lane-dense (x128) store


@jax.jit
def teacher_forward_pallas(x_nchw, w1, s1, b1, w2, s2, b2):
    """Fused teacher forward.  x_nchw: (N, Cin, H, W) f32 -> (f1, f2) NCHW."""
    N, Cin, H, W = x_nchw.shape
    C1, C2 = w1.shape[-1], w2.shape[-1]
    assert H % 4 == 0 and W % 4 == 0, "spatial dims must be divisible by 4"
    H1, W1, H2, W2 = H // 2, W // 2, H // 4, W // 4

    x_nhwc = jnp.transpose(x_nchw, (0, 2, 3, 1)).astype(jnp.float32)
    # 2-D lane-aligned weight slabs; row order (kh*3 + kw)*Cin + ci matches
    # the im2col column order built in the kernel.
    w1m = w1.reshape(9 * Cin, C1).astype(jnp.float32)
    w2m = w2.reshape(9 * C1, C2).astype(jnp.float32)
    s1r = s1.reshape(1, C1).astype(jnp.float32)
    b1r = b1.reshape(1, C1).astype(jnp.float32)
    s2r = s2.reshape(1, C2).astype(jnp.float32)
    b2r = b2.reshape(1, C2).astype(jnp.float32)

    o1, o2 = pl.pallas_call(
        _teacher_fused_kernel,
        out_shape=(
            jax.ShapeDtypeStruct((N, H1, W1 * C1), jnp.float32),
            jax.ShapeDtypeStruct((N, H2, W2 * C2), jnp.float32),
        ),
        grid=(N,),
        in_specs=[
            pl.BlockSpec((1, H, W, Cin), lambda n: (n, 0, 0, 0)),
            pl.BlockSpec((9 * Cin, C1), lambda n: (0, 0)),
            pl.BlockSpec((1, C1), lambda n: (0, 0)),
            pl.BlockSpec((1, C1), lambda n: (0, 0)),
            pl.BlockSpec((9 * C1, C2), lambda n: (0, 0)),
            pl.BlockSpec((1, C2), lambda n: (0, 0)),
            pl.BlockSpec((1, C2), lambda n: (0, 0)),
        ],
        out_specs=(
            pl.BlockSpec((1, H1, W1 * C1), lambda n: (n, 0, 0)),
            pl.BlockSpec((1, H2, W2 * C2), lambda n: (n, 0, 0)),
        ),
        scratch_shapes=[
            pltpu.VMEM((H + 2, W + 2, Cin), jnp.float32),
            pltpu.VMEM((H1 + 2, W1 + 2, C1), jnp.float32),
        ],
        compiler_params=pltpu.CompilerParams(
            dimension_semantics=("parallel",)),
    )(x_nhwc, w1m, s1r, b1r, w2m, s2r, b2r)

    # Layout plumbing only: back to the PyTorch-facing NCHW API.
    f1 = jnp.transpose(o1.reshape(N, H1, W1, C1), (0, 3, 1, 2))
    f2 = jnp.transpose(o2.reshape(N, H2, W2, C2), (0, 3, 1, 2))
    return f1, f2


# ----------------------------------------------------------------------------
# Teacher embedding network (stand-in for emb_func): two conv blocks.
# ----------------------------------------------------------------------------
class ConvEmbedding:
    """Teacher emb_func: [Conv3x3-BN-ReLU-MaxPool2x2] x 2.  NCHW in / NCHW out."""

    def __init__(self, key, cin=4, c1=16, c2=32):
        k1, k2, k3, k4, k5, k6 = jax.random.split(key, 6)
        self.w1 = 0.1 * jax.random.normal(k1, (3, 3, cin, c1), jnp.float32)
        self.s1 = 1.0 + 0.05 * jax.random.normal(k2, (c1,), jnp.float32)
        self.b1 = 0.05 * jax.random.normal(k3, (c1,), jnp.float32)
        self.w2 = 0.1 * jax.random.normal(k4, (3, 3, c1, c2), jnp.float32)
        self.s2 = 1.0 + 0.05 * jax.random.normal(k5, (c2,), jnp.float32)
        self.b2 = 0.05 * jax.random.normal(k6, (c2,), jnp.float32)

    def __call__(self, x_nchw, ret_layers=None):
        f1, f2 = teacher_forward_pallas(x_nchw, self.w1, self.s1, self.b1,
                                        self.w2, self.s2, self.b2)
        feats = [f1, f2]
        if ret_layers is None:
            return feats[-1]
        return [feats[i] for i in ret_layers]


# ----------------------------------------------------------------------------
# DistillLayer: same control flow as the PyTorch module.
# ----------------------------------------------------------------------------
class DistillLayer:
    def __init__(self, emb_func, is_distill, emb_func_path=None):
        # TODO(synk): torch.load(emb_func_path) checkpoint loading has no Pallas
        # equivalent; the teacher keeps its deterministic synthetic weights.
        self.emb_func = (
            emb_func if (is_distill and emb_func_path is not None) else None)

    def forward(self, x, ret_layers=None):
        if self.emb_func is not None:
            out = self.emb_func(x, ret_layers)
            # frozen teacher (@torch.no_grad()): block gradients through it.
            return jax.tree_util.tree_map(jax.lax.stop_gradient, out)
        return None


# ----------------------------------------------------------------------------
# Plain-XLA reference (for the numerical sanity check in __main__).
# ----------------------------------------------------------------------------
def _teacher_forward_reference(x_nchw, w1, s1, b1, w2, s2, b2):
    x = jnp.transpose(x_nchw, (0, 2, 3, 1))

    def block(xin, w, s, b):
        y = jax.lax.conv_general_dilated(
            xin, w, window_strides=(1, 1), padding=((1, 1), (1, 1)),
            dimension_numbers=("NHWC", "HWIO", "NHWC"),
            precision=jax.lax.Precision.HIGHEST)
        y = jnp.maximum(y * s + b, 0.0)
        n, hh, ww, c = y.shape
        return jnp.max(y.reshape(n, hh // 2, 2, ww // 2, 2, c), axis=(2, 4))

    f1 = block(x, w1, s1, b1)
    f2 = block(f1, w2, s2, b2)
    return (jnp.transpose(f1, (0, 3, 1, 2)), jnp.transpose(f2, (0, 3, 1, 2)))


if __name__ == "__main__":
    key = jax.random.PRNGKey(0)
    kx, kp = jax.random.split(key)

    teacher = ConvEmbedding(kp, cin=4, c1=16, c2=32)
    distill = DistillLayer(teacher, is_distill=True, emb_func_path="synthetic")

    x = jax.random.normal(kx, (2, 4, 16, 16), jnp.float32)   # NCHW input

    out = jax.block_until_ready(distill.forward(x, ret_layers=[0, 1]))
    assert out[0].shape == (2, 16, 8, 8)
    assert out[1].shape == (2, 32, 4, 4)

    final = jax.block_until_ready(distill.forward(x))
    assert final.shape == (2, 32, 4, 4)

    # Non-distill path returns None, exactly like the PyTorch module.
    assert DistillLayer(teacher, is_distill=False).forward(x) is None

    # Numerical check of the fused Pallas teacher against a plain-XLA reference.
    r1, r2 = _teacher_forward_reference(x, teacher.w1, teacher.s1, teacher.b1,
                                        teacher.w2, teacher.s2, teacher.b2)
    assert jnp.allclose(out[0], r1, atol=3e-2, rtol=3e-2)
    assert jnp.allclose(out[1], r2, atol=3e-2, rtol=3e-2)

    print("KERNEL_OK")
</pallas_src>

<mosaic_0001>
module attributes {stable_mosaic.version = 11 : i64} {
  func.func @_teacher_fused_kernel(%arg0: i32, %arg1: memref<1x16x16x4xf32, #tpu.memory_space<vmem>>, %arg2: memref<36x16xf32, #tpu.memory_space<vmem>>, %arg3: memref<1x16xf32, #tpu.memory_space<vmem>>, %arg4: memref<1x16xf32, #tpu.memory_space<vmem>>, %arg5: memref<144x32xf32, #tpu.memory_space<vmem>>, %arg6: memref<1x32xf32, #tpu.memory_space<vmem>>, %arg7: memref<1x32xf32, #tpu.memory_space<vmem>>, %arg8: memref<1x8x128xf32, #tpu.memory_space<vmem>>, %arg9: memref<1x4x128xf32, #tpu.memory_space<vmem>>, %arg10: memref<18x18x4xf32, #tpu.memory_space<vmem>>, %arg11: memref<10x10x16xf32, #tpu.memory_space<vmem>>) attributes {dimension_semantics = [#tpu.dimension_semantics<parallel>], iteration_bounds = array<i64: 2>, scalar_prefetch = 0 : i64, scratch_operands = 2 : i64, tpu.core_type = #tpu.core_type<tc>, window_params = [{transform_indices = @transform_0, window_bounds = array<i64: 1, 16, 16, 4>}, {pipeline_mode = #tpu.pipeline_mode<synchronous>, transform_indices = @transform_1, window_bounds = array<i64: 36, 16>}, {pipeline_mode = #tpu.pipeline_mode<synchronous>, transform_indices = @transform_2, window_bounds = array<i64: 1, 16>}, {pipeline_mode = #tpu.pipeline_mode<synchronous>, transform_indices = @transform_3, window_bounds = array<i64: 1, 16>}, {pipeline_mode = #tpu.pipeline_mode<synchronous>, transform_indices = @transform_4, window_bounds = array<i64: 144, 32>}, {pipeline_mode = #tpu.pipeline_mode<synchronous>, transform_indices = @transform_5, window_bounds = array<i64: 1, 32>}, {pipeline_mode = #tpu.pipeline_mode<synchronous>, transform_indices = @transform_6, window_bounds = array<i64: 1, 32>}, {transform_indices = @transform_7, window_bounds = array<i64: 1, 8, 128>}, {transform_indices = @transform_8, window_bounds = array<i64: 1, 4, 128>}]} {
    %c0 = arith.constant 0 : index
    %c0_0 = arith.constant 0 : index
    %c0_1 = arith.constant 0 : index
    %c0_2 = arith.constant 0 : index
    %0 = vector.load %arg1[%c0, %c0_0, %c0_1, %c0_2] : memref<1x16x16x4xf32, #tpu.memory_space<vmem>>, vector<1x16x16x4xf32>
    %1 = vector.shape_cast %0 : vector<1x16x16x4xf32> to vector<16x16x4xf32>
    %cst = arith.constant 0.000000e+00 : f32
    %2 = vector.broadcast %cst : f32 to vector<18x18x4xf32>
    %c0_3 = arith.constant 0 : index
    %c0_4 = arith.constant 0 : index
    %c0_5 = arith.constant 0 : index
    %3 = vector.load %arg10[%c0_3, %c0_4, %c0_5] : memref<18x18x4xf32, #tpu.memory_space<vmem>>, vector<18x18x4xf32>
    tpu.vector_store %arg10[%c0_3, %c0_4, %c0_5], %2 {strides = array<i32>} : memref<18x18x4xf32, #tpu.memory_space<vmem>>, vector<18x18x4xf32>,
    %c1 = arith.constant 1 : index
    %c1_6 = arith.constant 1 : index
    %c0_7 = arith.constant 0 : index
    %4 = vector.load %arg10[%c1, %c1_6, %c0_7] : memref<18x18x4xf32, #tpu.memory_space<vmem>>, vector<16x16x4xf32>
    tpu.vector_store %arg10[%c1, %c1_6, %c0_7], %1 {strides = array<i32>} : memref<18x18x4xf32, #tpu.memory_space<vmem>>, vector<16x16x4xf32>,
    %c0_8 = arith.constant 0 : index
    %c0_9 = arith.constant 0 : index
    %c0_10 = arith.constant 0 : index
    %5 = vector.load %arg10[%c0_8, %c0_9, %c0_10] : memref<18x18x4xf32, #tpu.memory_space<vmem>>, vector<18x18x4xf32>
    %6 = vector.extract_strided_slice %5 {offsets = [0, 0, 0], sizes = [16, 16, 4], strides = [1, 1, 1]} : vector<18x18x4xf32> to vector<16x16x4xf32>
    %7 = vector.extract_strided_slice %5 {offsets = [0, 1, 0], sizes = [16, 16, 4], strides = [1, 1, 1]} : vector<18x18x4xf32> to vector<16x16x4xf32>
    %8 = vector.extract_strided_slice %5 {offsets = [0, 2, 0], sizes = [16, 16, 4], strides = [1, 1, 1]} : vector<18x18x4xf32> to vector<16x16x4xf32>
    %9 = vector.extract_strided_slice %5 {offsets = [1, 0, 0], sizes = [16, 16, 4], strides = [1, 1, 1]} : vector<18x18x4xf32> to vector<16x16x4xf32>
    %10 = vector.extract_strided_slice %5 {offsets = [1, 1, 0], sizes = [16, 16, 4], strides = [1, 1, 1]} : vector<18x18x4xf32> to vector<16x16x4xf32>
    %11 = vector.extract_strided_slice %5 {offsets = [1, 2, 0], sizes = [16, 16, 4], strides = [1, 1, 1]} : vector<18x18x4xf32> to vector<16x16x4xf32>
    %12 = vector.extract_strided_slice %5 {offsets = [2, 0, 0], sizes = [16, 16, 4], strides = [1, 1, 1]} : vector<18x18x4xf32> to vector<16x16x4xf32>
    %13 = vector.extract_strided_slice %5 {offsets = [2, 1, 0], sizes = [16, 16, 4], strides = [1, 1, 1]} : vector<18x18x4xf32> to vector<16x16x4xf32>
    %14 = vector.extract_strided_slice %5 {offsets = [2, 2, 0], sizes = [16, 16, 4], strides = [1, 1, 1]} : vector<18x18x4xf32> to vector<16x16x4xf32>
    %15 = tpu.concatenate %6, %7, %8, %9, %10, %11, %12, %13, %14 in 2 : vector<16x16x4xf32>, vector<16x16x4xf32>, vector<16x16x4xf32>, vector<16x16x4xf32>, vector<16x16x4xf32>, vector<16x16x4xf32>, vector<16x16x4xf32>, vector<16x16x4xf32>, vector<16x16x4xf32> -> vector<16x16x36xf32>
    %16 = vector.shape_cast %15 : vector<16x16x36xf32> to vector<256x36xf32>
    %c0_11 = arith.constant 0 : index
    %c0_12 = arith.constant 0 : index
    %17 = vector.load %arg2[%c0_11, %c0_12] : memref<36x16xf32, #tpu.memory_space<vmem>>, vector<36x16xf32>
    %cst_13 = arith.constant dense<0.000000e+00> : vector<256x16xf32>
    %18 = tpu.matmul %16, %17, %cst_13 {dimension_numbers = #tpu.dot_dimension_numbers<[1], [0], [0], [1], [0, 0, 1, 1], [], []>} : vector<256x36xf32>, vector<36x16xf32>, vector<256x16xf32> -> vector<256x16xf32>
    %c0_14 = arith.constant 0 : index
    %c0_15 = arith.constant 0 : index
    %19 = vector.load %arg3[%c0_14, %c0_15] : memref<1x16xf32, #tpu.memory_space<vmem>>, vector<1x16xf32>
    %20 = vector.shape_cast %19 : vector<1x16xf32> to vector<16xf32>
    %21 = vector.shape_cast %20 : vector<16xf32> to vector<1x16xf32>
    %22 = vector.broadcast %21 : vector<1x16xf32> to vector<256x16xf32>
    %23 = arith.mulf %18, %22 : vector<256x16xf32>
    %c0_16 = arith.constant 0 : index
    %c0_17 = arith.constant 0 : index
    %24 = vector.load %arg4[%c0_16, %c0_17] : memref<1x16xf32, #tpu.memory_space<vmem>>, vector<1x16xf32>
    %25 = vector.shape_cast %24 : vector<1x16xf32> to vector<16xf32>
    %26 = vector.shape_cast %25 : vector<16xf32> to vector<1x16xf32>
    %27 = vector.broadcast %26 : vector<1x16xf32> to vector<256x16xf32>
    %28 = arith.addf %23, %27 : vector<256x16xf32>
    %cst_18 = arith.constant 0.000000e+00 : f32
    %29 = vector.broadcast %cst_18 : f32 to vector<256x16xf32>
    %30 = arith.maximumf %28, %29 : vector<256x16xf32>
    %31 = vector.shape_cast %30 : vector<256x16xf32> to vector<128x2x16xf32>
    %cst_19 = arith.constant dense<0xFF800000> : vector<128x16xf32>
    %32 = vector.multi_reduction <maximumf>, %31, %cst_19 [1] : vector<128x2x16xf32> to vector<128x16xf32>
    %33 = vector.shape_cast %32 : vector<128x16xf32> to vector<8x2x8x16xf32>
    %cst_20 = arith.constant dense<0xFF800000> : vector<8x8x16xf32>
    %34 = vector.multi_reduction <maximumf>, %33, %cst_20 [1] : vector<8x2x8x16xf32> to vector<8x8x16xf32>
    %35 = vector.shape_cast %34 : vector<8x8x16xf32> to vector<8x128xf32>
    %c0_21 = arith.constant 0 : index
    %c0_22 = arith.constant 0 : index
    %c0_23 = arith.constant 0 : index
    %36 = vector.load %arg8[%c0_21, %c0_22, %c0_23] : memref<1x8x128xf32, #tpu.memory_space<vmem>>, vector<1x8x128xf32>
    %37 = vector.shape_cast %36 : vector<1x8x128xf32> to vector<8x128xf32>
    %38 = vector.shape_cast %35 : vector<8x128xf32> to vector<1x8x128xf32>
    tpu.vector_store %arg8[%c0_21, %c0_22, %c0_23], %38 {strides = array<i32>} : memref<1x8x128xf32, #tpu.memory_space<vmem>>, vector<1x8x128xf32>,
    %cst_24 = arith.constant 0.000000e+00 : f32
    %39 = vector.broadcast %cst_24 : f32 to vector<10x10x16xf32>
    %c0_25 = arith.constant 0 : index
    %c0_26 = arith.constant 0 : index
    %c0_27 = arith.constant 0 : index
    %40 = vector.load %arg11[%c0_25, %c0_26, %c0_27] : memref<10x10x16xf32, #tpu.memory_space<vmem>>, vector<10x10x16xf32>
    tpu.vector_store %arg11[%c0_25, %c0_26, %c0_27], %39 {strides = array<i32>} : memref<10x10x16xf32, #tpu.memory_space<vmem>>, vector<10x10x16xf32>,
    %c1_28 = arith.constant 1 : index
    %c1_29 = arith.constant 1 : index
    %c0_30 = arith.constant 0 : index
    %41 = vector.load %arg11[%c1_28, %c1_29, %c0_30] : memref<10x10x16xf32, #tpu.memory_space<vmem>>, vector<8x8x16xf32>
    tpu.vector_store %arg11[%c1_28, %c1_29, %c0_30], %34 {strides = array<i32>} : memref<10x10x16xf32, #tpu.memory_space<vmem>>, vector<8x8x16xf32>,
    %c0_31 = arith.constant 0 : index
    %c0_32 = arith.constant 0 : index
    %c0_33 = arith.constant 0 : index
    %42 = vector.load %arg11[%c0_31, %c0_32, %c0_33] : memref<10x10x16xf32, #tpu.memory_space<vmem>>, vector<10x10x16xf32>
    %43 = vector.extract_strided_slice %42 {offsets = [0, 0, 0], sizes = [8, 8, 16], strides = [1, 1, 1]} : vector<10x10x16xf32> to vector<8x8x16xf32>
    %44 = vector.extract_strided_slice %42 {offsets = [0, 1, 0], sizes = [8, 8, 16], strides = [1, 1, 1]} : vector<10x10x16xf32> to vector<8x8x16xf32>
    %45 = vector.extract_strided_slice %42 {offsets = [0, 2, 0], sizes = [8, 8, 16], strides = [1, 1, 1]} : vector<10x10x16xf32> to vector<8x8x16xf32>
    %46 = vector.extract_strided_slice %42 {offsets = [1, 0, 0], sizes = [8, 8, 16], strides = [1, 1, 1]} : vector<10x10x16xf32> to vector<8x8x16xf32>
    %47 = vector.extract_strided_slice %42 {offsets = [1, 1, 0], sizes = [8, 8, 16], strides = [1, 1, 1]} : vector<10x10x16xf32> to vector<8x8x16xf32>
    %48 = vector.extract_strided_slice %42 {offsets = [1, 2, 0], sizes = [8, 8, 16], strides = [1, 1, 1]} : vector<10x10x16xf32> to vector<8x8x16xf32>
    %49 = vector.extract_strided_slice %42 {offsets = [2, 0, 0], sizes = [8, 8, 16], strides = [1, 1, 1]} : vector<10x10x16xf32> to vector<8x8x16xf32>
    %50 = vector.extract_strided_slice %42 {offsets = [2, 1, 0], sizes = [8, 8, 16], strides = [1, 1, 1]} : vector<10x10x16xf32> to vector<8x8x16xf32>
    %51 = vector.extract_strided_slice %42 {offsets = [2, 2, 0], sizes = [8, 8, 16], strides = [1, 1, 1]} : vector<10x10x16xf32> to vector<8x8x16xf32>
    %52 = tpu.concatenate %43, %44, %45, %46, %47, %48, %49, %50, %51 in 2 : vector<8x8x16xf32>, vector<8x8x16xf32>, vector<8x8x16xf32>, vector<8x8x16xf32>, vector<8x8x16xf32>, vector<8x8x16xf32>, vector<8x8x16xf32>, vector<8x8x16xf32>, vector<8x8x16xf32> -> vector<8x8x144xf32>
    %53 = vector.shape_cast %52 : vector<8x8x144xf32> to vector<64x144xf32>
    %c0_34 = arith.constant 0 : index
    %c0_35 = arith.constant 0 : index
    %54 = vector.load %arg5[%c0_34, %c0_35] : memref<144x32xf32, #tpu.memory_space<vmem>>, vector<144x32xf32>
    %cst_36 = arith.constant dense<0.000000e+00> : vector<64x32xf32>
    %55 = tpu.matmul %53, %54, %cst_36 {dimension_numbers = #tpu.dot_dimension_numbers<[1], [0], [0], [1], [0, 0, 1, 1], [], []>} : vector<64x144xf32>, vector<144x32xf32>, vector<64x32xf32> -> vector<64x32xf32>
    %c0_37 = arith.constant 0 : index
    %c0_38 = arith.constant 0 : index
    %56 = vector.load %arg6[%c0_37, %c0_38] : memref<1x32xf32, #tpu.memory_space<vmem>>, vector<1x32xf32>
    %57 = vector.shape_cast %56 : vector<1x32xf32> to vector<32xf32>
    %58 = vector.shape_cast %57 : vector<32xf32> to vector<1x32xf32>
    %59 = vector.broadcast %58 : vector<1x32xf32> to vector<64x32xf32>
    %60 = arith.mulf %55, %59 : vector<64x32xf32>
    %c0_39 = arith.constant 0 : index
    %c0_40 = arith.constant 0 : index
    %61 = vector.load %arg7[%c0_39, %c0_40] : memref<1x32xf32, #tpu.memory_space<vmem>>, vector<1x32xf32>
    %62 = vector.shape_cast %61 : vector<1x32xf32> to vector<32xf32>
    %63 = vector.shape_cast %62 : vector<32xf32> to vector<1x32xf32>
    %64 = vector.broadcast %63 : vector<1x32xf32> to vector<64x32xf32>
    %65 = arith.addf %60, %64 : vector<64x32xf32>
    %cst_41 = arith.constant 0.000000e+00 : f32
    %66 = vector.broadcast %cst_41 : f32 to vector<64x32xf32>
    %67 = arith.maximumf %65, %66 : vector<64x32xf32>
    %68 = vector.shape_cast %67 : vector<64x32xf32> to vector<32x2x32xf32>
    %cst_42 = arith.constant dense<0xFF800000> : vector<32x32xf32>
    %69 = vector.multi_reduction <maximumf>, %68, %cst_42 [1] : vector<32x2x32xf32> to vector<32x32xf32>
    %70 = vector.shape_cast %69 : vector<32x32xf32> to vector<4x2x4x32xf32>
    %cst_43 = arith.constant dense<0xFF800000> : vector<4x4x32xf32>
    %71 = vector.multi_reduction <maximumf>, %70, %cst_43 [1] : vector<4x2x4x32xf32> to vector<4x4x32xf32>
    %72 = vector.shape_cast %71 : vector<4x4x32xf32> to vector<4x128xf32>
    %c0_44 = arith.constant 0 : index
    %c0_45 = arith.constant 0 : index
    %c0_46 = arith.constant 0 : index
    %73 = vector.load %arg9[%c0_44, %c0_45, %c0_46] : memref<1x4x128xf32, #tpu.memory_space<vmem>>, vector<1x4x128xf32>
    %74 = vector.shape_cast %73 : vector<1x4x128xf32> to vector<4x128xf32>
    %75 = vector.shape_cast %72 : vector<4x128xf32> to vector<1x4x128xf32>
    tpu.vector_store %arg9[%c0_44, %c0_45, %c0_46], %75 {strides = array<i32>} : memref<1x4x128xf32, #tpu.memory_space<vmem>>, vector<1x4x128xf32>,
    return
  }
  func.func @transform_0(%arg0: i32) -> (i32, i32, i32, i32) {
    %c0_i32 = arith.constant 0 : i32
    %c0_i32_0 = arith.constant 0 : i32
    %c0_i32_1 = arith.constant 0 : i32
    %c0_i32_2 = arith.constant 0 : i32
    return %arg0, %c0_i32, %c0_i32_0, %c0_i32_1 : i32, i32, i32, i32
  }
  func.func @transform_1(%arg0: i32) -> (i32, i32) {
    %c0_i32 = arith.constant 0 : i32
    %c0_i32_0 = arith.constant 0 : i32
    %c0_i32_1 = arith.constant 0 : i32
    return %c0_i32, %c0_i32_0 : i32, i32
  }
  func.func @transform_2(%arg0: i32) -> (i32, i32) {
    %c0_i32 = arith.constant 0 : i32
    %c0_i32_0 = arith.constant 0 : i32
    %c0_i32_1 = arith.constant 0 : i32
    return %c0_i32, %c0_i32_0 : i32, i32
  }
  func.func @transform_3(%arg0: i32) -> (i32, i32) {
    %c0_i32 = arith.constant 0 : i32
    %c0_i32_0 = arith.constant 0 : i32
    %c0_i32_1 = arith.constant 0 : i32
    return %c0_i32, %c0_i32_0 : i32, i32
  }
  func.func @transform_4(%arg0: i32) -> (i32, i32) {
    %c0_i32 = arith.constant 0 : i32
    %c0_i32_0 = arith.constant 0 : i32
    %c0_i32_1 = arith.constant 0 : i32
    return %c0_i32, %c0_i32_0 : i32, i32
  }
  func.func @transform_5(%arg0: i32) -> (i32, i32) {
    %c0_i32 = arith.constant 0 : i32
    %c0_i32_0 = arith.constant 0 : i32
    %c0_i32_1 = arith.constant 0 : i32
    return %c0_i32, %c0_i32_0 : i32, i32
  }
  func.func @transform_6(%arg0: i32) -> (i32, i32) {
    %c0_i32 = arith.constant 0 : i32
    %c0_i32_0 = arith.constant 0 : i32
    %c0_i32_1 = arith.constant 0 : i32
    return %c0_i32, %c0_i32_0 : i32, i32
  }
  func.func @transform_7(%arg0: i32) -> (i32, i32, i32) {
    %c0_i32 = arith.constant 0 : i32
    %c0_i32_0 = arith.constant 0 : i32
    %c0_i32_1 = arith.constant 0 : i32
    return %arg0, %c0_i32, %c0_i32_0 : i32, i32, i32
  }
  func.func @transform_8(%arg0: i32) -> (i32, i32, i32) {
    %c0_i32 = arith.constant 0 : i32
    %c0_i32_0 = arith.constant 0 : i32
    %c0_i32_1 = arith.constant 0 : i32
    return %arg0, %c0_i32, %c0_i32_0 : i32, i32, i32
  }
}

</mosaic_0001>

<bundles_post_ra>
// kernel: teacher_forward_pallas.1
= control target key start
LH: loop header
LB: loop body
LE: loop exit
PB: predicated region body
PF: predicated region fallthrough
CT: control target
= control target key end

     0   :  { %s5845_s27 = smov 0   ;;  %s8774_s0 = inlined_call_operand.vmem [shape: f32[2,16,16,4], index: 0, kind: input, shape index: {}]   ;;  %s8775_s1 = inlined_call_operand.vmem [shape: f32[36,16], index: 1, kind: input, shape index: {}]   ;;  %s8776_s2 = inlined_call_operand.vmem [shape: f32[1,16], index: 2, kind: input, shape index: {}]   ;;  %s8777_s3 = inlined_call_operand.vmem [shape: f32[1,16], index: 3, kind: input, shape index: {}]   ;;  %s8778_s4 = inlined_call_operand.vmem [shape: f32[144,32], index: 4, kind: input, shape index: {}]   ;;  %s8779_s5 = inlined_call_operand.vmem [shape: f32[1,32], index: 5, kind: input, shape index: {}]   ;;  %s8780_s6 = inlined_call_operand.vmem [shape: f32[1,32], index: 6, kind: input, shape index: {}]   ;;  %s8781_s7 = inlined_call_operand.vmem [shape: f32[2,8,128], index: 7, kind: output, shape index: {0}]   ;;  %s8782_s8 = inlined_call_operand.vmem [shape: f32[2,4,128], index: 8, kind: output, shape index: {1}]  }
   0x1 LB: > { %s5448_s28 = sadd.s32 4294967295, %s5782_s27   ;;  %p5452_p0 = scmp.ge.s32.totalorder %s5782_s27, 1  ;;  %s5782_s27 = sphi %s5845_s27, %s19_s27  }
   0x2   : > { %p265_p1 = scmp.lt.s32.totalorder %s5782_s27, 3 }
   0x4   : > { %p266_p2 = pnand %p5452_p0, %p265_p1 }
   0x5   : > { %p5927_p3 = scmp.lt.s32.totalorder (!%p266_p2), %s5448_s28, 1  ;;  %s5785_s12 = smov (!%p266_p2), 8  }
   0x6   : > { %269 = sbr.rel (%p266_p2) target bundleno = 1402 (0x57a), region = 48  ;;  %s5786_s13 = smov (!%p266_p2), 4  }
   0x7   : > { %s5787_s14 = smov (!%p266_p2), 12   ;;  %s5788_s15 = smov (!%p266_p2), 16  }
   0x8   : > { %s5789_s16 = smov (!%p266_p2), 20   ;;  %s5790_s17 = smov (!%p266_p2), 24  }
   0x9   : > { %s5791_s26 = smov (!%p266_p2), 28   ;;  %s5792_s9 = smov (!%p266_p2), 32  }
   0xa   : > { %s5796_s21 = smov (!%p266_p2), 80   ;;  %s5798_s10 = smov (!%p266_p2), 112  }
   0xb   : > { %vm8789_vm0 = vcmask 31744   ;;  %v8783_v0 = vmov 0.0   ;;  %vm350_vm1 = vcmask 25600   ;;  %s8876_s28 = smov (!%p5927_p3, %s5448_s28), 1  ;;  %vm715_vm2 = vcmask 1045504   ;;  %v1760_v44 = vld [vmem:[%s8775_s1 + $0x18] sm:$0xff] }
   0xc   : > { %348 = vst.msk [vmem:[#allocation2] sm:$0xff] %vm8789_vm0, %v8783_v0  ;;  %349 = vst.msk [vmem:[#allocation2 + $0x8] sm:$0xff] %vm8789_vm0, %v8783_v0  ;;  %4690 = vmatprep.subr.mxu1 %v8783_v0  ;;  %s5504_s30 = sshll.u32 %s8876_s28, 8  ;;  %vm538_vm3 = vcmask 1046528   ;;  %vm1592_vm4 = vcmask 130048   ;;  %vm1859_vm5 = vcmask 1043456  }
   0xd   : > { %352 = vst.msk [vmem:[#allocation2 + $0x18] sm:$0xff] %vm8789_vm0, %v8783_v0  ;;  %353 = vst.msk [vmem:[#allocation2 + $0x20] sm:$0xff] %vm8789_vm0, %v8783_v0  ;;  %s5978_s11 = scalar_lea.vmem %s8774_s0, %s5504_s30  ;;  %v1761_v41 = vld [vmem:[%s8775_s1 + $0x20] sm:$0xf]  ;;  %v1759_v46 = vld [vmem:[%s8775_s1 + $0x10] sm:$0xff]  ;;  %vm8788_vm6 = vcmask 64512  }
   0xe   : > { %355 = vst.msk [vmem:[#allocation2 + $0x30] sm:$0xff] %vm8789_vm0, %v8783_v0  ;;  %356 = vst.msk [vmem:[#allocation2 + $0x38] sm:$0xff] %vm8789_vm0, %v8783_v0  ;;  %v315_v1 = vld [vmem:[%s5978_s11] sm:$0xff]  ;;  %v316_v2 = vld [vmem:[%s5978_s11 + $0x8] sm:$0xff]  ;;  %5542 = vmatprep.subr.msk.mxu0 %vm1859_vm5, %v1761_v41  ;;  %vm8787_vm7 = vcmask 97280   ;;  %vm1625_vm8 = vcmask 162816  }
   0xf   : > { %358 = vst.msk [vmem:[#allocation2 + $0x48] sm:$0xff] %vm8789_vm0, %v8783_v0  ;;  %359 = vst.msk [vmem:[#allocation2 + $0x50] sm:$0xff] %vm8789_vm0, %v8783_v0  ;;  %v317_v3 = vld [vmem:[%s5978_s11 + $0x10] sm:$0xff]  ;;  %v318_v6 = vld [vmem:[%s5978_s11 + $0x18] sm:$0xff]  ;;  %5543 = vmatpush3.msk.msra.mxu0 %vm1859_vm5, %v1761_v41  ;;  %vm1658_vm9 = vcmask 195584   ;;  %vm1691_vm10 = vcmask 228352  }
  0x10   : > { %361 = vst.msk [vmem:[#allocation2 + $0x60] sm:$0xff] %vm8789_vm0, %v8783_v0  ;;  %362 = vst.msk [vmem:[#allocation2 + $0x68] sm:$0xff] %vm8789_vm0, %v8783_v0  ;;  %v319_v14 = vld [vmem:[%s5978_s11 + $0x20] sm:$0xff]  ;;  %v320_v15 = vld [vmem:[%s5978_s11 + $0x28] sm:$0xff]  ;;  %5544 = vmatprep.subr.mxu0 %v1760_v44  ;;  %vm1724_vm11 = vcmask 261120   ;;  %vm1762_vm12 = vcmask 293888  }
  0x11   : > { %364 = vst.msk [vmem:[#allocation2 + $0x78] sm:$0xff] %vm8789_vm0, %v8783_v0  ;;  %365 = vst.msk [vmem:[#allocation2 + $0x80] sm:$0xff] %vm8789_vm0, %v8783_v0  ;;  %v321_v16 = vld [vmem:[%s5978_s11 + $0x30] sm:$0xff]  ;;  %v322_v19 = vld [vmem:[%s5978_s11 + $0x38] sm:$0xff]  ;;  %5545 = vmatpush3.msra.mxu0 %v1760_v44  ;;  %vm2902_vm13 = vcmask 123904   ;;  %vm4055_vm14 = vcmask 1041409  }
  0x12   : > { %367 = vst.msk [vmem:[#allocation2 + $0x90] sm:$0xff] %vm8789_vm0, %v8783_v0  ;;  %368 = vst.msk [vmem:[#allocation2 + $0x98] sm:$0xff] %vm8789_vm0, %v8783_v0  ;;  %v323_v20 = vld [vmem:[%s5978_s11 + $0x40] sm:$0xff]  ;;  %v324_v21 = vld [vmem:[%s5978_s11 + $0x48] sm:$0xff]  ;;  %5546 = vmatprep.subr.mxu0 %v1759_v46  ;;  %vm4057_vm15 = vcmask 1042434   ;;  %vm8793_vm5 = vcmask 1044484  }
  0x13   : > { %370 = vst.msk [vmem:[#allocation2 + $0xa8] sm:$0xff] %vm8789_vm0, %v8783_v0  ;;  %371 = vst.msk [vmem:[#allocation2 + $0xb0] sm:$0xff] %vm8789_vm0, %v8783_v0  ;;  %v5983_v4 = vld [vmem:[#allocation2] sm:$0xff]  ;;  %v5985_v5 = vld [vmem:[#allocation2 + $0x8] sm:$0xff]  ;;  %5547 = vmatpush3.msra.mxu0 %v1759_v46  ;;  %s5797_s30 = smov 96  }
  0x14   : > { %373 = vst.msk [vmem:[#allocation2 + $0xc0] sm:$0xff] %vm8789_vm0, %v8783_v0  ;;  %374 = vst.msk [vmem:[#allocation2 + $0xc8] sm:$0xff] %vm8789_vm0, %v8783_v0  ;;  %v716_v7 = vrot.slane %v5983_v4, 2  ;;  %v717_v8 = vrot.slane %v5985_v5, 2  ;;  %v539_v9 = vrot.slane %v5983_v4, 1  ;;  %v540_v10 = vrot.slane %v5985_v5, 1 }
  0x15   : > { %376 = vst.msk [vmem:[#allocation2 + $0xd8] sm:$0xff] %vm8789_vm0, %v8783_v0  ;;  %377 = vst.msk [vmem:[#allocation2 + $0xe0] sm:$0xff] %vm8789_vm0, %v8783_v0  ;;  %v325_v35 = vld [vmem:[%s5978_s11 + $0x50] sm:$0xff]  ;;  %v326_v39 = vld [vmem:[%s5978_s11 + $0x58] sm:$0xff] }
  0x16   : > { %379 = vst.msk [vmem:[#allocation2 + $0xf0] sm:$0xff] %vm8789_vm0, %v8783_v0  ;;  %380 = vst.msk [vmem:[#allocation2 + $0xf8] sm:$0xff] %vm8789_vm0, %v8783_v0  ;;  %v718_v17 = vsel %vm715_vm2, %v716_v7, %v717_v8  ;;  %v541_v18 = vsel %vm538_vm3, %v539_v9, %v540_v10  ;;  %v1758_v48 = vld [vmem:[%s8775_s1 + $0x8] sm:$0xff]  ;;  %v1757_v52 = vld [vmem:[%s8775_s1] sm:$0xff] }
  0x17   : > { %382 = vst.msk [vmem:[#allocation2 + $0x108] sm:$0xff] %vm8789_vm0, %v8783_v0  ;;  %383 = vst.msk [vmem:[#allocation2 + $0x110] sm:$0xff] %vm8789_vm0, %v8783_v0  ;;  %796 = vrot.lane.b32.xlu1 %v718_v17, %s5785_s12  ;;  %619 = vrot.lane.b32.xlu0 %v541_v18, %s5786_s13  ;;  %v327_v57 = vld [vmem:[%s5978_s11 + $0x60] sm:$0xff]  ;;  %v328_v59 = vld [vmem:[%s5978_s11 + $0x68] sm:$0xff] }
  0x18   : > { %385 = vst.msk [vmem:[#allocation2 + $0x120] sm:$0xff] %vm8789_vm0, %v8783_v0  ;;  %386 = vst.msk [vmem:[#allocation2 + $0x128] sm:$0xff] %vm8789_vm0, %v8783_v0  ;;  %5548 = vmatprep.subr.mxu0 %v1758_v48 }
  0x19   : > { %388 = vst.msk [vmem:[#allocation2 + $0x138] sm:$0xff] %vm8789_vm0, %v8783_v0  ;;  %389 = vst.msk [vmem:[#allocation2 + $0x140] sm:$0xff] %vm8789_vm0, %v8783_v0  ;;  %5549 = vmatpush3.msra.mxu0 %v1758_v48 }
  0x1a   : > { %391 = vst.msk [vmem:[#allocation2 + $0x150] sm:$0xff] %vm8789_vm0, %v8783_v0  ;;  %392 = vst.msk [vmem:[#allocation2 + $0x158] sm:$0xff] %vm8789_vm0, %v8783_v0  ;;  %5550 = vmatprep.subr.mxu0 %v1757_v52 }
  0x1b   : > { %394 = vst.msk [vmem:[#allocation2 + $0x168] sm:$0xff] %vm8789_vm0, %v8783_v0  ;;  %395 = vst.msk [vmem:[#allocation2 + $0x170] sm:$0xff] %vm8789_vm0, %v8783_v0  ;;  %5551 = vmatpush3.msra.mxu0 %v1757_v52 }
  0x1c   : > { %397 = vst.msk [vmem:[#allocation2 + $0x180] sm:$0xff] %vm8789_vm0, %v8783_v0  ;;  %398 = vst.msk [vmem:[#allocation2 + $0x188] sm:$0xff] %vm8789_vm0, %v8783_v0 }
  0x1d   : > { %400 = vst.msk [vmem:[#allocation2 + $0x198] sm:$0xff] %vm8789_vm0, %v8783_v0  ;;  %401 = vst.msk [vmem:[#allocation2 + $0x1a0] sm:$0xff] %vm8789_vm0, %v8783_v0 }
  0x1e   : > { %351 = vst.msk [vmem:[#allocation2 + $0x10] sm:$0x3] %vm350_vm1, %v8783_v0  ;;  %354 = vst.msk [vmem:[#allocation2 + $0x28] sm:$0x3] %vm350_vm1, %v8783_v0 }
  0x1f   : > { %357 = vst.msk [vmem:[#allocation2 + $0x40] sm:$0x3] %vm350_vm1, %v8783_v0  ;;  %360 = vst.msk [vmem:[#allocation2 + $0x58] sm:$0x3] %vm350_vm1, %v8783_v0 }
  0x20   : > { %363 = vst.msk [vmem:[#allocation2 + $0x70] sm:$0x3] %vm350_vm1, %v8783_v0  ;;  %366 = vst.msk [vmem:[#allocation2 + $0x88] sm:$0x3] %vm350_vm1, %v8783_v0 }
  0x21   : > { %369 = vst.msk [vmem:[#allocation2 + $0xa0] sm:$0x3] %vm350_vm1, %v8783_v0  ;;  %372 = vst.msk [vmem:[#allocation2 + $0xb8] sm:$0x3] %vm350_vm1, %v8783_v0 }
  0x22   : > { %375 = vst.msk [vmem:[#allocation2 + $0xd0] sm:$0x3] %vm350_vm1, %v8783_v0  ;;  %378 = vst.msk [vmem:[#allocation2 + $0xe8] sm:$0x3] %vm350_vm1, %v8783_v0 }
  0x23   : > { %381 = vst.msk [vmem:[#allocation2 + $0x100] sm:$0x3] %vm350_vm1, %v8783_v0  ;;  %384 = vst.msk [vmem:[#allocation2 + $0x118] sm:$0x3] %vm350_vm1, %v8783_v0 }
  0x24   : > { %387 = vst.msk [vmem:[#allocation2 + $0x130] sm:$0x3] %vm350_vm1, %v8783_v0  ;;  %390 = vst.msk [vmem:[#allocation2 + $0x148] sm:$0x3] %vm350_vm1, %v8783_v0 }
  0x25   : > { %393 = vst.msk [vmem:[#allocation2 + $0x160] sm:$0x3] %vm350_vm1, %v8783_v0  ;;  %396 = vst.msk [vmem:[#allocation2 + $0x178] sm:$0x3] %vm350_vm1, %v8783_v0  ;;  %v438_v11 = vld [vmem:[#allocation2 + $0x10] sm:$0x3] }
  0x26   : > { %399 = vst.msk [vmem:[#allocation2 + $0x190] sm:$0x3] %vm350_vm1, %v8783_v0  ;;  %402 = vst.msk [vmem:[#allocation2 + $0x1a8] sm:$0x3] %vm350_vm1, %v8783_v0  ;;  %v719_v12 = vrot.slane %v438_v11, 2  ;;  %v542_v13 = vrot.slane %v438_v11, 1 }
  0x27   : > { %404 = vst.msk [vmem:[#allocation2 + $0x19] sm:$0xff] %vm8789_vm0, %v315_v1  ;;  %405 = vst.msk [vmem:[#allocation2 + $0x21] sm:$0xff] %vm8789_vm0, %v316_v2  ;;  %v329_v11 = vld [vmem:[%s5978_s11 + $0x70] sm:$0xff]  ;;  %vm8794_vm1 = vcmask 1043459  }
  0x28   : > { %406 = vst.msk [vmem:[#allocation2 + $0x31] sm:$0xff] %vm8789_vm0, %v317_v3  ;;  %407 = vst.msk [vmem:[#allocation2 + $0x39] sm:$0xff] %vm8789_vm0, %v318_v6  ;;  %v720_v22 = vsel %vm715_vm2, %v717_v8, %v719_v12  ;;  %v543_v23 = vsel %vm538_vm3, %v540_v10, %v542_v13  ;;  %v330_v13 = vld [vmem:[%s5978_s11 + $0x78] sm:$0xff] }
  0x29   : > { %408 = vst.msk [vmem:[#allocation2 + $0x49] sm:$0xff] %vm8789_vm0, %v319_v14  ;;  %409 = vst.msk [vmem:[#allocation2 + $0x51] sm:$0xff] %vm8789_vm0, %v320_v15  ;;  %798 = vrot.lane.b32.xlu1 %v720_v22, %s5785_s12  ;;  %621 = vrot.lane.b32.xlu0 %v543_v23, %s5786_s13 }
  0x2a   : > { %410 = vst.msk [vmem:[#allocation2 + $0x61] sm:$0xff] %vm8789_vm0, %v321_v16  ;;  %411 = vst.msk [vmem:[#allocation2 + $0x69] sm:$0xff] %vm8789_vm0, %v322_v19 }
  0x2b   : > { %4303 = vst.msk [vmem:[#allocation3] sm:$0xff] %vm1592_vm4, %v8783_v0  ;;  %4305 = vst.msk [vmem:[#allocation3 + $0x10] sm:$0xff] %vm1592_vm4, %v8783_v0 }
  0x2c   : > { %4307 = vst.msk [vmem:[#allocation3 + $0x20] sm:$0xff] %vm1592_vm4, %v8783_v0  ;;  %4309 = vst.msk [vmem:[#allocation3 + $0x30] sm:$0xff] %vm1592_vm4, %v8783_v0 }
  0x2d   : > { %4311 = vst.msk [vmem:[#allocation3 + $0x40] sm:$0xff] %vm1592_vm4, %v8783_v0  ;;  %4313 = vst.msk [vmem:[#allocation3 + $0x50] sm:$0xff] %vm1592_vm4, %v8783_v0 }
  0x2e   : > { %4315 = vst.msk [vmem:[#allocation3 + $0x60] sm:$0xff] %vm1592_vm4, %v8783_v0  ;;  %4317 = vst.msk [vmem:[#allocation3 + $0x70] sm:$0xff] %vm1592_vm4, %v8783_v0  ;;  %v6034_v24 = vld [vmem:[#allocation2 + $0x20] sm:$0xff]  ;;  %v6036_v25 = vld [vmem:[#allocation2 + $0x18] sm:$0xff] }
  0x2f   : > { %4319 = vst.msk [vmem:[#allocation3 + $0x80] sm:$0xff] %vm1592_vm4, %v8783_v0  ;;  %4321 = vst.msk [vmem:[#allocation3 + $0x90] sm:$0xff] %vm1592_vm4, %v8783_v0  ;;  %v544_v26 = vrot.slane %v6036_v25, 1  ;;  %v545_v27 = vrot.slane %v6034_v24, 1  ;;  %v441_v28 = vld [vmem:[#allocation2 + $0x28] sm:$0x3]  ;;  %896 = vrot.lane.b32.xlu1 %v6034_v24, %s5787_s14  ;;  %894 = vrot.lane.b32.xlu0 %v6036_v25, %s5787_s14 }
  0x30   : > { %412 = vst.msk [vmem:[#allocation2 + $0x79] sm:$0xff] %vm8789_vm0, %v323_v20  ;;  %413 = vst.msk [vmem:[#allocation2 + $0x81] sm:$0xff] %vm8789_vm0, %v324_v21  ;;  %v721_v30 = vrot.slane %v6036_v25, 2  ;;  %v722_v31 = vrot.slane %v6034_v24, 2  ;;  %v547_v32 = vrot.slane %v441_v28, 1  ;;  %v724_v36 = vrot.slane %v441_v28, 2 }
  0x31   : > { %v546_v29 = vsel %vm538_vm3, %v544_v26, %v545_v27  ;;  %414 = vst.msk [vmem:[#allocation2 + $0x91] sm:$0xff] %vm8789_vm0, %v325_v35  ;;  %v6059_v37 = vld [vmem:[#allocation2 + $0x30] sm:$0xff]  ;;  %v6063_v40 = vld [vmem:[#allocation2 + $0x38] sm:$0xff]  ;;  %415 = vst.msk [vmem:[#allocation2 + $0x99] sm:$0xff] %vm8789_vm0, %v326_v39 }
  0x32   : > { %v723_v33 = vsel %vm715_vm2, %v721_v30, %v722_v31  ;;  %v548_v34 = vsel %vm538_vm3, %v545_v27, %v547_v32  ;;  %v725_v38 = vsel %vm715_vm2, %v722_v31, %v724_v36  ;;  %v549_v42 = vrot.slane %v6059_v37, 1  ;;  %v444_v47 = vld [vmem:[#allocation2 + $0x40] sm:$0x3]  ;;  %416 = vst.msk [vmem:[#allocation2 + $0xa9] sm:$0xff] %vm8789_vm0, %v327_v57  ;;  %v6111_v58 = vld [vmem:[#allocation2 + $0x48] sm:$0xff]  ;;  %v6114_v60 = vld [vmem:[#allocation2 + $0x50] sm:$0xff] }
  0x33   : > { %623 = vrot.lane.b32.xlu1 %v546_v29, %s5786_s13  ;;  %996 = vrot.lane.b32.xlu0 %v546_v29, %s5788_s15  ;;  %v550_v43 = vrot.slane %v6063_v40, 1  ;;  %v726_v49 = vrot.slane %v6059_v37, 2  ;;  %v727_v50 = vrot.slane %v6063_v40, 2  ;;  %v552_v51 = vrot.slane %v444_v47, 1  ;;  %417 = vst.msk [vmem:[#allocation2 + $0xb1] sm:$0xff] %vm8789_vm0, %v328_v59  ;;  %418 = vst.msk [vmem:[#allocation2 + $0xc1] sm:$0xff] %vm8789_vm0, %v329_v11 }
  0x34   : > { %v729_v55 = vrot.slane %v444_v47, 2  ;;  %v554_v61 = vrot.slane %v6111_v58, 1  ;;  %v555_v62 = vrot.slane %v6114_v60, 1  ;;  %v447_v1 = vld [vmem:[#allocation2 + $0x58] sm:$0x3]  ;;  %v731_v2 = vrot.slane %v6111_v58, 2 }
  0x35   : > { %v551_v45 = vsel %vm538_vm3, %v549_v42, %v550_v43  ;;  %v728_v53 = vsel %vm715_vm2, %v726_v49, %v727_v50  ;;  %v553_v54 = vsel %vm538_vm3, %v550_v43, %v552_v51  ;;  %v732_v3 = vrot.slane %v6114_v60, 2  ;;  %v6147_v12 = vld [vmem:[#allocation2 + $0x60] sm:$0xff]  ;;  %v6150_v14 = vld [vmem:[#allocation2 + $0x68] sm:$0xff]  ;;  %419 = vst.msk [vmem:[#allocation2 + $0xc9] sm:$0xff] %vm8789_vm0, %v330_v13  ;;  %v450_v18 = vld [vmem:[#allocation2 + $0x70] sm:$0x3] }
  0x36   : > { %v730_v56 = vsel %vm715_vm2, %v727_v50, %v729_v55  ;;  %v556_v63 = vsel %vm538_vm3, %v554_v61, %v555_v62  ;;  %v557_v6 = vrot.slane %v447_v1, 1  ;;  %v734_v9 = vrot.slane %v447_v1, 2  ;;  %v331_v28 = vld [vmem:[%s5978_s11 + $0x80] sm:$0xff]  ;;  %v332_v32 = vld [vmem:[%s5978_s11 + $0x88] sm:$0xff]  ;;  %4304 = vst.msk [vmem:[#allocation3 + $0x8] sm:$0x3] %vm2902_vm13, %v8783_v0 }
  0x37   : > { %1097 = vrot.lane.b32.xlu1 %v723_v33, %s5789_s16  ;;  %998 = vrot.lane.b32.xlu0 %v548_v34, %s5788_s15  ;;  %v733_v7 = vsel %vm715_vm2, %v731_v2, %v732_v3  ;;  %v559_v15 = vrot.slane %v6147_v12, 1  ;;  %v560_v16 = vrot.slane %v6150_v14, 1  ;;  %v736_v19 = vrot.slane %v6147_v12, 2  ;;  %420 = vst.msk [vmem:[#allocation2 + $0xd9] sm:$0xff] %vm8789_vm0, %v331_v28  ;;  %v6183_v31 = vld [vmem:[#allocation2 + $0x78] sm:$0xff]  ;;  %v6190_v35 = vld [vmem:[#allocation2 + $0x80] sm:$0xff] }
  0x38   : > { %v558_v8 = vsel %vm538_vm3, %v555_v62, %v557_v6  ;;  %v735_v10 = vsel %vm715_vm2, %v732_v3, %v734_v9  ;;  %v737_v20 = vrot.slane %v6150_v14, 2  ;;  %v562_v21 = vrot.slane %v450_v18, 1  ;;  %421 = vst.msk [vmem:[#allocation2 + $0xe1] sm:$0xff] %vm8789_vm0, %v332_v32  ;;  %v6248_v11 = vld [vmem:[#allocation2 + $0x98] sm:$0xff] }
  0x39   : > { %v561_v17 = vsel %vm538_vm3, %v559_v15, %v560_v16  ;;  %v739_v26 = vrot.slane %v450_v18, 2  ;;  %v564_v36 = vrot.slane %v6183_v31, 1  ;;  %v741_v46 = vrot.slane %v6183_v31, 2  ;;  %4306 = vst.msk [vmem:[#allocation3 + $0x18] sm:$0x3] %vm2902_vm13, %v8783_v0 }
  0x3a   : > { %v738_v22 = vsel %vm715_vm2, %v736_v19, %v737_v20  ;;  %v563_v23 = vsel %vm538_vm3, %v560_v16, %v562_v21  ;;  %v742_v47 = vrot.slane %v6190_v35, 2  ;;  %v570_v18 = vrot.slane %v6248_v11, 1  ;;  %4308 = vst.msk [vmem:[#allocation3 + $0x28] sm:$0x3] %vm2902_vm13, %v8783_v0  ;;  %4310 = vst.msk [vmem:[#allocation3 + $0x38] sm:$0x3] %vm2902_vm13, %v8783_v0 }
  0x3b   : > { %800 = vrot.lane.b32.xlu1 %v723_v33, %s5785_s12  ;;  %625 = vrot.lane.b32.xlu0 %v548_v34, %s5786_s13  ;;  %v740_v27 = vsel %vm715_vm2, %v737_v20, %v739_v26  ;;  %4312 = vst.msk [vmem:[#allocation3 + $0x48] sm:$0x3] %vm2902_vm13, %v8783_v0  ;;  %4314 = vst.msk [vmem:[#allocation3 + $0x58] sm:$0x3] %vm2902_vm13, %v8783_v0 }
  0x3c   : > { %v743_v51 = vsel %vm715_vm2, %v741_v46, %v742_v47  ;;  %4316 = vst.msk [vmem:[#allocation3 + $0x68] sm:$0x3] %vm2902_vm13, %v8783_v0  ;;  %4318 = vst.msk [vmem:[#allocation3 + $0x78] sm:$0x3] %vm2902_vm13, %v8783_v0 }
  0x3d   : > { %4320 = vst.msk [vmem:[#allocation3 + $0x88] sm:$0x3] %vm2902_vm13, %v8783_v0  ;;  %4322 = vst.msk [vmem:[#allocation3 + $0x98] sm:$0x3] %vm2902_vm13, %v8783_v0 }
  0x3f   : > { %1195 = vrot.lane.b32.xlu1 %v6059_v37, %s5790_s17  ;;  %1099 = vrot.lane.b32.xlu0 %v725_v38, %s5789_s16 }
  0x43   : > { %898 = vrot.lane.b32.xlu1 %v6059_v37, %s5787_s14  ;;  %802 = vrot.lane.b32.xlu0 %v725_v38, %s5785_s12  ;;  %v565_v38 = vrot.slane %v6190_v35, 1 }
  0x45   : > { %v566_v42 = vsel %vm538_vm3, %v564_v36, %v565_v38 }
  0x47   : > { %1297 = vrot.lane.b32.xlu1 %v551_v45, %s5791_s26  ;;  %1197 = vrot.lane.b32.xlu0 %v6063_v40, %s5790_s17 }
  0x4b   : > { %1000 = vrot.lane.b32.xlu1 %v551_v45, %s5788_s15  ;;  %900 = vrot.lane.b32.xlu0 %v6063_v40, %s5787_s14 }
  0x4f   : > { %1398 = vrot.lane.b32.xlu1 %v728_v53, %s5792_s9  ;;  %1299 = vrot.lane.b32.xlu0 %v553_v54, %s5791_s26 }
  0x53   : > { %1002 = vrot.lane.b32.xlu1 %v553_v54, %s5788_s15  ;;  %627 = vrot.lane.b32.xlu0 %v551_v45, %s5786_s13  ;;  %v453_v45 = vld [vmem:[#allocation2 + $0x88] sm:$0x3] }
  0x54   : > { %v567_v48 = vrot.slane %v453_v45, 1  ;;  %v744_v55 = vrot.slane %v453_v45, 2 }
  0x56   : > { %v568_v52 = vsel %vm538_vm3, %v565_v38, %v567_v48  ;;  %v745_v59 = vsel %vm715_vm2, %v742_v47, %v744_v55  ;;  %v747_v38 = vrot.slane %v6248_v11, 2 }
  0x57   : > { %1400 = vrot.lane.b32.xlu1 %v730_v56, %s5792_s9  ;;  %1101 = vrot.lane.b32.xlu0 %v728_v53, %s5789_s16 }
  0x5b   : > { %804 = vrot.lane.b32.xlu1 %v728_v53, %s5785_s12  ;;  %629 = vrot.lane.b32.xlu0 %v553_v54, %s5786_s13 }
  0x5f   : > { %1199 = vrot.lane.b32.xlu1 %v6111_v58, %s5790_s17  ;;  %1103 = vrot.lane.b32.xlu0 %v730_v56, %s5789_s16 }
  0x63   : > { %902 = vrot.lane.b32.xlu1 %v6111_v58, %s5787_s14  ;;  %806 = vrot.lane.b32.xlu0 %v730_v56, %s5785_s12 }
  0x67   : > { %1301 = vrot.lane.b32.xlu1 %v556_v63, %s5791_s26  ;;  %1201 = vrot.lane.b32.xlu0 %v6114_v60, %s5790_s17 }
  0x6b   : > { %1004 = vrot.lane.b32.xlu1 %v556_v63, %s5788_s15  ;;  %904 = vrot.lane.b32.xlu0 %v6114_v60, %s5787_s14 }
  0x6f   : > { %1402 = vrot.lane.b32.xlu1 %v733_v7, %s5792_s9  ;;  %1303 = vrot.lane.b32.xlu0 %v558_v8, %s5791_s26 }
  0x73   : > { %1006 = vrot.lane.b32.xlu1 %v558_v8, %s5788_s15  ;;  %631 = vrot.lane.b32.xlu0 %v556_v63, %s5786_s13  ;;  %v333_v63 = vld [vmem:[%s5978_s11 + $0x90] sm:$0xff] }
  0x74   : > { %422 = vst.msk [vmem:[#allocation2 + $0xf1] sm:$0xff] %vm8789_vm0, %v333_v63 }
  0x77   : > { %1404 = vrot.lane.b32.xlu1 %v735_v10, %s5792_s9  ;;  %1105 = vrot.lane.b32.xlu0 %v733_v7, %s5789_s16 }
  0x7b   : > { %808 = vrot.lane.b32.xlu1 %v733_v7, %s5785_s12  ;;  %633 = vrot.lane.b32.xlu0 %v558_v8, %s5786_s13  ;;  %v6240_v7 = vld [vmem:[#allocation2 + $0x90] sm:$0xff]  ;;  %v334_v8 = vld [vmem:[%s5978_s11 + $0x98] sm:$0xff] }
  0x7c   : > { %423 = vst.msk [vmem:[#allocation2 + $0xf9] sm:$0xff] %vm8789_vm0, %v334_v8  ;;  %v746_v36 = vrot.slane %v6240_v7, 2  ;;  %v336_v8 = vld [vmem:[%s5978_s11 + $0xa8] sm:$0xff] }
  0x7d   : > { %425 = vst.msk [vmem:[#allocation2 + $0x111] sm:$0xff] %vm8789_vm0, %v336_v8  ;;  %v338_v8 = vld [vmem:[%s5978_s11 + $0xb8] sm:$0xff] }
  0x7e   : > { %v748_v46 = vsel %vm715_vm2, %v746_v36, %v747_v38  ;;  %427 = vst.msk [vmem:[#allocation2 + $0x129] sm:$0xff] %vm8789_vm0, %v338_v8 }
  0x7f   : > { %1203 = vrot.lane.b32.xlu1 %v6147_v12, %s5790_s17  ;;  %1107 = vrot.lane.b32.xlu0 %v735_v10, %s5789_s16 }
  0x83   : > { %906 = vrot.lane.b32.xlu1 %v6147_v12, %s5787_s14  ;;  %810 = vrot.lane.b32.xlu0 %v735_v10, %s5785_s12 }
  0x87   : > { %1305 = vrot.lane.b32.xlu1 %v561_v17, %s5791_s26  ;;  %1205 = vrot.lane.b32.xlu0 %v6150_v14, %s5790_s17 }
  0x89   : > { %v797_v29 = vpop.permute.xlu1 %796  ;;  %v620_v30 = vpop.permute.xlu0 %619 }
  0x8a   : > { %v1494_v1 = vsel %vm8789_vm0, %v5983_v4, %v620_v30  ;;  %v456_v30 = vld [vmem:[#allocation2 + $0xa0] sm:$0x3] }
  0x8b   : > { %1008 = vrot.lane.b32.xlu1 %v561_v17, %s5788_s15  ;;  %908 = vrot.lane.b32.xlu0 %v6150_v14, %s5787_s14  ;;  %v1527_v6 = vsel %vm8788_vm6, %v1494_v1, %v797_v29 }
  0x8f   : > { %1406 = vrot.lane.b32.xlu1 %v738_v22, %s5792_s9  ;;  %1307 = vrot.lane.b32.xlu0 %v563_v23, %s5791_s26 }
  0x93   : > { %1010 = vrot.lane.b32.xlu1 %v563_v23, %s5788_s15  ;;  %635 = vrot.lane.b32.xlu0 %v561_v17, %s5786_s13  ;;  %v569_v17 = vrot.slane %v6240_v7, 1 }
  0x97   : > { %1408 = vrot.lane.b32.xlu1 %v740_v27, %s5792_s9  ;;  %1109 = vrot.lane.b32.xlu0 %v738_v22, %s5789_s16 }
  0x9b   : > { %812 = vrot.lane.b32.xlu1 %v738_v22, %s5785_s12  ;;  %637 = vrot.lane.b32.xlu0 %v563_v23, %s5786_s13  ;;  %v6186_v33 = vpop.permute.xlu1 %798  ;;  %v6188_v34 = vpop.permute.xlu0 %621 }
  0x9c   : > { %v1495_v19 = vsel %vm8789_vm0, %v5985_v5, %v6188_v34 }
  0x9d   : > { %v1528_v26 = vsel %vm8788_vm6, %v1495_v19, %v6186_v33 }
  0x9f   : > { %1207 = vrot.lane.b32.xlu1 %v6183_v31, %s5790_s17  ;;  %1111 = vrot.lane.b32.xlu0 %v740_v27, %s5789_s16 }
  0xa1   : > { %v6198_v39 = vpop.permute.xlu1 %896  ;;  %v895_v41 = vpop.permute.xlu0 %894 }
  0xa2   : > { %v1560_v9 = vsel %vm8787_vm7, %v1527_v6, %v895_v41  ;;  %v1561_v5 = vsel %vm8787_vm7, %v1528_v26, %v6198_v39  ;;  %v572_v39 = vrot.slane %v456_v30, 1  ;;  %v6318_v6 = vld [vmem:[#allocation2 + $0xa8] sm:$0xff] }
  0xa3   : > { %910 = vrot.lane.b32.xlu1 %v6183_v31, %s5787_s14  ;;  %814 = vrot.lane.b32.xlu0 %v740_v27, %s5785_s12  ;;  %v571_v27 = vsel %vm538_vm3, %v569_v17, %v570_v18 }
  0xa4   : > { %v573_v47 = vsel %vm538_vm3, %v570_v18, %v572_v39 }
  0xa5   : > { %v6204_v43 = vpop.permute.xlu1 %623  ;;  %v997_v44 = vpop.permute.xlu0 %996 }
  0xa6   : > { %v1593_v13 = vsel %vm1592_vm4, %v1560_v9, %v997_v44 }
  0xa7   : > { %1309 = vrot.lane.b32.xlu1 %v566_v42, %s5791_s26  ;;  %1209 = vrot.lane.b32.xlu0 %v6190_v35, %s5790_s17 }
  0xa9   : > { %v1098_v49 = vpop.permute.xlu1 %1097  ;;  %v6211_v50 = vpop.permute.xlu0 %998 }
  0xaa   : > { %v1626_v15 = vsel %vm1625_vm8, %v1593_v13, %v1098_v49  ;;  %v1594_v32 = vsel %vm1592_vm4, %v1561_v5, %v6211_v50  ;;  %v749_v50 = vrot.slane %v456_v30, 2 }
  0xab   : > { %1012 = vrot.lane.b32.xlu1 %v566_v42, %s5788_s15  ;;  %912 = vrot.lane.b32.xlu0 %v6190_v35, %s5787_s14 }
  0xac   : > { %v750_v55 = vsel %vm715_vm2, %v747_v38, %v749_v50 }
  0xad   : > { %v6218_v53 = vpop.permute.xlu1 %800  ;;  %v6220_v54 = vpop.permute.xlu0 %625 }
  0xaf   : > { %1410 = vrot.lane.b32.xlu1 %v743_v51, %s5792_s9  ;;  %1311 = vrot.lane.b32.xlu0 %v568_v52, %s5791_s26 }
  0xb1   : > { %v1196_v56 = vpop.permute.xlu1 %1195  ;;  %v1100_v57 = vpop.permute.xlu0 %1099 }
  0xb2   : > { %v1659_v16 = vsel %vm1658_vm9, %v1626_v15, %v1196_v56  ;;  %v1627_v34 = vsel %vm1625_vm8, %v1594_v32, %v1100_v57  ;;  %v751_v32 = vrot.slane %v6318_v6, 2 }
  0xb3   : > { %1014 = vrot.lane.b32.xlu1 %v568_v52, %s5788_s15  ;;  %639 = vrot.lane.b32.xlu0 %v566_v42, %s5786_s13 }
  0xb5   : > { %v6227_v61 = vpop.permute.xlu1 %898  ;;  %v6229_v62 = vpop.permute.xlu0 %802 }
  0xb7   : > { %1412 = vrot.lane.b32.xlu1 %v745_v59, %s5792_s9  ;;  %1113 = vrot.lane.b32.xlu0 %v743_v51, %s5789_s16 }
  0xb9   : > { %v1298_v2 = vpop.permute.xlu1 %1297  ;;  %v1198_v3 = vpop.permute.xlu0 %1197 }
  0xba   : > { %v1692_v20 = vsel %vm1691_vm10, %v1659_v16, %v1298_v2  ;;  %v1660_v33 = vsel %vm1658_vm9, %v1627_v34, %v1198_v3  ;;  %v1496_v2 = vsel %vm8789_vm0, %v6036_v25, %v6204_v43  ;;  %v6327_v16 = vld [vmem:[#allocation2 + $0xb0] sm:$0xff] }
  0xbb   : > { %816 = vrot.lane.b32.xlu1 %v743_v51, %s5785_s12  ;;  %641 = vrot.lane.b32.xlu0 %v568_v52, %s5786_s13  ;;  %v1529_v3 = vsel %vm8788_vm6, %v1496_v2, %v6218_v53  ;;  %v575_v17 = vrot.slane %v6327_v16, 1 }
  0xbc   : > { %v1562_v9 = vsel %vm8787_vm7, %v1529_v3, %v6227_v61  ;;  %v574_v61 = vrot.slane %v6318_v6, 1  ;;  %v6398_v3 = vld [vmem:[#allocation2 + $0xc0] sm:$0xff] }
  0xbd   : > { %v6244_v10 = vpop.permute.xlu1 %1000  ;;  %v6246_v4 = vpop.permute.xlu0 %900 }
  0xbe   : > { %v1595_v25 = vsel %vm1592_vm4, %v1562_v9, %v6244_v10  ;;  %v1497_v10 = vsel %vm8789_vm0, %v6034_v24, %v6220_v54  ;;  %v459_v24 = vld [vmem:[#allocation2 + $0xb8] sm:$0x3] }
  0xbf   : > { %1211 = vrot.lane.b32.xlu1 %v6240_v7, %s5790_s17  ;;  %1115 = vrot.lane.b32.xlu0 %v745_v59, %s5789_s16  ;;  %v577_v34 = vrot.slane %v459_v24, 1 }
  0xc1   : > { %v1399_v21 = vpop.permute.xlu1 %1398  ;;  %v1300_v22 = vpop.permute.xlu0 %1299 }
  0xc2   : > { %v1725_v23 = vsel %vm1724_vm11, %v1692_v20, %v1399_v21  ;;  %v1693_v41 = vsel %vm1691_vm10, %v1660_v33, %v1300_v22  ;;  %v1530_v22 = vsel %vm8788_vm6, %v1497_v10, %v6229_v62 }
  0xc3   : > { %914 = vrot.lane.b32.xlu1 %v6240_v7, %s5787_s14  ;;  %818 = vrot.lane.b32.xlu0 %v745_v59, %s5785_s12  ;;  %v335_v59 = vld [vmem:[%s5978_s11 + $0xa0] sm:$0xff]  ;;  %v1563_v26 = vsel %vm8787_vm7, %v1530_v22, %v6246_v4  ;;  %v752_v4 = vrot.slane %v6327_v16, 2 }
  0xc4   : > { %5552 = vmatprep.mubr.msk.f32.mxu0 %vm1762_vm12, %v1725_v23  ;;  %424 = vst.msk [vmem:[#allocation2 + $0x109] sm:$0xff] %vm8789_vm0, %v335_v59  ;;  %v576_v23 = vsel %vm538_vm3, %v574_v61, %v575_v17 }
  0xc5   : > { %v6273_v28 = vpop.permute.xlu1 %1002  ;;  %v6275_v29 = vpop.permute.xlu0 %627  ;;  %v753_v39 = vsel %vm715_vm2, %v751_v32, %v752_v4 }
  0xc6   : > { %v1596_v54 = vsel %vm1592_vm4, %v1563_v26, %v6273_v28 }
  0xc7   : > { %1313 = vrot.lane.b32.xlu1 %v571_v27, %s5791_s26  ;;  %1213 = vrot.lane.b32.xlu0 %v6248_v11, %s5790_s17 }
  0xc9   : > { %v1401_v42 = vpop.permute.xlu1 %1400  ;;  %v1102_v44 = vpop.permute.xlu0 %1101 }
  0xca   : > { %v1726_v45 = vsel %vm1724_vm11, %v1693_v41, %v1401_v42  ;;  %v1628_v43 = vsel %vm1625_vm8, %v1595_v25, %v1102_v44  ;;  %v578_v41 = vsel %vm538_vm3, %v575_v17, %v577_v34 }
  0xcb   : > { %1016 = vrot.lane.b32.xlu1 %v571_v27, %s5788_s15  ;;  %916 = vrot.lane.b32.xlu0 %v6248_v11, %s5787_s14 }
  0xcc   : > { %5553 = vmatmul.mubr.msk.f32.vlgmr.msra.gmra.mxu0 %vm1762_vm12, %v1726_v45  ;;  %v754_v45 = vrot.slane %v459_v24, 2 }
  0xcd   : > { %v6294_v48 = vpop.permute.xlu1 %804  ;;  %v6296_v49 = vpop.permute.xlu0 %629 }
  0xce   : > { %v755_v50 = vsel %vm715_vm2, %v752_v4, %v754_v45 }
  0xcf   : > { %1414 = vrot.lane.b32.xlu1 %v748_v46, %s5792_s9  ;;  %1315 = vrot.lane.b32.xlu0 %v573_v47, %s5791_s26 }
  0xd1   : > { %v1200_v51 = vpop.permute.xlu1 %1199  ;;  %v1104_v52 = vpop.permute.xlu0 %1103 }
  0xd2   : > { %v1661_v53 = vsel %vm1658_vm9, %v1628_v43, %v1200_v51  ;;  %v1629_v30 = vsel %vm1625_vm8, %v1596_v54, %v1104_v52  ;;  %v756_v54 = vrot.slane %v6398_v3, 2 }
  0xd3   : > { %1018 = vrot.lane.b32.xlu1 %v573_v47, %s5788_s15  ;;  %643 = vrot.lane.b32.xlu0 %v571_v27, %s5786_s13 }
  0xd5   : > { %v6303_v56 = vpop.permute.xlu1 %902  ;;  %v6305_v57 = vpop.permute.xlu0 %806 }
  0xd7   : > { %1416 = vrot.lane.b32.xlu1 %v750_v55, %s5792_s9  ;;  %1117 = vrot.lane.b32.xlu0 %v748_v46, %s5789_s16 }
  0xd9   : > { %v1302_v63 = vpop.permute.xlu1 %1301  ;;  %v1202_v1 = vpop.permute.xlu0 %1201 }
  0xda   : > { %v1694_v18 = vsel %vm1691_vm10, %v1661_v53, %v1302_v63  ;;  %v1662_v62 = vsel %vm1658_vm9, %v1629_v30, %v1202_v1  ;;  %v1498_v1 = vsel %vm8789_vm0, %v6059_v37, %v6275_v29  ;;  %v6407_v53 = vld [vmem:[#allocation2 + $0xc8] sm:$0xff] }
  0xdb   : > { %820 = vrot.lane.b32.xlu1 %v748_v46, %s5785_s12  ;;  %645 = vrot.lane.b32.xlu0 %v573_v47, %s5786_s13  ;;  %v1531_v2 = vsel %vm8788_vm6, %v1498_v1, %v6294_v48  ;;  %v580_v61 = vrot.slane %v6407_v53, 1  ;;  %v463_v1 = vld [vmem:[#allocation2 + $0xd8] sm:$0xff] }
  0xdc   : > { %v1564_v9 = vsel %vm8787_vm7, %v1531_v2, %v6303_v56  ;;  %v579_v56 = vrot.slane %v6398_v3, 1 }
  0xdd   : > { %v6323_v13 = vpop.permute.xlu1 %1004  ;;  %v6325_v15 = vpop.permute.xlu0 %904 }
  0xde   : > { %v1597_v37 = vsel %vm1592_vm4, %v1564_v9, %v6323_v13  ;;  %v1499_v13 = vsel %vm8789_vm0, %v6063_v40, %v6296_v49  ;;  %v581_v10 = vsel %vm538_vm3, %v579_v56, %v580_v61  ;;  %v462_v40 = vld [vmem:[#allocation2 + $0xd0] sm:$0x3] }
  0xdf   : > { %1215 = vrot.lane.b32.xlu1 %v6318_v6, %s5790_s17  ;;  %1119 = vrot.lane.b32.xlu0 %v750_v55, %s5789_s16  ;;  %v582_v30 = vrot.slane %v462_v40, 1 }
  0xe1   : > { %v1403_v19 = vpop.permute.xlu1 %1402  ;;  %v1304_v20 = vpop.permute.xlu0 %1303 }
  0xe2   : > { %v1727_v21 = vsel %vm1724_vm11, %v1694_v18, %v1403_v19  ;;  %v1695_v33 = vsel %vm1691_vm10, %v1662_v62, %v1304_v20 }
  0xe3   : > { %918 = vrot.lane.b32.xlu1 %v6318_v6, %s5787_s14  ;;  %822 = vrot.lane.b32.xlu0 %v750_v55, %s5785_s12  ;;  %v337_v55 = vld [vmem:[%s5978_s11 + $0xb0] sm:$0xff] }
  0xe4   : > { %5555 = vmatprep.mubr.msk.f32.mxu0 %vm1762_vm12, %v1727_v21  ;;  %426 = vst.msk [vmem:[#allocation2 + $0x121] sm:$0xff] %vm8789_vm0, %v337_v55  ;;  %v1532_v21 = vsel %vm8788_vm6, %v1499_v13, %v6305_v57 }
  0xe5   : > { %v6353_v27 = vpop.permute.xlu1 %1006  ;;  %v6355_v5 = vpop.permute.xlu0 %631  ;;  %v1565_v22 = vsel %vm8787_vm7, %v1532_v21, %v6325_v15  ;;  %v757_v15 = vrot.slane %v6407_v53, 2 }
  0xe6   : > { %v1598_v49 = vsel %vm1592_vm4, %v1565_v22, %v6353_v27 }
  0xe7   : > { %1317 = vrot.lane.b32.xlu1 %v576_v23, %s5791_s26  ;;  %1217 = vrot.lane.b32.xlu0 %v6327_v16, %s5790_s17  ;;  %v758_v34 = vsel %vm715_vm2, %v756_v54, %v757_v15 }
  0xe9   : > { %v1405_v36 = vpop.permute.xlu1 %1404  ;;  %v1106_v38 = vpop.permute.xlu0 %1105 }
  0xea   : > { %v1728_v28 = vsel %vm1724_vm11, %v1695_v33, %v1405_v36  ;;  %v1630_v29 = vsel %vm1625_vm8, %v1597_v37, %v1106_v38  ;;  %v583_v33 = vsel %vm538_vm3, %v580_v61, %v582_v30  ;;  %v464_v37 = vld [vmem:[#allocation2 + $0xe0] sm:$0xff] }
  0xeb   : > { %1020 = vrot.lane.b32.xlu1 %v576_v23, %s5788_s15  ;;  %920 = vrot.lane.b32.xlu0 %v6327_v16, %s5787_s14 }
  0xec   : > { %5556 = vmatmul.mubr.msk.f32.gmra.mxu0 %vm1762_vm12, %v1728_v28  ;;  %v759_v28 = vrot.slane %v462_v40, 2 }
  0xed   : > { %v6374_v42 = vpop.permute.xlu1 %808  ;;  %v6376_v44 = vpop.permute.xlu0 %633 }
  0xee   : > { %v760_v45 = vsel %vm715_vm2, %v757_v15, %v759_v28 }
  0xef   : > { %1418 = vrot.lane.b32.xlu1 %v753_v39, %s5792_s9  ;;  %1319 = vrot.lane.b32.xlu0 %v578_v41, %s5791_s26 }
  0xf1   : > { %v1204_v46 = vpop.permute.xlu1 %1203  ;;  %v1108_v47 = vpop.permute.xlu0 %1107 }
  0xf2   : > { %v1663_v48 = vsel %vm1658_vm9, %v1630_v29, %v1204_v46  ;;  %v1631_v24 = vsel %vm1625_vm8, %v1598_v49, %v1108_v47  ;;  %v584_v29 = vrot.slane %v463_v1, 1  ;;  %v761_v49 = vrot.slane %v463_v1, 2 }
  0xf3   : > { %1022 = vrot.lane.b32.xlu1 %v578_v41, %s5788_s15  ;;  %647 = vrot.lane.b32.xlu0 %v576_v23, %s5786_s13 }
  0xf5   : > { %v6383_v51 = vpop.permute.xlu1 %906  ;;  %v6385_v52 = vpop.permute.xlu0 %810 }
  0xf7   : > { %1420 = vrot.lane.b32.xlu1 %v755_v50, %s5792_s9  ;;  %1121 = vrot.lane.b32.xlu0 %v753_v39, %s5789_s16 }
  0xf9   : > { %v1306_v59 = vpop.permute.xlu1 %1305  ;;  %v1206_v63 = vpop.permute.xlu0 %1205 }
  0xfa   : > { %v1696_v17 = vsel %vm1691_vm10, %v1663_v48, %v1306_v59  ;;  %v1664_v57 = vsel %vm1658_vm9, %v1631_v24, %v1206_v63  ;;  %v1500_v59 = vsel %vm8789_vm0, %v6111_v58, %v6355_v5  ;;  %v585_v48 = vrot.slane %v464_v37, 1 }
  0xfb   : > { %824 = vrot.lane.b32.xlu1 %v753_v39, %s5785_s12  ;;  %649 = vrot.lane.b32.xlu0 %v578_v41, %s5786_s13  ;;  %v1533_v63 = vsel %vm8788_vm6, %v1500_v59, %v6374_v42  ;;  %v762_v24 = vrot.slane %v464_v37, 2 }
  0xfc   : > { %v1566_v2 = vsel %vm8787_vm7, %v1533_v63, %v6383_v51  ;;  %v466_v63 = vld [vmem:[#allocation2 + $0xf0] sm:$0xff] }
  0xfd   : > { %v6403_v25 = vpop.permute.xlu1 %1008  ;;  %v6405_v43 = vpop.permute.xlu0 %908  ;;  %v763_v30 = vsel %vm715_vm2, %v761_v49, %v762_v24 }
  0xfe   : > { %v1599_v58 = vsel %vm1592_vm4, %v1566_v2, %v6403_v25  ;;  %v1501_v25 = vsel %vm8789_vm0, %v6114_v60, %v6376_v44  ;;  %v465_v60 = vld [vmem:[#allocation2 + $0xe8] sm:$0x3] }
  0xff   : > { %1219 = vrot.lane.b32.xlu1 %v6398_v3, %s5790_s17  ;;  %1123 = vrot.lane.b32.xlu0 %v755_v50, %s5789_s16 }
 0x101   : > { %v1407_v18 = vpop.permute.xlu1 %1406  ;;  %v1308_v19 = vpop.permute.xlu0 %1307 }
 0x102   : > { %v1729_v20 = vsel %vm1724_vm11, %v1696_v17, %v1407_v18  ;;  %v1697_v62 = vsel %vm1691_vm10, %v1664_v57, %v1308_v19  ;;  %v339_v18 = vld [vmem:[%s5978_s11 + $0xc0] sm:$0xff]  ;;  %v1534_v19 = vsel %vm8788_vm6, %v1501_v25, %v6385_v52  ;;  %v340_v52 = vld [vmem:[%s5978_s11 + $0xc8] sm:$0xff] }
 0x103   : > { %922 = vrot.lane.b32.xlu1 %v6398_v3, %s5787_s14  ;;  %826 = vrot.lane.b32.xlu0 %v755_v50, %s5785_s12  ;;  %428 = vst.msk [vmem:[#allocation2 + $0x139] sm:$0xff] %vm8789_vm0, %v339_v18  ;;  %v1567_v13 = vsel %vm8787_vm7, %v1534_v19, %v6405_v43  ;;  %v587_v43 = vrot.slane %v465_v60, 1  ;;  %429 = vst.msk [vmem:[#allocation2 + $0x141] sm:$0xff] %vm8789_vm0, %v340_v52 }
 0x104   : > { %5558 = vmatprep.mubr.msk.f32.mxu0 %vm1762_vm12, %v1729_v20  ;;  %v586_v20 = vsel %vm538_vm3, %v584_v29, %v585_v48 }
 0x105   : > { %v6433_v23 = vpop.permute.xlu1 %1010  ;;  %v6435_v26 = vpop.permute.xlu0 %635 }
 0x106   : > { %v1600_v44 = vsel %vm1592_vm4, %v1567_v13, %v6433_v23  ;;  %v766_v13 = vrot.slane %v466_v63, 2 }
 0x107   : > { %1321 = vrot.lane.b32.xlu1 %v581_v10, %s5791_s26  ;;  %1221 = vrot.lane.b32.xlu0 %v6407_v53, %s5790_s17 }
 0x109   : > { %v1409_v32 = vpop.permute.xlu1 %1408  ;;  %v1110_v4 = vpop.permute.xlu0 %1109 }
 0x10a   : > { %v1730_v27 = vsel %vm1724_vm11, %v1697_v62, %v1409_v32  ;;  %v1632_v5 = vsel %vm1625_vm8, %v1599_v58, %v1110_v4  ;;  %v588_v62 = vsel %vm538_vm3, %v585_v48, %v587_v43  ;;  %v467_v58 = vld [vmem:[#allocation2 + $0xf8] sm:$0xff] }
 0x10b   : > { %1024 = vrot.lane.b32.xlu1 %v581_v10, %s5788_s15  ;;  %924 = vrot.lane.b32.xlu0 %v6407_v53, %s5787_s14 }
 0x10c   : > { %5559 = vmatmul.mubr.msk.f32.gmra.mxu0 %vm1762_vm12, %v1730_v27  ;;  %v764_v27 = vrot.slane %v465_v60, 2  ;;  %v767_v60 = vrot.slane %v467_v58, 2 }
 0x10d   : > { %v6454_v36 = vpop.permute.xlu1 %812  ;;  %v6456_v38 = vpop.permute.xlu0 %637 }
 0x10e   : > { %v765_v28 = vsel %vm715_vm2, %v762_v24, %v764_v27  ;;  %v768_v49 = vsel %vm715_vm2, %v766_v13, %v767_v60 }
 0x10f   : > { %1422 = vrot.lane.b32.xlu1 %v758_v34, %s5792_s9  ;;  %1323 = vrot.lane.b32.xlu0 %v583_v33, %s5791_s26 }
 0x111   : > { %v1208_v39 = vpop.permute.xlu1 %1207  ;;  %v1112_v41 = vpop.permute.xlu0 %1111 }
 0x112   : > { %v1665_v42 = vsel %vm1658_vm9, %v1632_v5, %v1208_v39  ;;  %v1633_v22 = vsel %vm1625_vm8, %v1600_v44, %v1112_v41  ;;  %v589_v5 = vrot.slane %v466_v63, 1 }
 0x113   : > { %1026 = vrot.lane.b32.xlu1 %v583_v33, %s5788_s15  ;;  %651 = vrot.lane.b32.xlu0 %v581_v10, %s5786_s13 }
 0x115   : > { %v6463_v46 = vpop.permute.xlu1 %910  ;;  %v6465_v47 = vpop.permute.xlu0 %814 }
 0x117   : > { %1424 = vrot.lane.b32.xlu1 %v760_v45, %s5792_s9  ;;  %1125 = vrot.lane.b32.xlu0 %v758_v34, %s5789_s16 }
 0x119   : > { %v1310_v50 = vpop.permute.xlu1 %1309  ;;  %v1210_v55 = vpop.permute.xlu0 %1209 }
 0x11a   : > { %v1698_v51 = vsel %vm1691_vm10, %v1665_v42, %v1310_v50  ;;  %v1666_v40 = vsel %vm1658_vm9, %v1633_v22, %v1210_v55  ;;  %v1502_v55 = vsel %vm8789_vm0, %v6147_v12, %v6435_v26  ;;  %v590_v42 = vrot.slane %v467_v58, 1 }
 0x11b   : > { %828 = vrot.lane.b32.xlu1 %v758_v34, %s5785_s12  ;;  %653 = vrot.lane.b32.xlu0 %v583_v33, %s5786_s13  ;;  %v1535_v59 = vsel %vm8788_vm6, %v1502_v55, %v6454_v36 }
 0x11d   : > { %v6498_v8 = vpop.permute.xlu1 %1012  ;;  %v6500_v9 = vpop.permute.xlu0 %912 }
 0x11f   : > { %1223 = vrot.lane.b32.xlu1 %v463_v1, %s5790_s17  ;;  %1127 = vrot.lane.b32.xlu0 %v760_v45, %s5789_s16 }
 0x121   : > { %v1411_v56 = vpop.permute.xlu1 %1410  ;;  %v1312_v61 = vpop.permute.xlu0 %1311 }
 0x122   : > { %v1731_v17 = vsel %vm1724_vm11, %v1698_v51, %v1411_v56  ;;  %v1699_v57 = vsel %vm1691_vm10, %v1666_v40, %v1312_v61  ;;  %v341_v56 = vld [vmem:[%s5978_s11 + $0xd0] sm:$0xff] }
 0x123   : > { %926 = vrot.lane.b32.xlu1 %v463_v1, %s5787_s14  ;;  %830 = vrot.lane.b32.xlu0 %v760_v45, %s5785_s12  ;;  %v1568_v1 = vsel %vm8787_vm7, %v1535_v59, %v6463_v46  ;;  %430 = vst.msk [vmem:[#allocation2 + $0x151] sm:$0xff] %vm8789_vm0, %v341_v56 }
 0x124   : > { %5561 = vmatprep.mubr.msk.f32.mxu0 %vm1762_vm12, %v1731_v17  ;;  %v1601_v12 = vsel %vm1592_vm4, %v1568_v1, %v6498_v8  ;;  %v1503_v8 = vsel %vm8789_vm0, %v6150_v14, %v6456_v38  ;;  %v591_v17 = vsel %vm538_vm3, %v589_v5, %v590_v42  ;;  %v468_v38 = vld [vmem:[#allocation2 + $0x100] sm:$0x3]  ;;  %v470_v1 = vld [vmem:[#allocation2 + $0x110] sm:$0xff] }
 0x125   : > { %v6523_v21 = vpop.permute.xlu1 %1014  ;;  %v6525_v10 = vpop.permute.xlu0 %639  ;;  %v1536_v61 = vsel %vm8788_vm6, %v1503_v8, %v6465_v47  ;;  %v592_v44 = vrot.slane %v468_v38, 1 }
 0x126   : > { %v1569_v18 = vsel %vm8787_vm7, %v1536_v61, %v6500_v9  ;;  %v342_v9 = vld [vmem:[%s5978_s11 + $0xd8] sm:$0xff] }
 0x127   : > { %1325 = vrot.lane.b32.xlu1 %v586_v20, %s5791_s26  ;;  %1225 = vrot.lane.b32.xlu0 %v464_v37, %s5790_s17  ;;  %v1602_v19 = vsel %vm1592_vm4, %v1569_v18, %v6523_v21  ;;  %431 = vst.msk [vmem:[#allocation2 + $0x159] sm:$0xff] %vm8789_vm0, %v342_v9  ;;  %v593_v24 = vsel %vm538_vm3, %v590_v42, %v592_v44  ;;  %v343_v42 = vld [vmem:[%s5978_s11 + $0xe0] sm:$0xff] }
 0x128   : > { %432 = vst.msk [vmem:[#allocation2 + $0x169] sm:$0xff] %vm8789_vm0, %v343_v42  ;;  %v2234_v42 = vlaneseq }
 0x129   : > { %v1413_v54 = vpop.permute.xlu1 %1412  ;;  %v1114_v15 = vpop.permute.xlu0 %1113 }
 0x12a   : > { %v1732_v23 = vsel %vm1724_vm11, %v1699_v57, %v1413_v54  ;;  %v1634_v26 = vsel %vm1625_vm8, %v1601_v12, %v1114_v15  ;;  %v769_v54 = vrot.slane %v468_v38, 2  ;;  %v595_v12 = vrot.slane %v470_v1, 1 }
 0x12b   : > { %1028 = vrot.lane.b32.xlu1 %v586_v20, %s5788_s15  ;;  %928 = vrot.lane.b32.xlu0 %v464_v37, %s5787_s14 }
 0x12c   : > { %5562 = vmatmul.mubr.msk.f32.gmra.mxu0 %vm1762_vm12, %v1732_v23 }
 0x12d   : > { %v6542_v32 = vpop.permute.xlu1 %816  ;;  %v6544_v4 = vpop.permute.xlu0 %641 }
 0x12f   : > { %1426 = vrot.lane.b32.xlu1 %v763_v30, %s5792_s9  ;;  %1327 = vrot.lane.b32.xlu0 %v588_v62, %s5791_s26 }
 0x131   : > { %v1212_v34 = vpop.permute.xlu1 %1211  ;;  %v1116_v33 = vpop.permute.xlu0 %1115 }
 0x132   : > { %v1667_v36 = vsel %vm1658_vm9, %v1634_v26, %v1212_v34  ;;  %v1635_v47 = vsel %vm1625_vm8, %v1602_v19, %v1116_v33 }
 0x133   : > { %1030 = vrot.lane.b32.xlu1 %v588_v62, %s5788_s15  ;;  %655 = vrot.lane.b32.xlu0 %v586_v20, %s5786_s13 }
 0x135   : > { %v6551_v39 = vpop.permute.xlu1 %914  ;;  %v6553_v41 = vpop.permute.xlu0 %818 }
 0x137   : > { %1428 = vrot.lane.b32.xlu1 %v765_v28, %s5792_s9  ;;  %1129 = vrot.lane.b32.xlu0 %v763_v30, %s5789_s16 }
 0x139   : > { %v1314_v45 = vpop.permute.xlu1 %1313  ;;  %v1214_v50 = vpop.permute.xlu0 %1213 }
 0x13a   : > { %v1700_v46 = vsel %vm1691_vm10, %v1667_v36, %v1314_v45  ;;  %v1668_v20 = vsel %vm1658_vm9, %v1635_v47, %v1214_v50  ;;  %v469_v50 = vld [vmem:[#allocation2 + $0x108] sm:$0xff] }
 0x13b   : > { %832 = vrot.lane.b32.xlu1 %v763_v30, %s5785_s12  ;;  %657 = vrot.lane.b32.xlu0 %v588_v62, %s5786_s13  ;;  %v770_v30 = vsel %vm715_vm2, %v767_v60, %v769_v54  ;;  %v771_v61 = vrot.slane %v469_v50, 2 }
 0x13d   : > { %v6566_v2 = vpop.permute.xlu1 %1016  ;;  %v6568_v37 = vpop.permute.xlu0 %916 }
 0x13f   : > { %1227 = vrot.lane.b32.xlu1 %v466_v63, %s5790_s17  ;;  %1131 = vrot.lane.b32.xlu0 %v765_v28, %s5789_s16 }
 0x141   : > { %v1415_v29 = vpop.permute.xlu1 %1414  ;;  %v1316_v48 = vpop.permute.xlu0 %1315 }
 0x142   : > { %v1733_v51 = vsel %vm1724_vm11, %v1700_v46, %v1415_v29  ;;  %v1701_v22 = vsel %vm1691_vm10, %v1668_v20, %v1316_v48 }
 0x143   : > { %930 = vrot.lane.b32.xlu1 %v466_v63, %s5787_s14  ;;  %834 = vrot.lane.b32.xlu0 %v765_v28, %s5785_s12  ;;  %v1504_v28 = vsel %vm8789_vm0, %v6183_v31, %v6525_v10 }
 0x144   : > { %5564 = vmatprep.mubr.msk.f32.mxu0 %vm1762_vm12, %v1733_v51  ;;  %v1537_v45 = vsel %vm8788_vm6, %v1504_v28, %v6542_v32 }
 0x145   : > { %v6591_v25 = vpop.permute.xlu1 %1018  ;;  %v6593_v14 = vpop.permute.xlu0 %643  ;;  %v1570_v55 = vsel %vm8787_vm7, %v1537_v45, %v6551_v39  ;;  %v6706_v45 = vld [vmem:[#allocation2 + $0x128] sm:$0xff] }
 0x146   : > { %v1603_v31 = vsel %vm1592_vm4, %v1570_v55, %v6566_v2  ;;  %v1505_v2 = vsel %vm8789_vm0, %v6190_v35, %v6544_v4  ;;  %v471_v4 = vld [vmem:[#allocation2 + $0x118] sm:$0x3] }
 0x147   : > { %1329 = vrot.lane.b32.xlu1 %v591_v17, %s5791_s26  ;;  %1229 = vrot.lane.b32.xlu0 %v467_v58, %s5790_s17  ;;  %v1538_v46 = vsel %vm8788_vm6, %v1505_v2, %v6553_v41  ;;  %v597_v18 = vrot.slane %v471_v4, 1  ;;  %v774_v9 = vrot.slane %v471_v4, 2  ;;  %v346_v4 = vld [vmem:[%s5978_s11 + $0xf8] sm:$0xff] }
 0x148   : > { %v1571_v48 = vsel %vm8787_vm7, %v1538_v46, %v6568_v37  ;;  %v344_v37 = vld [vmem:[%s5978_s11 + $0xe8] sm:$0xff]  ;;  %435 = vst.msk [vmem:[#allocation2 + $0x189] sm:$0xff] %vm8789_vm0, %v346_v4 }
 0x149   : > { %v1417_v52 = vpop.permute.xlu1 %1416  ;;  %v1118_v40 = vpop.permute.xlu0 %1117  ;;  %v1604_v8 = vsel %vm1592_vm4, %v1571_v48, %v6591_v25  ;;  %433 = vst.msk [vmem:[#allocation2 + $0x171] sm:$0xff] %vm8789_vm0, %v344_v37  ;;  %v598_v13 = vsel %vm538_vm3, %v595_v12, %v597_v18  ;;  %v6754_v18 = vshrl.u32 %v2234_v42, 7 }
 0x14a   : > { %v1734_v21 = vsel %vm1724_vm11, %v1701_v22, %v1417_v52  ;;  %v1636_v10 = vsel %vm1625_vm8, %v1603_v31, %v1118_v40 }
 0x14b   : > { %1032 = vrot.lane.b32.xlu1 %v591_v17, %s5788_s15  ;;  %932 = vrot.lane.b32.xlu0 %v467_v58, %s5787_s14  ;;  %v594_v58 = vrot.slane %v469_v50, 1 }
 0x14c   : > { %5565 = vmatmul.mubr.msk.f32.gmra.mxu0 %vm1762_vm12, %v1734_v21 }
 0x14d   : > { %v6610_v43 = vpop.permute.xlu1 %820  ;;  %v6612_v57 = vpop.permute.xlu0 %645  ;;  %v596_v29 = vsel %vm538_vm3, %v594_v58, %v595_v12 }
 0x14f   : > { %1430 = vrot.lane.b32.xlu1 %v768_v49, %s5792_s9  ;;  %1331 = vrot.lane.b32.xlu0 %v593_v24, %s5791_s26 }
 0x151   : > { %v1216_v15 = vpop.permute.xlu1 %1215  ;;  %v1120_v23 = vpop.permute.xlu0 %1119 }
 0x152   : > { %v1669_v32 = vsel %vm1658_vm9, %v1636_v10, %v1216_v15  ;;  %v1637_v41 = vsel %vm1625_vm8, %v1604_v8, %v1120_v23  ;;  %v1506_v15 = vsel %vm8789_vm0, %v6240_v7, %v6593_v14 }
 0x153   : > { %1034 = vrot.lane.b32.xlu1 %v593_v24, %s5788_s15  ;;  %659 = vrot.lane.b32.xlu0 %v591_v17, %s5786_s13  ;;  %v772_v17 = vrot.slane %v470_v1, 2  ;;  %v1539_v23 = vsel %vm8788_vm6, %v1506_v15, %v6610_v43 }
 0x155   : > { %v6619_v62 = vpop.permute.xlu1 %918  ;;  %v6621_v27 = vpop.permute.xlu0 %822  ;;  %v773_v20 = vsel %vm715_vm2, %v771_v61, %v772_v17  ;;  %v775_v40 = vsel %vm715_vm2, %v772_v17, %v774_v9  ;;  %v6751_v61 = vld [vmem:[%s8776_s2] ss:$0 sm:$0xff] }
 0x157   : > { %1432 = vrot.lane.b32.xlu1 %v770_v30, %s5792_s9  ;;  %1133 = vrot.lane.b32.xlu0 %v768_v49, %s5789_s16 }
 0x159   : > { %v1318_v34 = vpop.permute.xlu1 %1317  ;;  %v1218_v33 = vpop.permute.xlu0 %1217 }
 0x15a   : > { %v1702_v39 = vsel %vm1691_vm10, %v1669_v32, %v1318_v34  ;;  %v1670_v56 = vsel %vm1658_vm9, %v1637_v41, %v1218_v33  ;;  %v1572_v34 = vsel %vm8787_vm7, %v1539_v23, %v6619_v62  ;;  %v600_v62 = vrot.slane %v6706_v45, 1  ;;  %v345_v32 = vld [vmem:[%s5978_s11 + $0xf0] sm:$0xff] }
 0x15b   : > { %836 = vrot.lane.b32.xlu1 %v768_v49, %s5785_s12  ;;  %661 = vrot.lane.b32.xlu0 %v593_v24, %s5786_s13  ;;  %434 = vst.msk [vmem:[#allocation2 + $0x181] sm:$0xff] %vm8789_vm0, %v345_v32 }
 0x15d   : > { %v6634_v59 = vpop.permute.xlu1 %1020  ;;  %v6636_v63 = vpop.permute.xlu0 %920 }
 0x15e   : > { %v1605_v7 = vsel %vm1592_vm4, %v1572_v34, %v6634_v59  ;;  %v1507_v59 = vsel %vm8789_vm0, %v6248_v11, %v6612_v57  ;;  %v474_v57 = vld [vmem:[#allocation2 + $0x130] sm:$0x3] }
 0x15f   : > { %1231 = vrot.lane.b32.xlu1 %v469_v50, %s5790_s17  ;;  %1135 = vrot.lane.b32.xlu0 %v770_v30, %s5789_s16  ;;  %v1540_v58 = vsel %vm8788_vm6, %v1507_v59, %v6621_v27  ;;  %v602_v48 = vrot.slane %v474_v57, 1  ;;  %v6795_v59 = vld [vmem:[#allocation2 + $0x140] sm:$0xff] }
 0x161   : > { %v1419_v26 = vpop.permute.xlu1 %1418  ;;  %v1320_v36 = vpop.permute.xlu0 %1319 }
 0x162   : > { %v1735_v5 = vsel %vm1724_vm11, %v1702_v39, %v1419_v26  ;;  %v1703_v38 = vsel %vm1691_vm10, %v1670_v56, %v1320_v36  ;;  %v1573_v39 = vsel %vm8787_vm7, %v1540_v58, %v6636_v63 }
 0x163   : > { %934 = vrot.lane.b32.xlu1 %v469_v50, %s5787_s14  ;;  %838 = vrot.lane.b32.xlu0 %v770_v30, %s5785_s12  ;;  %v472_v30 = vld [vmem:[#allocation2 + $0x120] sm:$0xff] }
 0x164   : > { %5567 = vmatprep.mubr.msk.f32.mxu0 %vm1762_vm12, %v1735_v5  ;;  %v599_v50 = vrot.slane %v472_v30, 1  ;;  %v5793_v5 = vmov 1983009808   ;;  %v776_v46 = vrot.slane %v472_v30, 2 }
 0x165   : > { %v6659_v51 = vpop.permute.xlu1 %1022  ;;  %v6661_v35 = vpop.permute.xlu0 %647  ;;  %v2232_v2 = vunpack.c.l.s4 %v5793_v5 }
 0x166   : > { %v601_v12 = vsel %vm538_vm3, %v599_v50, %v600_v62  ;;  %v1606_v36 = vsel %vm1592_vm4, %v1573_v39, %v6659_v51  ;;  %v475_v39 = vld [vmem:[#allocation2 + $0x138] sm:$0xff] }
 0x167   : > { %1333 = vrot.lane.b32.xlu1 %v596_v29, %s5791_s26  ;;  %1233 = vrot.lane.b32.xlu0 %v470_v1, %s5790_s17  ;;  %v2233_v17 = vunpack.c.0.s8 %v2232_v2  ;;  %v605_v2 = vrot.slane %v6795_v59, 1 }
 0x169   : > { %v1421_v19 = vpop.permute.xlu1 %1420  ;;  %v1122_v47 = vpop.permute.xlu0 %1121 }
 0x16a   : > { %v1736_v25 = vsel %vm1724_vm11, %v1703_v38, %v1421_v19  ;;  %v1638_v14 = vsel %vm1625_vm8, %v1605_v7, %v1122_v47  ;;  %v6761_v38 = vld [vmem:[%s8777_s3] ss:$0 sm:$0xff]  ;;  %v603_v47 = vsel %vm538_vm3, %v600_v62, %v602_v48 }
 0x16b   : > { %1036 = vrot.lane.b32.xlu1 %v596_v29, %s5788_s15  ;;  %936 = vrot.lane.b32.xlu0 %v470_v1, %s5787_s14 }
 0x16c   : > { %5568 = vmatmul.mubr.msk.f32.gmra.mxu0 %vm1762_vm12, %v1736_v25 }
 0x16d   : > { %v6678_v60 = vpop.permute.xlu1 %824  ;;  %v6680_v44 = vpop.permute.xlu0 %649 }
 0x16f   : > { %1434 = vrot.lane.b32.xlu1 %v773_v20, %s5792_s9  ;;  %1335 = vrot.lane.b32.xlu0 %v598_v13, %s5791_s26 }
 0x171   : > { %v1220_v22 = vpop.permute.xlu1 %1219  ;;  %v1124_v52 = vpop.permute.xlu0 %1123 }
 0x172   : > { %v1671_v43 = vsel %vm1658_vm9, %v1638_v14, %v1220_v22  ;;  %v1639_v27 = vsel %vm1625_vm8, %v1606_v36, %v1124_v52  ;;  %v6773_v52 = vsub.s32 %v2233_v17, %v6754_v18  ;;  %v6816_v17 = vld [vmem:[#allocation2 + $0x148] sm:$0x3] }
 0x173   : > { %1038 = vrot.lane.b32.xlu1 %v598_v13, %s5788_s15  ;;  %663 = vrot.lane.b32.xlu0 %v596_v29, %s5786_s13  ;;  %v777_v29 = vrot.slane %v6706_v45, 2 }
 0x175   : > { %v6687_v21 = vpop.permute.xlu1 %922  ;;  %v6689_v49 = vpop.permute.xlu0 %826  ;;  %v778_v19 = vsel %vm715_vm2, %v776_v46, %v777_v29 }
 0x177   : > { %1436 = vrot.lane.b32.xlu1 %v775_v40, %s5792_s9  ;;  %1137 = vrot.lane.b32.xlu0 %v773_v20, %s5789_s16 }
 0x179   : > { %v1322_v24 = vpop.permute.xlu1 %1321  ;;  %v1222_v54 = vpop.permute.xlu0 %1221 }
 0x17a   : > { %v1704_v55 = vsel %vm1691_vm10, %v1671_v43, %v1322_v24  ;;  %v1672_v63 = vsel %vm1658_vm9, %v1639_v27, %v1222_v54  ;;  %v779_v24 = vrot.slane %v474_v57, 2  ;;  %v604_v57 = vrot.slane %v475_v39, 1 }
 0x17b   : > { %840 = vrot.lane.b32.xlu1 %v773_v20, %s5785_s12  ;;  %665 = vrot.lane.b32.xlu0 %v598_v13, %s5786_s13 }
 0x17c   : > { %v780_v14 = vsel %vm715_vm2, %v777_v29, %v779_v24 }
 0x17d   : > { %v6702_v33 = vpop.permute.xlu1 %1024  ;;  %v6704_v28 = vpop.permute.xlu0 %924 }
 0x17f   : > { %1235 = vrot.lane.b32.xlu1 %v472_v30, %s5790_s17  ;;  %1139 = vrot.lane.b32.xlu0 %v775_v40, %s5789_s16 }
 0x181   : > { %v1423_v1 = vpop.permute.xlu1 %1422  ;;  %v1324_v31 = vpop.permute.xlu0 %1323 }
 0x182   : > { %v1737_v10 = vsel %vm1724_vm11, %v1704_v55, %v1423_v1  ;;  %v1705_v8 = vsel %vm1691_vm10, %v1672_v63, %v1324_v31 }
 0x183   : > { %938 = vrot.lane.b32.xlu1 %v472_v30, %s5787_s14  ;;  %842 = vrot.lane.b32.xlu0 %v775_v40, %s5785_s12 }
 0x184   : > { %5570 = vmatprep.mubr.msk.f32.mxu0 %vm1762_vm12, %v1737_v10 }
 0x185   : > { %v6730_v26 = vpop.permute.xlu1 %1026  ;;  %v6732_v11 = vpop.permute.xlu0 %651 }
 0x187   : > { %1337 = vrot.lane.b32.xlu1 %v601_v12, %s5791_s26  ;;  %1237 = vrot.lane.b32.xlu0 %v6706_v45, %s5790_s17 }
 0x189   : > { %v1425_v51 = vpop.permute.xlu1 %1424  ;;  %v6744_v41 = vpop.permute.xlu0 %1125 }
 0x18a   : > { %v1738_v56 = vsel %vm1724_vm11, %v1705_v8, %v1425_v51  ;;  %v781_v51 = vrot.slane %v475_v39, 2 }
 0x18b   : > { %1040 = vrot.lane.b32.xlu1 %v601_v12, %s5788_s15  ;;  %940 = vrot.lane.b32.xlu0 %v6706_v45, %s5787_s14 }
 0x18c   : > { %v5554_v37 = vpop.f32.mrf.mxu0  ;;  %5571 = vmatmul.mubr.msk.f32.gmra.mxu0 %vm1762_vm12, %v1738_v56  ;;  %v782_v56 = vrot.slane %v6795_v59, 2 }
 0x18d   : > { %v2096_v25 = vmul.f32 %v5554_v37, %v6751_v61  ;;  %v6767_v20 = vpop.permute.xlu1 %828  ;;  %v6769_v13 = vpop.permute.xlu0 %653 }
 0x18e   : > { %v1929_v9 = vpop.f32.mrf.mxu0 }
 0x18f   : > { %v2135_v22 = vadd.f32 %v6761_v38, %v2096_v25  ;;  %v2095_v40 = vmul.f32 %v6751_v61, %v1929_v9  ;;  %1438 = vrot.lane.b32.xlu1 %v778_v19, %s5792_s9  ;;  %1339 = vrot.lane.b32.xlu0 %v603_v47, %s5791_s26  ;;  %v1508_v25 = vsel %vm8789_vm0, %v6318_v6, %v6661_v35 }
 0x190   : > { %v1541_v24 = vsel %vm8788_vm6, %v1508_v25, %v6678_v60  ;;  %v1509_v6 = vsel %vm8789_vm0, %v6327_v16, %v6680_v44  ;;  %v6841_v60 = vsel %vm715_vm2, %v781_v51, %v782_v56  ;;  %v6867_v51 = vld [vmem:[#allocation2 + $0x158] sm:$0xff] }
 0x191   : > { %v2167_v54 = vmax.f32 %v2135_v22, 0.0  ;;  %v2134_v15 = vadd.f32 %v6761_v38, %v2095_v40  ;;  %v6779_v23 = vpop.permute.xlu1 %1223  ;;  %v6781_v30 = vpop.permute.xlu0 %1127  ;;  %v6826_v40 = vsel %vm538_vm3, %v604_v57, %v605_v2  ;;  %v1574_v35 = vsel %vm8787_vm7, %v1541_v24, %v6687_v21 }
 0x192   : > { %v1607_v16 = vsel %vm1592_vm4, %v1574_v35, %v6702_v33 }
 0x193   : > { %v2247_v34 = vcombine.high %v2167_v54, %v2167_v54  ;;  %v2254_v45 = vrot.slane %v2167_v54, %v6773_v52  ;;  %v2166_v7 = vmax.f32 %v2134_v15, 0.0  ;;  %1042 = vrot.lane.b32.xlu1 %v603_v47, %s5788_s15  ;;  %667 = vrot.lane.b32.xlu0 %v601_v12, %s5786_s13 }
 0x195   : > { %v2261_v43 = vrot.slane %v2247_v34, %v6773_v52  ;;  %v2230_v50 = vcombine.high %v2166_v7, %v2166_v7  ;;  %v6788_v62 = vpop.permute.xlu1 %926  ;;  %v6790_v55 = vpop.permute.xlu0 %830  ;;  %v2262_v1 = vcombine.high %v2254_v45, %v2254_v45  ;;  %v2237_v10 = vrot.slane %v2166_v7, %v6773_v52 }
 0x196   : > { %v2931_v36 = vsel %vm2902_vm13, %v2254_v45, -inf  ;;  %v607_v34 = vrot.slane %v6816_v17, 1 }
 0x197   : > { %1440 = vrot.lane.b32.xlu1 %v780_v14, %s5792_s9  ;;  %1141 = vrot.lane.b32.xlu0 %v778_v19, %s5789_s16  ;;  %v2263_v31 = vcombine.high %v2261_v43, %v2261_v43  ;;  %v2244_v32 = vrot.slane %v2230_v50, %v6773_v52  ;;  %v2938_v27 = vsel %vm2902_vm13, %v2262_v1, -inf  ;;  %v2945_v5 = vsel %vm2902_vm13, %v2261_v43, -inf }
 0x198   : > { %v2245_v63 = vcombine.high %v2237_v10, %v2237_v10  ;;  %v2903_v46 = vsel %vm2902_vm13, %v2237_v10, -inf  ;;  %v2932_v37 = vrot.slane %v2931_v36, 4  ;;  %v1542_v50 = vsel %vm8788_vm6, %v1509_v6, %v6689_v49 }
 0x199   : > { %v6798_v58 = vpop.permute.xlu1 %1325  ;;  %v6800_v12 = vpop.permute.xlu0 %1225  ;;  %v2952_v42 = vsel %vm2902_vm13, %v2263_v31, -inf  ;;  %v2246_v29 = vcombine.high %v2244_v32, %v2244_v32  ;;  %v2917_v48 = vsel %vm2902_vm13, %v2244_v32, -inf  ;;  %v2904_v22 = vrot.slane %v2903_v46, 4 }
 0x19a   : > { %v2953_v9 = vrot.slane %v2952_v42, 4  ;;  %v2910_v54 = vsel %vm2902_vm13, %v2245_v63, -inf  ;;  %v2918_v15 = vrot.slane %v2917_v48, 4  ;;  %v2933_v1 = vmax.f32 %v2931_v36, %v2932_v37 }
 0x19b   : > { %844 = vrot.lane.b32.xlu1 %v778_v19, %s5785_s12  ;;  %669 = vrot.lane.b32.xlu0 %v603_v47, %s5786_s13  ;;  %v2939_v19 = vrot.slane %v2938_v27, 4  ;;  %v2946_v47 = vrot.slane %v2945_v5, 4  ;;  %v2924_v45 = vsel %vm2902_vm13, %v2246_v29, -inf  ;;  %v2905_v21 = vmax.f32 %v2903_v46, %v2904_v22 }
 0x19c   : > { %v2954_v44 = vmax.f32 %v2952_v42, %v2953_v9  ;;  %v2911_v32 = vrot.slane %v2910_v54, 4  ;;  %v1575_v57 = vsel %vm8787_vm7, %v1542_v50, %v6704_v28  ;;  %v1640_v63 = vsel %vm1625_vm8, %v1607_v16, %v6744_v41  ;;  %v6886_v50 = vld [vmem:[#allocation2 + $0x160] sm:$0x3] }
 0x19d   : > { %v6811_v4 = vpop.permute.xlu1 %1028  ;;  %v6813_v8 = vpop.permute.xlu0 %928  ;;  %v2940_v31 = vmax.f32 %v2938_v27, %v2939_v19  ;;  %v2947_v10 = vmax.f32 %v2945_v5, %v2946_v47  ;;  %v2919_v49 = vmax.f32 %v2917_v48, %v2918_v15  ;;  %v2925_v36 = vrot.slane %v2924_v45, 4  ;;  %v6853_v27 = vld [vmem:[#allocation2 + $0x150] sm:$0xff] }
 0x19e   : > { %v1608_v33 = vsel %vm1592_vm4, %v1575_v57, %v6730_v26  ;;  %v1673_v5 = vsel %vm1658_vm9, %v1640_v63, %v6779_v23  ;;  %v609_v28 = vrot.slane %v6853_v27, 1  ;;  %v2934_v46 = vrot.slane %v2933_v1, 2 }
 0x19f   : > { %1239 = vrot.lane.b32.xlu1 %v475_v39, %s5790_s17  ;;  %1143 = vrot.lane.b32.xlu0 %v780_v14, %s5789_s16  ;;  %v2941_v41 = vrot.slane %v2940_v31, 2  ;;  %v2948_v29 = vrot.slane %v2947_v10, 2  ;;  %v1641_v48 = vsel %vm1625_vm8, %v1608_v33, %v6781_v30  ;;  %v2955_v26 = vrot.slane %v2954_v44, 2 }
 0x1a0   : > { %v2906_v37 = vrot.slane %v2905_v21, 2  ;;  %v2912_v19 = vmax.f32 %v2910_v54, %v2911_v32  ;;  %v1706_v23 = vsel %vm1691_vm10, %v1673_v5, %v6798_v58  ;;  %v2926_v47 = vmax.f32 %v2924_v45, %v2925_v36 }
 0x1a1   : > { %v1427_v7 = vpop.permute.xlu1 %1426  ;;  %v1328_v43 = vpop.permute.xlu0 %1327  ;;  %v1674_v25 = vsel %vm1658_vm9, %v1641_v48, %v6800_v12  ;;  %v8786_v58 = vrot.slane %v6867_v51, 1  ;;  %v786_v54 = vrot.slane %v6853_v27, 2  ;;  %v8785_v15 = vrot.slane %v6867_v51, 2 }
 0x1a2   : > { %v1739_v30 = vsel %vm1724_vm11, %v1706_v23, %v1427_v7  ;;  %v1707_v9 = vsel %vm1691_vm10, %v1674_v25, %v1328_v43  ;;  %v2935_v6 = vmax.f32 %v2933_v1, %v2934_v46  ;;  %v2942_v35 = vmax.f32 %v2940_v31, %v2941_v41 }
 0x1a3   : > { %942 = vrot.lane.b32.xlu1 %v475_v39, %s5787_s14  ;;  %846 = vrot.lane.b32.xlu0 %v780_v14, %s5785_s12  ;;  %v784_v14 = vrot.slane %v6816_v17, 2  ;;  %v2920_v17 = vrot.slane %v2919_v49, 2  ;;  %v2949_v45 = vmax.f32 %v2947_v10, %v2948_v29  ;;  %v2956_v7 = vmax.f32 %v2954_v44, %v2955_v26 }
 0x1a4   : > { %5573 = vmatprep.mubr.msk.f32.mxu0 %vm1762_vm12, %v1739_v30  ;;  %v6895_v43 = vsel %vm538_vm3, %v605_v2, %v607_v34  ;;  %v2907_v31 = vmax.f32 %v2905_v21, %v2906_v37  ;;  %v2913_v10 = vrot.slane %v2912_v19, 2  ;;  %v2927_v44 = vrot.slane %v2926_v47, 2 }
 0x1a5   : > { %v6859_v42 = vpop.permute.xlu1 %1030  ;;  %v6861_v39 = vpop.permute.xlu0 %655  ;;  %v6900_v1 = vsel %vm715_vm2, %v782_v56, %v784_v14  ;;  %v2921_v16 = vmax.f32 %v2919_v49, %v2920_v17  ;;  %v6916_v2 = vsel %vm715_vm2, %v786_v54, %v8785_v15  ;;  %v612_v56 = vrot.slane %v6886_v50, 1 }
 0x1a6   : > { %v1510_v34 = vsel %vm8789_vm0, %v6398_v3, %v6732_v11  ;;  %v2936_v21 = vrot.slane %v2935_v6, 1  ;;  %v2943_v49 = vrot.slane %v2942_v35, 1  ;;  %v2950_v33 = vrot.slane %v2949_v45, 1 }
 0x1a7   : > { %1341 = vrot.lane.b32.xlu1 %v6826_v40, %s5791_s26  ;;  %1241 = vrot.lane.b32.xlu0 %v6795_v59, %s5790_s17  ;;  %v2957_v14 = vrot.slane %v2956_v7, 1  ;;  %v2908_v29 = vrot.slane %v2907_v31, 1  ;;  %v6930_v3 = vmax.f32 %v2912_v19, %v2913_v10  ;;  %v2922_v11 = vrot.slane %v2921_v16, 1 }
 0x1a8   : > { %v6932_v48 = vmax.f32 %v2926_v47, %v2927_v44  ;;  %v6944_v30 = vmax.f32 %v2935_v6, %v2936_v21  ;;  %v6946_v19 = vmax.f32 %v2942_v35, %v2943_v49  ;;  %v6948_v47 = vmax.f32 %v2949_v45, %v2950_v33 }
 0x1a9   : > { %v1429_v22 = vpop.permute.xlu1 %1428  ;;  %v6880_v24 = vpop.permute.xlu0 %1129  ;;  %v2909_v54 = vmax.f32 %v2907_v31, %v2908_v29  ;;  %v2915_v6 = vrot.slane %v6930_v3, 1  ;;  %v6960_v35 = vmax.f32 %v2921_v16, %v2922_v11 }
 0x1aa   : > { %v1740_v12 = vsel %vm1724_vm11, %v1707_v9, %v1429_v22  ;;  %v2929_v45 = vrot.slane %v6932_v48, 1 }
 0x1ab   : > { %1044 = vrot.lane.b32.xlu1 %v6826_v40, %s5788_s15  ;;  %944 = vrot.lane.b32.xlu0 %v6795_v59, %s5787_s14  ;;  %v6911_v59 = vsel %vm538_vm3, %v609_v28, %v8786_v58  ;;  %v1543_v28 = vsel %vm8788_vm6, %v1510_v34, %v6767_v20  ;;  %v1511_v20 = vsel %vm8789_vm0, %v6407_v53, %v6769_v13  ;;  %vm8790_vm0 = vcmask 1047559  }
 0x1ac   : > { %v5557_v32 = vpop.f32.mrf.mxu0  ;;  %5574 = vmatmul.mubr.msk.f32.gmra.mxu0 %vm1762_vm12, %v1740_v12  ;;  %v1576_v26 = vsel %vm8787_vm7, %v1543_v28, %v6788_v62  ;;  %v1544_v9 = vsel %vm8788_vm6, %v1511_v20, %v6790_v55  ;;  %v6952_v53 = vmax.f32 %v2956_v7, %v2957_v14  ;;  %vm8791_vm6 = vcmask 1046534  }
 0x1ad   : > { %v2098_v57 = vmul.f32 %v5557_v32, %v6751_v61  ;;  %v6904_v63 = vpop.permute.xlu1 %832  ;;  %v6906_v36 = vpop.permute.xlu0 %657  ;;  %v1577_v31 = vsel %vm8787_vm7, %v1544_v9, %v6813_v8  ;;  %vm8792_vm7 = vcmask 1045509  }
 0x1ae   : > { %v1939_v5 = vpop.f32.mrf.mxu0 }
 0x1af   : > { %v2137_v46 = vadd.f32 %v6761_v38, %v2098_v57  ;;  %v2097_v41 = vmul.f32 %v6751_v61, %v1939_v5  ;;  %1442 = vrot.lane.b32.xlu1 %v6841_v60, %s5792_s9  ;;  %1343 = vrot.lane.b32.xlu0 %v6895_v43, %s5791_s26 }
 0x1b1   : > { %v2169_v37 = vmax.f32 %v2137_v46, 0.0  ;;  %v2136_v23 = vadd.f32 %v6761_v38, %v2097_v41  ;;  %v6940_v17 = vpop.permute.xlu1 %1227  ;;  %v6942_v25 = vpop.permute.xlu0 %1131 }
 0x1b3   : > { %v2281_v13 = vcombine.high %v2169_v37, %v2169_v37  ;;  %v2288_v62 = vrot.slane %v2169_v37, %v6773_v52  ;;  %v2168_v22 = vmax.f32 %v2136_v23, 0.0  ;;  %1046 = vrot.lane.b32.xlu1 %v6895_v43, %s5788_s15  ;;  %671 = vrot.lane.b32.xlu0 %v6826_v40, %s5786_s13  ;;  %v6971_v40 = vsel %vm1592_vm4, %v1576_v26, %v6811_v4 }
 0x1b5   : > { %v2295_v55 = vrot.slane %v2281_v13, %v6773_v52  ;;  %v2296_v12 = vcombine.high %v2288_v62, %v2288_v62  ;;  %v2987_v7 = vsel %vm2902_vm13, %v2288_v62, -inf  ;;  %v2264_v10 = vcombine.high %v2168_v22, %v2168_v22  ;;  %v6965_v44 = vpop.permute.xlu1 %930  ;;  %v6967_v32 = vpop.permute.xlu0 %834 }
 0x1b6   : > { %v2988_v16 = vrot.slane %v2987_v7, 4  ;;  %v2271_v57 = vrot.slane %v2168_v22, %v6773_v52 }
 0x1b7   : > { %v2297_v34 = vcombine.high %v2295_v55, %v2295_v55  ;;  %v2994_v21 = vsel %vm2902_vm13, %v2296_v12, -inf  ;;  %v3001_v49 = vsel %vm2902_vm13, %v2295_v55, -inf  ;;  %v2278_v33 = vrot.slane %v2264_v10, %v6773_v52  ;;  %1444 = vrot.lane.b32.xlu1 %v6900_v1, %s5792_s9  ;;  %1145 = vrot.lane.b32.xlu0 %v6841_v60, %s5789_s16 }
 0x1b8   : > { %v2989_v4 = vmax.f32 %v2987_v7, %v2988_v16  ;;  %v2995_v5 = vrot.slane %v2994_v21, 4  ;;  %v3002_v14 = vrot.slane %v3001_v49, 4  ;;  %v2279_v8 = vcombine.high %v2271_v57, %v2271_v57 }
 0x1b9   : > { %v3008_v28 = vsel %vm2902_vm13, %v2297_v34, -inf  ;;  %v2280_v46 = vcombine.high %v2278_v33, %v2278_v33  ;;  %v2959_v41 = vsel %vm2902_vm13, %v2271_v57, -inf  ;;  %v2973_v29 = vsel %vm2902_vm13, %v2278_v33, -inf  ;;  %v6986_v11 = vpop.permute.xlu1 %1329  ;;  %v6988_v20 = vpop.permute.xlu0 %1229 }
 0x1ba   : > { %v2990_v26 = vrot.slane %v2989_v4, 2  ;;  %v2996_v37 = vmax.f32 %v2994_v21, %v2995_v5  ;;  %v3003_v23 = vmax.f32 %v3001_v49, %v3002_v14  ;;  %v3009_v9 = vrot.slane %v3008_v28, 4 }
 0x1bb   : > { %v2960_v13 = vrot.slane %v2959_v41, 4  ;;  %v2966_v62 = vsel %vm2902_vm13, %v2279_v8, -inf  ;;  %v2974_v22 = vrot.slane %v2973_v29, 4  ;;  %v2980_v55 = vsel %vm2902_vm13, %v2280_v46, -inf  ;;  %848 = vrot.lane.b32.xlu1 %v6841_v60, %s5785_s12  ;;  %673 = vrot.lane.b32.xlu0 %v6895_v43, %s5786_s13 }
 0x1bc   : > { %v2991_v12 = vmax.f32 %v2989_v4, %v2990_v26  ;;  %v2997_v7 = vrot.slane %v2996_v37, 2  ;;  %v3004_v10 = vrot.slane %v3003_v23, 2  ;;  %v3010_v16 = vmax.f32 %v3008_v28, %v3009_v9 }
 0x1bd   : > { %v2961_v57 = vmax.f32 %v2959_v41, %v2960_v13  ;;  %v2967_v34 = vrot.slane %v2966_v62, 4  ;;  %v2975_v21 = vmax.f32 %v2973_v29, %v2974_v22  ;;  %v2981_v49 = vrot.slane %v2980_v55, 4  ;;  %v6996_v33 = vpop.permute.xlu1 %1032  ;;  %v6998_v5 = vpop.permute.xlu0 %932 }
 0x1be   : > { %v2992_v14 = vrot.slane %v2991_v12, 1  ;;  %v2998_v8 = vmax.f32 %v2996_v37, %v2997_v7  ;;  %v3005_v46 = vmax.f32 %v3003_v23, %v3004_v10  ;;  %v3011_v0 = vrot.slane %v3010_v16, 2 }
 0x1bf   : > { %v2962_v60 = vrot.slane %v2961_v57, 2  ;;  %v2968_v15 = vmax.f32 %v2966_v62, %v2967_v34  ;;  %v2976_v58 = vrot.slane %v2975_v21, 2  ;;  %v2982_v43 = vmax.f32 %v2980_v55, %v2981_v49  ;;  %1243 = vrot.lane.b32.xlu1 %v6853_v27, %s5790_s17  ;;  %1147 = vrot.lane.b32.xlu0 %v6900_v1, %s5789_s16 }
 0x1c0   : > { %v2916_v4 = vmax.f32 %v6930_v3, %v2915_v6  ;;  %v2930_v28 = vmax.f32 %v6932_v48, %v2929_v45  ;;  %v7007_v41 = vsel %vm1592_vm4, %v2909_v54, -inf  ;;  %v3012_v29 = vmax.f32 %v3010_v16, %v3011_v0 }
 0x1c1   : > { %v2963_v26 = vmax.f32 %v2961_v57, %v2962_v60  ;;  %v2969_v37 = vrot.slane %v2968_v15, 2  ;;  %v2977_v23 = vmax.f32 %v2975_v21, %v2976_v58  ;;  %v2983_v9 = vrot.slane %v2982_v43, 2  ;;  %v1431_v13 = vpop.permute.xlu1 %1430  ;;  %v1332_v62 = vpop.permute.xlu0 %1331 }
 0x1c2   : > { %v7011_v22 = vsel %vm1592_vm4, %v6960_v35, -inf  ;;  %v1610_v3 = vsel %vm1592_vm4, %v1577_v31, %v6859_v42  ;;  %v2993_v6 = vmax.f32 %v2991_v12, %v2992_v14  ;;  %v2999_v48 = vrot.slane %v2998_v8, 1 }
 0x1c3   : > { %v3006_v54 = vrot.slane %v3005_v46, 1  ;;  %v2964_v45 = vrot.slane %v2963_v26, 1  ;;  %v2970_v0 = vmax.f32 %v2968_v15, %v2969_v37  ;;  %v2978_v55 = vrot.slane %v2977_v23, 1  ;;  %946 = vrot.lane.b32.xlu1 %v6853_v27, %s5787_s14  ;;  %850 = vrot.lane.b32.xlu0 %v6900_v1, %s5785_s12 }
 0x1c4   : > { %v3802_v58 = vsel %vm1592_vm4, %v2916_v4, -inf  ;;  %v1642_v42 = vsel %vm1625_vm8, %v6971_v40, %v6880_v24  ;;  %v3013_v35 = vrot.slane %v3012_v29, 1  ;;  %v2984_v31 = vmax.f32 %v2982_v43, %v2983_v9 }
 0x1c5   : > { %v3808_v12 = vsel %vm1592_vm4, %v2930_v28, -inf  ;;  %v2965_v15 = vmax.f32 %v2963_v26, %v2964_v45  ;;  %v2971_v7 = vrot.slane %v2970_v0, 1  ;;  %v1675_v27 = vsel %vm1658_vm9, %v1642_v42, %v6940_v17  ;;  %v7026_v10 = vpop.permute.xlu1 %1034  ;;  %v7028_v1 = vpop.permute.xlu0 %659 }
 0x1c6   : > { %v3000_v16 = vmax.f32 %v2998_v8, %v2999_v48  ;;  %v2979_v57 = vmax.f32 %v2977_v23, %v2978_v55  ;;  %v2985_v34 = vrot.slane %v2984_v31, 1  ;;  %v1643_v24 = vsel %vm1625_vm8, %v1610_v3, %v6942_v25 }
 0x1c7   : > { %v3007_v40 = vmax.f32 %v3005_v46, %v3006_v54  ;;  %v3812_v21 = vsel %vm1592_vm4, %v2993_v6, -inf  ;;  %v2972_v49 = vmax.f32 %v2970_v0, %v2971_v7  ;;  %v3800_v14 = vsel %vm1592_vm4, %v2965_v15, -inf  ;;  %1345 = vrot.lane.b32.xlu1 %v6911_v59, %s5791_s26  ;;  %1245 = vrot.lane.b32.xlu0 %v6867_v51, %s5790_s17 }
 0x1c8   : > { %v3014_v17 = vmax.f32 %v3012_v29, %v3013_v35  ;;  %v2986_v8 = vmax.f32 %v2984_v31, %v2985_v34  ;;  %v3806_v60 = vsel %vm1592_vm4, %v2979_v57, -inf  ;;  %v1708_v25 = vsel %vm1691_vm10, %v1675_v27, %v6986_v11 }
 0x1c9   : > { %v3803_v46 = vsel %vm1592_vm4, %v2972_v49, -inf  ;;  %v3807_v43 = vmax.f32 %v7011_v22, %v3806_v60  ;;  %v1676_v4 = vsel %vm1658_vm9, %v1643_v24, %v6988_v20  ;;  %v1741_v28 = vsel %vm1724_vm11, %v1708_v25, %v1431_v13  ;;  %v1433_v26 = vpop.permute.xlu1 %1432  ;;  %v7046_v37 = vpop.permute.xlu0 %1133 }
 0x1ca   : > { %v3801_v29 = vmax.f32 %v7007_v41, %v3800_v14  ;;  %v3804_v23 = vmax.f32 %v3802_v58, %v3803_v46  ;;  %v3809_v9 = vsel %vm1592_vm4, %v2986_v8, -inf  ;;  %v1709_v3 = vsel %vm1691_vm10, %v1676_v4, %v1332_v62  ;;  %5576 = vmatprep.mubr.msk.f32.mxu0 %vm1762_vm12, %v1741_v28 }
 0x1cb   : > { %v3815_v11 = vsel %vm1592_vm4, %v3000_v16, -inf  ;;  %v3810_v22 = vmax.f32 %v3808_v12, %v3809_v9  ;;  %v1742_v6 = vsel %vm1724_vm11, %v1709_v3, %v1433_v26  ;;  %1048 = vrot.lane.b32.xlu1 %v6911_v59, %s5788_s15  ;;  %v8797_v20 = vrot.slane %v6867_v51, 1  ;;  %948 = vrot.lane.b32.xlu0 %v6867_v51, %s5787_s14 }
 0x1cc   : > { %v3811_v13 = vsel %vm1592_vm4, %v6944_v30, -inf  ;;  %v3814_v62 = vsel %vm1592_vm4, %v6946_v19, -inf  ;;  %v3818_v48 = vsel %vm1592_vm4, %v3007_v40, -inf  ;;  %v4056_v54 = vsel %vm4055_vm14, %v3804_v23, %v3801_v29  ;;  %v5560_v45 = vpop.f32.mrf.mxu0  ;;  %5577 = vmatmul.mubr.msk.f32.gmra.mxu0 %vm1762_vm12, %v1742_v6 }
 0x1cd   : > { %v7061_v41 = vsel %vm538_vm3, %v8797_v20, %v612_v56  ;;  %v3813_v0 = vmax.f32 %v3811_v13, %v3812_v21  ;;  %v3821_v56 = vsel %vm1592_vm4, %v3014_v17, -inf  ;;  %v4058_v55 = vsel %vm4057_vm15, %v3807_v43, %v4056_v54  ;;  %v7075_v58 = vpop.permute.xlu1 %836  ;;  %v7077_v19 = vpop.permute.xlu0 %661 }
 0x1ce   : > { %v2100_v30 = vmul.f32 %v5560_v45, %v6751_v61  ;;  %v3817_v42 = vsel %vm1592_vm4, %v6948_v47, -inf  ;;  %v3820_v35 = vsel %vm1592_vm4, %v6952_v53, -inf  ;;  %v3816_v31 = vmax.f32 %v3814_v62, %v3815_v11  ;;  %v1949_v15 = vpop.f32.mrf.mxu0 }
 0x1cf   : > { %v4060_v12 = vsel %vm8794_vm1, %v3810_v22, %v4058_v55  ;;  %v3819_v7 = vmax.f32 %v3817_v42, %v3818_v48  ;;  %v2099_v57 = vmul.f32 %v6751_v61, %v1949_v15  ;;  %1446 = vrot.lane.b32.xlu1 %v6916_v2, %s5792_s9  ;;  %v3822_v34 = vmax.f32 %v3820_v35, %v3821_v56  ;;  %v481_v22 = vld [vmem:[#allocation2 + $0x168] sm:$0xff] }
 0x1d0   : > { %v4062_v27 = vsel %vm8793_vm5, %v3813_v0, %v4060_v12  ;;  %v2139_v16 = vadd.f32 %v6761_v38, %v2100_v30  ;;  %1347 = vrot.lane.b32.xlu0 %v7061_v41, %s5791_s26  ;;  %v789_v53 = vrot.slane %v6886_v50, 2  ;;  %v8798_v50 = vrot.slane %v6867_v51, 2  ;;  %v7124_v51 = vld [vmem:[#allocation2 + $0x170] sm:$0xff] }
 0x1d1   : > { %v4064_v47 = vsel %vm8792_vm7, %v3816_v31, %v4062_v27  ;;  %v2138_v21 = vadd.f32 %v6761_v38, %v2099_v57  ;;  %v7095_v49 = vpop.permute.xlu1 %1231  ;;  %v7097_v14 = vpop.permute.xlu0 %1135  ;;  %v614_v6 = vrot.slane %v481_v22, 1  ;;  %v615_v48 = vrot.slane %v7124_v51, 1  ;;  %v7147_v31 = vld [vmem:[#allocation2 + $0x178] sm:$0x3] }
 0x1d2   : > { %v4066_v24 = vsel %vm8791_vm6, %v3819_v7, %v4064_v47  ;;  %v2171_v40 = vmax.f32 %v2139_v16, 0.0  ;;  %v7112_v46 = vsel %vm715_vm2, %v8798_v50, %v789_v53  ;;  %v791_v35 = vrot.slane %v481_v22, 2  ;;  %v5749_v27 = vld [vmem:[#allocation2 + $0xd8] sm:$0xff] }
 0x1d3   : > { %v7100_v17 = vsel %vm8790_vm0, %v3822_v34, %v4066_v24  ;;  %v2170_v25 = vmax.f32 %v2138_v21, 0.0  ;;  %1050 = vrot.lane.b32.xlu1 %v7061_v41, %s5788_s15  ;;  %vm8799_vm0 = vcmask 31744   ;;  %v7155_v34 = vsel %vm538_vm3, %v614_v6, %v615_v48 }
 0x1d4   : > { %4324 = vst.msk [vmem:[#allocation3 + $0x11] sm:$0xff] %vm1592_vm4, %v7100_v17  ;;  %v2315_v8 = vcombine.high %v2171_v40, %v2171_v40  ;;  %v2322_v60 = vrot.slane %v2171_v40, %v6773_v52  ;;  %675 = vrot.lane.b32.xlu0 %v6911_v59, %s5786_s13  ;;  %v1512_v16 = vsel %vm8799_vm0, %v5749_v27, %v6861_v39  ;;  %vm8800_vm6 = vcmask 64512   ;;  %v5750_v40 = vld [vmem:[#allocation2 + $0xe0] sm:$0xff] }
 0x1d5   : > { %v2298_v4 = vcombine.high %v2170_v25, %v2170_v25  ;;  %v7115_v28 = vpop.permute.xlu1 %934  ;;  %v7117_v26 = vpop.permute.xlu0 %838  ;;  %v2305_v9 = vrot.slane %v2170_v25, %v6773_v52  ;;  %v1545_v47 = vsel %vm8800_vm6, %v1512_v16, %v6904_v63  ;;  %v617_v39 = vrot.slane %v7147_v31, 1 }
 0x1d6   : > { %v2329_v43 = vrot.slane %v2315_v8, %v6773_v52  ;;  %v2330_v29 = vcombine.high %v2322_v60, %v2322_v60  ;;  %v3043_v20 = vsel %vm2902_vm13, %v2322_v60, -inf  ;;  %v1513_v21 = vsel %vm8799_vm0, %v5750_v40, %v6906_v36 }
 0x1d7   : > { %1448 = vrot.lane.b32.xlu1 %v7112_v46, %s5792_s9  ;;  %v2312_v59 = vrot.slane %v2298_v4, %v6773_v52  ;;  %v2313_v45 = vcombine.high %v2305_v9, %v2305_v9  ;;  %v3015_v0 = vsel %vm2902_vm13, %v2305_v9, -inf  ;;  %v3044_v12 = vrot.slane %v3043_v20, 4 }
 0x1d8   : > { %v2331_v23 = vcombine.high %v2329_v43, %v2329_v43  ;;  %1149 = vrot.lane.b32.xlu0 %v6916_v2, %s5789_s16  ;;  %v3050_v13 = vsel %vm2902_vm13, %v2330_v29, -inf  ;;  %v3057_v62 = vsel %vm2902_vm13, %v2329_v43, -inf  ;;  %v3016_v57 = vrot.slane %v3015_v0, 4 }
 0x1d9   : > { %v7127_v3 = vpop.permute.xlu1 %1333  ;;  %v7129_v11 = vpop.permute.xlu0 %1233  ;;  %v2314_v56 = vcombine.high %v2312_v59, %v2312_v59  ;;  %v3029_v55 = vsel %vm2902_vm13, %v2312_v59, -inf  ;;  %v3051_v15 = vrot.slane %v3050_v13, 4  ;;  %v3058_v7 = vrot.slane %v3057_v62, 4 }
 0x1da   : > { %v3064_v54 = vsel %vm2902_vm13, %v2331_v23, -inf  ;;  %v3022_v53 = vsel %vm2902_vm13, %v2313_v45, -inf  ;;  %v3030_v24 = vrot.slane %v3029_v55, 4  ;;  %vm8801_vm7 = vcmask 97280  }
 0x1db   : > { %852 = vrot.lane.b32.xlu1 %v6916_v2, %s5785_s12  ;;  %v792_v2 = vrot.slane %v7124_v51, 2  ;;  %v1578_v8 = vsel %vm8801_vm7, %v1545_v47, %v6965_v44  ;;  %v3036_v60 = vsel %vm2902_vm13, %v2314_v56, -inf  ;;  %v1546_v43 = vsel %vm8800_vm6, %v1513_v21, %v6967_v32  ;;  %v7184_v32 = vld [vmem:[#allocation2 + $0x180] sm:$0xff] }
 0x1dc   : > { %677 = vrot.lane.b32.xlu0 %v7061_v41, %s5786_s13  ;;  %v3065_v41 = vrot.slane %v3064_v54, 4  ;;  %v3045_v4 = vmax.f32 %v3043_v20, %v3044_v12  ;;  %v3052_v29 = vmax.f32 %v3050_v13, %v3051_v15  ;;  %v3059_v23 = vmax.f32 %v3057_v62, %v3058_v7 }
 0x1dd   : > { %v7142_v30 = vpop.permute.xlu1 %1036  ;;  %v7144_v42 = vpop.permute.xlu0 %936  ;;  %v7171_v63 = vsel %vm715_vm2, %v791_v35, %v792_v2  ;;  %v1611_v36 = vsel %vm1592_vm4, %v1578_v8, %v6996_v33  ;;  %v3017_v44 = vmax.f32 %v3015_v0, %v3016_v57  ;;  %v3023_v59 = vrot.slane %v3022_v53, 4  ;;  %v7217_v8 = vld [vmem:[#allocation2 + $0x190] sm:$0x3] }
 0x1de   : > { %v3066_v9 = vmax.f32 %v3064_v54, %v3065_v41  ;;  %v1579_v6 = vsel %vm8801_vm7, %v1546_v43, %v6998_v5  ;;  %v1644_v45 = vsel %vm1625_vm8, %v1611_v36, %v7046_v37  ;;  %v3031_v56 = vmax.f32 %v3029_v55, %v3030_v24  ;;  %v7198_v55 = vld [vmem:[#allocation2 + $0x188] sm:$0xff]  ;;  %vm8802_vm7 = vmmov %vm8799_vm0 }
 0x1df   : > { %1247 = vrot.lane.b32.xlu1 %v481_v22, %s5790_s17  ;;  %v3037_v35 = vrot.slane %v3036_v60, 4  ;;  %v1612_v33 = vsel %vm1592_vm4, %v1579_v6, %v7026_v10  ;;  %v1677_v20 = vsel %vm1658_vm9, %v1644_v45, %v7095_v49  ;;  %v794_v5 = vrot.slane %v7147_v31, 2 }
 0x1e0   : > { %1151 = vrot.lane.b32.xlu0 %v7112_v46, %s5789_s16  ;;  %v991_v37 = vrot.slane %v7184_v32, 1  ;;  %v3046_v62 = vrot.slane %v3045_v4, 2  ;;  %v3053_v54 = vrot.slane %v3052_v29, 2  ;;  %v3060_v0 = vrot.slane %v3059_v23, 2 }
 0x1e1   : > { %v1435_v25 = vpop.permute.xlu1 %1434  ;;  %v1336_v50 = vpop.permute.xlu0 %1335  ;;  %v3067_v10 = vrot.slane %v3066_v9, 2  ;;  %v3018_v12 = vrot.slane %v3017_v44, 2  ;;  %v3024_v15 = vmax.f32 %v3022_v53, %v3023_v59  ;;  %v1710_v49 = vsel %vm1691_vm10, %v1677_v20, %v7127_v3 }
 0x1e2   : > { %v3032_v31 = vrot.slane %v3031_v56, 2  ;;  %v3038_v7 = vmax.f32 %v3036_v60, %v3037_v35  ;;  %v1743_v16 = vsel %vm1724_vm11, %v1710_v49, %v1435_v25  ;;  %v1092_v3 = vrot.slane %v7184_v32, 2 }
 0x1e3   : > { %950 = vrot.lane.b32.xlu1 %v481_v22, %s5787_s14  ;;  %5579 = vmatprep.mubr.msk.f32.mxu0 %vm1762_vm12, %v1743_v16  ;;  %v992_v47 = vrot.slane %v7198_v55, 1  ;;  %v1093_v53 = vrot.slane %v7198_v55, 2  ;;  %v3047_v24 = vmax.f32 %v3045_v4, %v3046_v62  ;;  %v3061_v40 = vmax.f32 %v3059_v23, %v3060_v0 }
 0x1e4   : > { %854 = vrot.lane.b32.xlu0 %v7112_v46, %s5785_s12  ;;  %v1645_v46 = vsel %vm1625_vm8, %v1612_v33, %v7097_v14  ;;  %v3068_v60 = vmax.f32 %v3066_v9, %v3067_v10  ;;  %v7225_v25 = vsel %vm538_vm3, %v615_v48, %v617_v39  ;;  %v3019_v43 = vmax.f32 %v3017_v44, %v3018_v12  ;;  %v5751_v44 = vld [vmem:[#allocation2 + $0xf0] sm:$0xff]  ;;  %v5752_v10 = vld [vmem:[#allocation2 + $0xf8] sm:$0xff] }
 0x1e5   : > { %v7190_v22 = vpop.permute.xlu1 %1038  ;;  %v7192_v13 = vpop.permute.xlu0 %663  ;;  %v1678_v27 = vsel %vm1658_vm9, %v1645_v46, %v7129_v11  ;;  %v3054_v11 = vmax.f32 %v3052_v29, %v3053_v54  ;;  %v3025_v4 = vrot.slane %v3024_v15, 2  ;;  %v3033_v29 = vmax.f32 %v3031_v56, %v3032_v31 }
 0x1e6   : > { %v1711_v14 = vsel %vm1691_vm10, %v1678_v27, %v1336_v50  ;;  %v7230_v50 = vsel %vm715_vm2, %v792_v2, %v794_v5  ;;  %v3039_v23 = vrot.slane %v3038_v7, 2  ;;  %v7242_v48 = vsel %vm538_vm3, %v991_v37, %v992_v47 }
 0x1e7   : > { %1349 = vrot.lane.b32.xlu1 %v7155_v34, %s5791_s26  ;;  %v7247_v2 = vsel %vm715_vm2, %v1092_v3, %v1093_v53  ;;  %v994_v39 = vrot.slane %v7217_v8, 1  ;;  %v3048_v45 = vrot.slane %v3047_v24, 1  ;;  %v3055_v56 = vrot.slane %v3054_v11, 1 }
 0x1e8   : > { %1249 = vrot.lane.b32.xlu0 %v7124_v51, %s5790_s17  ;;  %v3062_v35 = vrot.slane %v3061_v40, 1  ;;  %v3069_v20 = vrot.slane %v3068_v60, 1  ;;  %v3020_v54 = vrot.slane %v3019_v43, 1  ;;  %v7258_v0 = vmax.f32 %v3024_v15, %v3025_v4 }
 0x1e9   : > { %v1437_v41 = vpop.permute.xlu1 %1436  ;;  %v7211_v57 = vpop.permute.xlu0 %1137  ;;  %v3034_v46 = vrot.slane %v3033_v29, 1  ;;  %v7273_v27 = vmax.f32 %v3047_v24, %v3048_v45 }
 0x1ea   : > { %v1744_v21 = vsel %vm1724_vm11, %v1711_v14, %v1437_v41  ;;  %v7277_v16 = vmax.f32 %v3061_v40, %v3062_v35  ;;  %v3027_v24 = vrot.slane %v7258_v0, 1 }
 0x1eb   : > { %1052 = vrot.lane.b32.xlu1 %v7155_v34, %s5788_s15  ;;  %5580 = vmatmul.mubr.msk.f32.gmra.mxu0 %vm1762_vm12, %v1744_v21  ;;  %v7287_v21 = vmax.f32 %v3033_v29, %v3034_v46 }
 0x1ec   : > { %v5563_v36 = vpop.f32.mrf.mxu0  ;;  %952 = vrot.lane.b32.xlu0 %v7124_v51, %s5787_s14  ;;  %v1514_v51 = vsel %vm8799_vm0, %v5751_v44, %v7028_v1  ;;  %v7260_v1 = vmax.f32 %v3038_v7, %v3039_v23  ;;  %vm8803_vm0 = vcmask 97280   ;;  %v7275_v7 = vmax.f32 %v3054_v11, %v3055_v56 }
 0x1ed   : > { %v2102_v9 = vmul.f32 %v5563_v36, %v6751_v61  ;;  %v7235_v59 = vpop.permute.xlu1 %840  ;;  %v7237_v6 = vpop.permute.xlu0 %665  ;;  %v1547_v5 = vsel %vm8800_vm6, %v1514_v51, %v7075_v58  ;;  %v1515_v58 = vsel %vm8802_vm7, %v5752_v10, %v7077_v19  ;;  %v7281_v19 = vmax.f32 %v3068_v60, %v3069_v20  ;;  %vm8804_vm7 = vmmov %vm8803_vm0 }
 0x1ee   : > { %v1959_v33 = vpop.f32.mrf.mxu0  ;;  %v1580_v12 = vsel %vm8803_vm0, %v1547_v5, %v7115_v28  ;;  %v1548_v14 = vsel %vm8800_vm6, %v1515_v58, %v7117_v26  ;;  %v3041_v11 = vrot.slane %v7260_v1, 1  ;;  %vm8805_vm0 = vcmask 1045509  }
 0x1ef   : > { %v2141_v37 = vadd.f32 %v6761_v38, %v2102_v9  ;;  %v2101_v62 = vmul.f32 %v6751_v61, %v1959_v33  ;;  %1450 = vrot.lane.b32.xlu1 %v7171_v63, %s5792_s9  ;;  %v1581_v29 = vsel %vm8804_vm7, %v1548_v14, %v7144_v42  ;;  %vm8806_vm6 = vcmask 1046534  }
 0x1f0   : > { %1351 = vrot.lane.b32.xlu0 %v7225_v25, %s5791_s26  ;;  %vm8807_vm7 = vcmask 1047559  }
 0x1f1   : > { %v2173_v61 = vmax.f32 %v2141_v37, 0.0  ;;  %v2140_v49 = vadd.f32 %v6761_v38, %v2101_v62  ;;  %v7269_v31 = vpop.permute.xlu1 %1235  ;;  %v7271_v15 = vpop.permute.xlu0 %1139  ;;  %v3021_v38 = vmax.f32 %v3019_v43, %v3020_v54  ;;  %v7300_v43 = vsel %vm1592_vm4, %v1580_v12, %v7142_v30 }
 0x1f3   : > { %v2349_v41 = vcombine.high %v2173_v61, %v2173_v61  ;;  %v2356_v28 = vrot.slane %v2173_v61, %v6773_v52  ;;  %v2172_v3 = vmax.f32 %v2140_v49, 0.0  ;;  %1054 = vrot.lane.b32.xlu1 %v7225_v25, %s5788_s15 }
 0x1f4   : > { %679 = vrot.lane.b32.xlu0 %v7155_v34, %s5786_s13 }
 0x1f5   : > { %v2363_v26 = vrot.slane %v2349_v41, %v6773_v52  ;;  %v2364_v40 = vcombine.high %v2356_v28, %v2356_v28  ;;  %v3099_v60 = vsel %vm2902_vm13, %v2356_v28, -inf  ;;  %v2332_v4 = vcombine.high %v2172_v3, %v2172_v3  ;;  %v7294_v23 = vpop.permute.xlu1 %938  ;;  %v7296_v36 = vpop.permute.xlu0 %842 }
 0x1f6   : > { %v3100_v9 = vrot.slane %v3099_v60, 4  ;;  %v2339_v34 = vrot.slane %v2172_v3, %v6773_v52 }
 0x1f7   : > { %v2365_v44 = vcombine.high %v2363_v26, %v2363_v26  ;;  %v3106_v51 = vsel %vm2902_vm13, %v2364_v40, -inf  ;;  %v3113_v45 = vsel %vm2902_vm13, %v2363_v26, -inf  ;;  %v2346_v56 = vrot.slane %v2332_v4, %v6773_v52  ;;  %1452 = vrot.lane.b32.xlu1 %v7230_v50, %s5792_s9 }
 0x1f8   : > { %v3101_v35 = vmax.f32 %v3099_v60, %v3100_v9  ;;  %v3107_v33 = vrot.slane %v3106_v51, 4  ;;  %v3114_v30 = vrot.slane %v3113_v45, 4  ;;  %v2347_v20 = vcombine.high %v2339_v34, %v2339_v34  ;;  %1153 = vrot.lane.b32.xlu0 %v7171_v63, %s5789_s16 }
 0x1f9   : > { %v3120_v42 = vsel %vm2902_vm13, %v2365_v44, -inf  ;;  %v2348_v5 = vcombine.high %v2346_v56, %v2346_v56  ;;  %v3071_v37 = vsel %vm2902_vm13, %v2339_v34, -inf  ;;  %v3085_v62 = vsel %vm2902_vm13, %v2346_v56, -inf  ;;  %v7315_v54 = vpop.permute.xlu1 %1337  ;;  %v7317_v46 = vpop.permute.xlu0 %1237 }
 0x1fa   : > { %v3102_v10 = vrot.slane %v3101_v35, 2  ;;  %v3108_v58 = vmax.f32 %v3106_v51, %v3107_v33  ;;  %v3115_v12 = vmax.f32 %v3113_v45, %v3114_v30  ;;  %v3121_v61 = vrot.slane %v3120_v42, 4 }
 0x1fb   : > { %v3072_v49 = vrot.slane %v3071_v37, 4  ;;  %v3078_v14 = vsel %vm2902_vm13, %v2347_v20, -inf  ;;  %v3086_v41 = vrot.slane %v3085_v62, 4  ;;  %v3092_v28 = vsel %vm2902_vm13, %v2348_v5, -inf  ;;  %856 = vrot.lane.b32.xlu1 %v7171_v63, %s5785_s12 }
 0x1fc   : > { %v3103_v3 = vmax.f32 %v3101_v35, %v3102_v10  ;;  %v3109_v26 = vrot.slane %v3108_v58, 2  ;;  %v3116_v40 = vrot.slane %v3115_v12, 2  ;;  %v3122_v60 = vmax.f32 %v3120_v42, %v3121_v61  ;;  %681 = vrot.lane.b32.xlu0 %v7225_v25, %s5786_s13 }
 0x1fd   : > { %v3073_v4 = vmax.f32 %v3071_v37, %v3072_v49  ;;  %v3079_v9 = vrot.slane %v3078_v14, 4  ;;  %v3087_v34 = vmax.f32 %v3085_v62, %v3086_v41  ;;  %v3093_v44 = vrot.slane %v3092_v28, 4  ;;  %v7325_v51 = vpop.permute.xlu1 %1040  ;;  %v7327_v45 = vpop.permute.xlu0 %940 }
 0x1fe   : > { %v3104_v56 = vrot.slane %v3103_v3, 1  ;;  %v3110_v33 = vmax.f32 %v3108_v58, %v3109_v26  ;;  %v3117_v30 = vmax.f32 %v3115_v12, %v3116_v40  ;;  %v3123_v20 = vrot.slane %v3122_v60, 2 }
 0x1ff   : > { %v3074_v63 = vrot.slane %v3073_v4, 2  ;;  %v3080_v35 = vmax.f32 %v3078_v14, %v3079_v9  ;;  %v3088_v5 = vrot.slane %v3087_v34, 2  ;;  %v3094_v10 = vmax.f32 %v3092_v28, %v3093_v44  ;;  %1251 = vrot.lane.b32.xlu1 %v7184_v32, %s5790_s17 }
 0x200   : > { %v3028_v25 = vmax.f32 %v7258_v0, %v3027_v24  ;;  %v3042_v42 = vmax.f32 %v7260_v1, %v3041_v11  ;;  %v7334_v37 = vsel %vm1592_vm4, %v3021_v38, -inf  ;;  %v3124_v62 = vmax.f32 %v3122_v60, %v3123_v20  ;;  %1155 = vrot.lane.b32.xlu0 %v7230_v50, %s5789_s16 }
 0x201   : > { %v3075_v58 = vmax.f32 %v3073_v4, %v3074_v63  ;;  %v3081_v12 = vrot.slane %v3080_v35, 2  ;;  %v3089_v61 = vmax.f32 %v3087_v34, %v3088_v5  ;;  %v3095_v49 = vrot.slane %v3094_v10, 2  ;;  %v1439_v14 = vpop.permute.xlu1 %1438  ;;  %v1340_v41 = vpop.permute.xlu0 %1339 }
 0x202   : > { %v3829_v28 = vsel %vm1592_vm4, %v7287_v21, -inf  ;;  %v1614_v0 = vsel %vm1592_vm4, %v1581_v29, %v7190_v22  ;;  %v3105_v1 = vmax.f32 %v3103_v3, %v3104_v56  ;;  %v3111_v24 = vrot.slane %v3110_v33, 1 }
 0x203   : > { %v3118_v38 = vrot.slane %v3117_v30, 1  ;;  %v3076_v11 = vrot.slane %v3075_v58, 1  ;;  %v3082_v26 = vmax.f32 %v3080_v35, %v3081_v12  ;;  %v3090_v40 = vrot.slane %v3089_v61, 1  ;;  %954 = vrot.lane.b32.xlu1 %v7184_v32, %s5787_s14 }
 0x204   : > { %v3826_v60 = vsel %vm1592_vm4, %v3028_v25, -inf  ;;  %v1646_v4 = vsel %vm1625_vm8, %v7300_v43, %v7211_v57  ;;  %v3125_v9 = vrot.slane %v3124_v62, 1  ;;  %v3096_v21 = vmax.f32 %v3094_v10, %v3095_v49  ;;  %858 = vrot.lane.b32.xlu0 %v7230_v50, %s5785_s12 }
 0x205   : > { %v3832_v22 = vsel %vm1592_vm4, %v3042_v42, -inf  ;;  %v3077_v29 = vmax.f32 %v3075_v58, %v3076_v11  ;;  %v3083_v3 = vrot.slane %v3082_v26, 1  ;;  %v1679_v34 = vsel %vm1658_vm9, %v1646_v4, %v7269_v31  ;;  %v7353_v44 = vpop.permute.xlu1 %1042  ;;  %v7355_v32 = vpop.permute.xlu0 %667 }
 0x206   : > { %v3112_v56 = vmax.f32 %v3110_v33, %v3111_v24  ;;  %v3091_v20 = vmax.f32 %v3089_v61, %v3090_v40  ;;  %v3097_v63 = vrot.slane %v3096_v21, 1  ;;  %v1647_v57 = vsel %vm1625_vm8, %v1614_v0, %v7271_v15 }
 0x207   : > { %v3119_v43 = vmax.f32 %v3117_v30, %v3118_v38  ;;  %v3836_v50 = vsel %vm1592_vm4, %v3105_v1, -inf  ;;  %v3084_v35 = vmax.f32 %v3082_v26, %v3083_v3  ;;  %v3824_v5 = vsel %vm1592_vm4, %v3077_v29, -inf  ;;  %1353 = vrot.lane.b32.xlu1 %v7242_v48, %s5791_s26 }
 0x208   : > { %v3126_v31 = vmax.f32 %v3124_v62, %v3125_v9  ;;  %v3098_v10 = vmax.f32 %v3096_v21, %v3097_v63  ;;  %v3830_v25 = vsel %vm1592_vm4, %v3091_v20, -inf  ;;  %v1712_v33 = vsel %vm1691_vm10, %v1679_v34, %v7315_v54  ;;  %1253 = vrot.lane.b32.xlu0 %v7198_v55, %s5790_s17  ;;  %v7417_v34 = vld [vmem:[%s8777_s3] ss:$0 sm:$0xff] }
 0x209   : > { %v3827_v15 = vsel %vm1592_vm4, %v3084_v35, -inf  ;;  %v3831_v30 = vmax.f32 %v3829_v28, %v3830_v25  ;;  %v1680_v42 = vsel %vm1658_vm9, %v1647_v57, %v7317_v46  ;;  %v1745_v58 = vsel %vm1724_vm11, %v1712_v33, %v1439_v14  ;;  %v1441_v12 = vpop.permute.xlu1 %1440  ;;  %v7372_v61 = vpop.permute.xlu0 %1141  ;;  %v488_v33 = vld [vmem:[#allocation2 + $0x1a0] sm:$0xff] }
 0x20a   : > { %v3825_v62 = vmax.f32 %v7334_v37, %v3824_v5  ;;  %v3828_v49 = vmax.f32 %v3826_v60, %v3827_v15  ;;  %v3833_v0 = vsel %vm1592_vm4, %v3098_v10, -inf  ;;  %v1713_v54 = vsel %vm1691_vm10, %v1680_v42, %v1340_v41  ;;  %5582 = vmatprep.mubr.msk.f32.mxu0 %vm1762_vm12, %v1745_v58  ;;  %v4333_v10 = vld [vmem:[#allocation3 + $0x8] sm:$0x3]  ;;  %v489_v58 = vld [vmem:[#allocation2 + $0x1a8] sm:$0x3] }
 0x20b   : > { %v3839_v1 = vsel %vm1592_vm4, %v3112_v56, -inf  ;;  %v3834_v28 = vmax.f32 %v3832_v22, %v3833_v0  ;;  %v1746_v24 = vsel %vm1724_vm11, %v1713_v54, %v1441_v12  ;;  %1056 = vrot.lane.b32.xlu1 %v7242_v48, %s5788_s15  ;;  %v995_v46 = vsel %vm538_vm3, %v992_v47, %v994_v39  ;;  %v7401_v39 = vld [vmem:[%s8776_s2] ss:$0 sm:$0xff]  ;;  %v487_v42 = vld [vmem:[#allocation2 + $0x198] sm:$0xff] }
 0x20c   : > { %v3835_v37 = vsel %vm1592_vm4, %v7273_v27, -inf  ;;  %v3838_v14 = vsel %vm1592_vm4, %v7275_v7, -inf  ;;  %v3842_v41 = vsel %vm1592_vm4, %v3119_v43, -inf  ;;  %v4069_v38 = vsel %vm4055_vm14, %v3828_v49, %v3825_v62  ;;  %v5566_v11 = vpop.f32.mrf.mxu0  ;;  %956 = vrot.lane.b32.xlu0 %v7198_v55, %s5787_s14  ;;  %5583 = vmatmul.mubr.msk.f32.gmra.mxu0 %vm1762_vm12, %v1746_v24 }
 0x20d   : > { %v3837_v48 = vmax.f32 %v3835_v37, %v3836_v50  ;;  %v3845_v26 = vsel %vm1592_vm4, %v3126_v31, -inf  ;;  %v4070_v47 = vsel %vm4057_vm15, %v3831_v30, %v4069_v38  ;;  %v2104_v27 = vmul.f32 %v7401_v39, %v5566_v11  ;;  %v7404_v7 = vpop.permute.xlu1 %844  ;;  %v7406_v40 = vpop.permute.xlu0 %669  ;;  %v4332_v31 = vld [vmem:[#allocation3] sm:$0xff] }
 0x20e   : > { %v3841_v60 = vsel %vm1592_vm4, %v7277_v16, -inf  ;;  %v3844_v4 = vsel %vm1592_vm4, %v7281_v19, -inf  ;;  %v3840_v9 = vmax.f32 %v3838_v14, %v3839_v1  ;;  %v4071_v21 = vsel %vm8794_vm1, %v3834_v28, %v4070_v47  ;;  %v1969_v22 = vpop.f32.mrf.mxu0 }
 0x20f   : > { %v3843_v29 = vmax.f32 %v3841_v60, %v3842_v41  ;;  %v4072_v3 = vsel %vm8793_vm5, %v3837_v48, %v4071_v21  ;;  %v2143_v56 = vadd.f32 %v7417_v34, %v2104_v27  ;;  %v2103_v20 = vmul.f32 %v7401_v39, %v1969_v22  ;;  %1454 = vrot.lane.b32.xlu1 %v7247_v2, %s5792_s9  ;;  %v7457_v27 = vld [vmem:[#allocation3 + $0x10] sm:$0xff]  ;;  %v4335_v60 = vld [vmem:[#allocation3 + $0x18] sm:$0x3] }
 0x210   : > { %v3846_v16 = vmax.f32 %v3844_v4, %v3845_v26  ;;  %v4073_v19 = vsel %vm8805_vm0, %v3840_v9, %v4072_v3  ;;  %1355 = vrot.lane.b32.xlu0 %v995_v46, %s5791_s26  ;;  %v1095_v63 = vrot.slane %v7217_v8, 2  ;;  %v4416_v62 = vrot.slane %v4332_v31, 2 }
 0x211   : > { %v4074_v57 = vsel %vm8806_vm6, %v3843_v29, %v4073_v19  ;;  %v2175_v43 = vmax.f32 %v2143_v56, 0.0  ;;  %v2142_v50 = vadd.f32 %v7417_v34, %v2103_v20  ;;  %v7428_v35 = vpop.permute.xlu1 %1239  ;;  %v7430_v5 = vpop.permute.xlu0 %1143  ;;  %v4417_v49 = vrot.slane %v4333_v10, 2 }
 0x212   : > { %v7433_v25 = vsel %vm8807_vm7, %v3846_v16, %v4074_v57  ;;  %v1096_v12 = vsel %vm715_vm2, %v1093_v53, %v1095_v63  ;;  %v4368_v0 = vrot.slane %v4332_v31, 1  ;;  %v1293_v37 = vrot.slane %v488_v33, 1 }
 0x213   : > { %4325 = vst.msk [vmem:[#allocation3 + $0x21] sm:$0xff] %vm1592_vm4, %v7433_v25  ;;  %v2383_v15 = vcombine.high %v2175_v43, %v2175_v43  ;;  %v2390_v8 = vrot.slane %v2175_v43, %v6773_v52  ;;  %v2174_v30 = vmax.f32 %v2142_v50, 0.0  ;;  %1157 = vrot.lane.b32.xlu1 %v7247_v2, %s5789_s16  ;;  %v4369_v2 = vrot.slane %v4333_v10, 1 }
 0x214   : > { %1058 = vrot.lane.b32.xlu0 %v995_v46, %s5788_s15  ;;  %v1394_v14 = vrot.slane %v488_v33, 2  ;;  %v1292_v41 = vrot.slane %v487_v42, 1  ;;  %v1295_v38 = vrot.slane %v489_v58, 1  ;;  %v1396_v46 = vrot.slane %v489_v58, 2 }
 0x215   : > { %v2397_v54 = vrot.slane %v2383_v15, %v6773_v52  ;;  %v2366_v1 = vcombine.high %v2174_v30, %v2174_v30  ;;  %v7445_v28 = vpop.permute.xlu1 %942  ;;  %v7447_v24 = vpop.permute.xlu0 %846  ;;  %v2398_v11 = vcombine.high %v2390_v8, %v2390_v8  ;;  %v2373_v55 = vrot.slane %v2174_v30, %v6773_v52 }
 0x216   : > { %v7460_v4 = vsel %vm715_vm2, %v4416_v62, %v4417_v49  ;;  %v1393_v9 = vrot.slane %v487_v42, 2  ;;  %v7463_v21 = vsel %vm538_vm3, %v4368_v0, %v4369_v2  ;;  %v3155_v22 = vsel %vm2902_vm13, %v2390_v8, -inf }
 0x217   : > { %v2380_v53 = vrot.slane %v2366_v1, %v6773_v52  ;;  %1159 = vrot.lane.b32.xlu1 %v1096_v12, %s5789_s16  ;;  %v2399_v48 = vcombine.high %v2397_v54, %v2397_v54  ;;  %v1296_v29 = vsel %vm538_vm3, %v1293_v37, %v1295_v38  ;;  %v1294_v3 = vsel %vm538_vm3, %v1292_v41, %v1293_v37  ;;  %v5756_v38 = vld [vmem:[#allocation2 + $0x110] sm:$0xff]  ;;  %s5794_s16 = smov 48  }
 0x218   : > { %1456 = vrot.lane.b32.xlu0 %v1096_v12, %s5792_s9  ;;  %v1397_v56 = vsel %vm715_vm2, %v1394_v14, %v1396_v46  ;;  %v3162_v20 = vsel %vm2902_vm13, %v2398_v11, -inf  ;;  %v3169_v16 = vsel %vm2902_vm13, %v2397_v54, -inf  ;;  %v2381_v19 = vcombine.high %v2373_v55, %v2373_v55 }
 0x219   : > { %v7453_v26 = vpop.permute.xlu1 %1341  ;;  %v7455_v47 = vpop.permute.xlu0 %1241  ;;  %v2382_v63 = vcombine.high %v2380_v53, %v2380_v53  ;;  %v3176_v57 = vsel %vm2902_vm13, %v2399_v48, -inf  ;;  %v3127_v43 = vsel %vm2902_vm13, %v2373_v55, -inf  ;;  %v4419_v50 = vrot.slane %v7457_v27, 2 }
 0x21a   : > { %v4420_v31 = vrot.slane %v4335_v60, 2  ;;  %v3156_v10 = vrot.slane %v3155_v22, 4  ;;  %v3141_v15 = vsel %vm2902_vm13, %v2380_v53, -inf  ;;  %v4372_v8 = vrot.slane %v4335_v60, 1 }
 0x21b   : > { %1257 = vrot.lane.b32.xlu1 %v488_v33, %s5790_s17  ;;  %v4371_v12 = vrot.slane %v7457_v27, 1  ;;  %v5755_v33 = vld [vmem:[#allocation2 + $0x108] sm:$0xff]  ;;  %vm8808_vm0 = vcmask 31744   ;;  %v3163_v49 = vrot.slane %v3162_v20, 4  ;;  %v3170_v0 = vrot.slane %v3169_v16, 4 }
 0x21c   : > { %1255 = vrot.lane.b32.xlu0 %v487_v42, %s5790_s17  ;;  %v1516_v62 = vsel %vm8808_vm0, %v5755_v33, %v7192_v13  ;;  %v1395_v54 = vsel %vm715_vm2, %v1393_v9, %v1394_v14  ;;  %v3177_v1 = vrot.slane %v3176_v57, 4  ;;  %v3128_v42 = vrot.slane %v3127_v43, 4  ;;  %vm8810_vm7 = vmmov %vm8808_vm0  ;;  %s5795_s17 = smov 64  }
 0x21d   : > { %v7477_v30 = vpop.permute.xlu1 %1044  ;;  %v7479_v58 = vpop.permute.xlu0 %944  ;;  %v3134_v37 = vsel %vm2902_vm13, %v2381_v19, -inf  ;;  %v3148_v2 = vsel %vm2902_vm13, %v2382_v63, -inf  ;;  %vm8809_vm6 = vcmask 64512   ;;  %v1517_v46 = vsel %vm8810_vm7, %v5756_v38, %v7237_v6 }
 0x21e   : > { %v1549_v41 = vsel %vm8809_vm6, %v1516_v62, %v7235_v59  ;;  %v3142_v13 = vrot.slane %v3141_v15, 4  ;;  %v7493_v11 = vsel %vm715_vm2, %v4419_v50, %v4420_v31  ;;  %vm8811_vm0 = vcmask 97280   ;;  %vm8812_vm5 = vmmov %vm8809_vm6  ;;  %v7507_v31 = vld [vmem:[#allocation3 + $0x20] sm:$0xff] }
 0x21f   : > { %1359 = vrot.lane.b32.xlu1 %v1296_v29, %s5791_s26  ;;  %v1582_v14 = vsel %vm8811_vm0, %v1549_v41, %v7294_v23  ;;  %v1550_v55 = vsel %vm8812_vm5, %v1517_v46, %v7296_v36  ;;  %v3157_v53 = vmax.f32 %v3155_v22, %v3156_v10  ;;  %v7501_v59 = vsel %vm538_vm3, %v4371_v12, %v4372_v8  ;;  %vm8813_vm6 = vmmov %vm8811_vm0  ;;  %v5757_v46 = vld [vmem:[#allocation2 + $0x120] sm:$0xff] }
 0x220   : > { %1357 = vrot.lane.b32.xlu0 %v1294_v3, %s5791_s26  ;;  %v1615_v6 = vsel %vm1592_vm4, %v1582_v14, %v7325_v51  ;;  %v3164_v9 = vmax.f32 %v3162_v20, %v3163_v49  ;;  %v3135_v29 = vrot.slane %v3134_v37, 4  ;;  %v3149_v19 = vrot.slane %v3148_v2, 4  ;;  %vm8814_vm5 = vmmov %vm8810_vm7 }
 0x221   : > { %v1443_v48 = vpop.permute.xlu1 %1442  ;;  %v1344_v60 = vpop.permute.xlu0 %1343  ;;  %v1583_v3 = vsel %vm8813_vm6, %v1550_v55, %v7327_v45  ;;  %v3171_v63 = vmax.f32 %v3169_v16, %v3170_v0  ;;  %v3178_v23 = vmax.f32 %v3176_v57, %v3177_v1  ;;  %v3129_v50 = vmax.f32 %v3127_v43, %v3128_v42  ;;  %vm8816_vm0 = vmmov %vm8814_vm5 }
 0x222   : > { %v1616_v36 = vsel %vm1592_vm4, %v1583_v3, %v7353_v44  ;;  %v1648_v22 = vsel %vm1625_vm8, %v1615_v6, %v7372_v61  ;;  %v3143_v51 = vmax.f32 %v3141_v15, %v3142_v13  ;;  %v5629_v20 = vpack.i.bf16 %v7493_v11, %v7460_v4 }
 0x223   : > { %1460 = vrot.lane.b32.xlu1 %v1397_v56, %s5792_s9  ;;  %v3158_v45 = vrot.slane %v3157_v53, 2  ;;  %v1681_v16 = vsel %vm1658_vm9, %v1648_v22, %v7428_v35  ;;  %v1649_v57 = vsel %vm1625_vm8, %v1616_v36, %v7430_v5  ;;  %v4337_v56 = vld [vmem:[#allocation3 + $0x28] sm:$0x3]  ;;  %v5624_v61 = vpack.i.bf16 %v7501_v59, %v7463_v21 }
 0x224   : > { %1458 = vrot.lane.b32.xlu0 %v1395_v54, %s5792_s9  ;;  %v3165_v10 = vrot.slane %v3164_v9, 2  ;;  %v3136_v15 = vmax.f32 %v3134_v37, %v3135_v29  ;;  %v3150_v4 = vmax.f32 %v3148_v2, %v3149_v19  ;;  %v4422_v8 = vrot.slane %v7507_v31, 2 }
 0x225   : > { %v7521_v43 = vpop.permute.xlu1 %1046  ;;  %v7523_v44 = vpop.permute.xlu0 %671  ;;  %v3172_v12 = vrot.slane %v3171_v63, 2  ;;  %v3179_v33 = vrot.slane %v3178_v23, 2  ;;  %v3130_v62 = vrot.slane %v3129_v50, 2  ;;  %v1714_v35 = vsel %vm1691_vm10, %v1681_v16, %v7453_v26 }
 0x226   : > { %v3144_v5 = vrot.slane %v3143_v51, 2  ;;  %v1682_v49 = vsel %vm1658_vm9, %v1649_v57, %v7455_v47  ;;  %v4423_v0 = vrot.slane %v4337_v56, 2  ;;  %v1747_v21 = vsel %vm1724_vm11, %v1714_v35, %v1443_v48 }
 0x227   : > { %5630 = vrot.lane.b32.xlu1 %v5629_v20, %s5792_s9  ;;  %v3159_v54 = vmax.f32 %v3157_v53, %v3158_v45  ;;  %v4375_v1 = vrot.slane %v4337_v56, 1  ;;  %v1715_v42 = vsel %vm1691_vm10, %v1682_v49, %v1344_v60  ;;  %5585 = vmatprep.mubr.msk.f32.mxu0 %vm1762_vm12, %v1747_v21  ;;  %v3137_v26 = vrot.slane %v3136_v15, 2 }
 0x228   : > { %5625 = vrot.lane.b32.xlu0 %v5624_v61, %s5788_s15  ;;  %v3151_v41 = vrot.slane %v3150_v4, 2  ;;  %v7540_v38 = vsel %vm715_vm2, %v4422_v8, %v4423_v0  ;;  %v1518_v13 = vsel %vm8814_vm5, %v5757_v46, %v7355_v32  ;;  %v3166_v14 = vmax.f32 %v3164_v9, %v3165_v10 }
 0x229   : > { %v1445_v37 = vpop.permute.xlu1 %1444  ;;  %v7537_v2 = vpop.permute.xlu0 %1145  ;;  %5492 = vmatprep.mubr.msk.f32.mxu1 %vm1592_vm4, %v7540_v38  ;;  %v4374_v55 = vrot.slane %v7507_v31, 1  ;;  %v5634_v53 = vpack.i.bf16 %v7507_v31, %v7457_v27  ;;  %v3173_v48 = vmax.f32 %v3171_v63, %v3172_v12  ;;  %v3180_v60 = vmax.f32 %v3178_v23, %v3179_v33 }
 0x22a   : > { %v1748_v47 = vsel %vm1724_vm11, %v1715_v42, %v1445_v37  ;;  %v3131_v6 = vmax.f32 %v3129_v50, %v3130_v62  ;;  %v3145_v29 = vmax.f32 %v3143_v51, %v3144_v5  ;;  %vm8815_vm7 = vcmask 64512  }
 0x22b   : > { %5586 = vmatmul.mubr.msk.f32.gmra.mxu0 %vm1762_vm12, %v1748_v47  ;;  %v1551_v3 = vsel %vm8815_vm7, %v1518_v13, %v7404_v7  ;;  %v7554_v32 = vsel %vm538_vm3, %v4374_v55, %v4375_v1  ;;  %v3160_v63 = vrot.slane %v3159_v54, 1  ;;  %v3138_v23 = vmax.f32 %v3136_v15, %v3137_v26  ;;  %v5758_v15 = vld [vmem:[#allocation2 + $0x128] sm:$0xff]  ;;  %vm8817_vm5 = vmmov %vm8815_vm7 }
 0x22c   : > { %v5569_v19 = vpop.f32.mrf.mxu0  ;;  %5635 = vrot.lane.b32.xlu0 %v5634_v53, %s5794_s16  ;;  %v3152_v50 = vmax.f32 %v3150_v4, %v3151_v41  ;;  %v5639_v22 = vpack.i.bf16 %v7554_v32, %v7501_v59  ;;  %v3167_v7 = vrot.slane %v3166_v14, 1  ;;  %v5644_v20 = vpack.i.bf16 %v7540_v38, %v7493_v11  ;;  %vm8818_vm7 = vmmov %vm8813_vm6 }
 0x22d   : > { %v2106_v9 = vmul.f32 %v7401_v39, %v5569_v19  ;;  %v7558_v36 = vpop.permute.xlu1 %848  ;;  %v7560_v27 = vpop.permute.xlu0 %673  ;;  %v3174_v57 = vrot.slane %v3173_v48, 1  ;;  %v3181_v56 = vrot.slane %v3180_v60, 1  ;;  %v3132_v61 = vrot.slane %v3131_v6, 1 }
 0x22e   : > { %v1979_v51 = vpop.f32.mrf.mxu0  ;;  %v3146_v10 = vrot.slane %v3145_v29, 1  ;;  %5640 = vrot.lane.b32.xlu1 %v5639_v22, %s5795_s17  ;;  %v1519_v59 = vsel %vm8816_vm0, %v5758_v15, %v7406_v40  ;;  %v7573_v4 = vsel %vm8813_vm6, %v1551_v3, %v7445_v28  ;;  %v7581_v62 = vmax.f32 %v3159_v54, %v3160_v63 }
 0x22f   : > { %v2145_v45 = vadd.f32 %v7417_v34, %v2106_v9  ;;  %v2105_v16 = vmul.f32 %v7401_v39, %v1979_v51  ;;  %v3139_v35 = vrot.slane %v3138_v23, 1  ;;  %v3153_v5 = vrot.slane %v3152_v50, 1 }
 0x230   : > { %5645 = vrot.lane.b32.xlu0 %v5644_v20, %s5796_s21  ;;  %v7585_v40 = vsel %vm8817_vm5, %v1519_v59, %v7447_v24  ;;  %v7587_v28 = vmax.f32 %v3166_v14, %v3167_v7  ;;  %v7590_v1 = vmax.f32 %v3173_v48, %v3174_v57  ;;  %v7592_v42 = vmax.f32 %v3180_v60, %v3181_v56 }
 0x231   : > { %v2177_v11 = vmax.f32 %v2145_v45, 0.0  ;;  %v2144_v8 = vadd.f32 %v7417_v34, %v2105_v16  ;;  %v7577_v12 = vpop.permute.xlu1 %1243  ;;  %v7579_v33 = vpop.permute.xlu0 %1147  ;;  %v3133_v37 = vmax.f32 %v3131_v6, %v3132_v61  ;;  %v3147_v26 = vmax.f32 %v3145_v29, %v3146_v10 }
 0x232   : > { %v3140_v14 = vmax.f32 %v3138_v23, %v3139_v35  ;;  %v7600_v55 = vmax.f32 %v3152_v50, %v3153_v5  ;;  %vm8820_vm0 = vcmask 1044484   ;;  %vm8821_vm6 = vcmask 1045509  }
 0x233   : > { %v2417_v49 = vcombine.high %v2177_v11, %v2177_v11  ;;  %v2424_v0 = vrot.slane %v2177_v11, %v6773_v52  ;;  %v2176_v21 = vmax.f32 %v2144_v8, 0.0  ;;  %vm8822_vm5 = vcmask 1046534  }
 0x235   : > { %v2431_v54 = vrot.slane %v2417_v49, %v6773_v52  ;;  %v2432_v41 = vcombine.high %v2424_v0, %v2424_v0  ;;  %v3211_v47 = vsel %vm2902_vm13, %v2424_v0, -inf  ;;  %v2400_v46 = vcombine.high %v2176_v21, %v2176_v21  ;;  %v7596_v24 = vpop.permute.xlu1 %946  ;;  %v7598_v13 = vpop.permute.xlu0 %850 }
 0x236   : > { %v3212_v53 = vrot.slane %v3211_v47, 4  ;;  %v2407_v48 = vrot.slane %v2176_v21, %v6773_v52 }
 0x237   : > { %v2433_v60 = vcombine.high %v2431_v54, %v2431_v54  ;;  %v3218_v6 = vsel %vm2902_vm13, %v2432_v41, -inf  ;;  %v3225_v29 = vsel %vm2902_vm13, %v2431_v54, -inf  ;;  %v2414_v19 = vrot.slane %v2400_v46, %v6773_v52 }
 0x238   : > { %v3213_v3 = vmax.f32 %v3211_v47, %v3212_v53  ;;  %v3219_v9 = vrot.slane %v3218_v6, 4  ;;  %v3226_v63 = vrot.slane %v3225_v29, 4  ;;  %v2415_v22 = vcombine.high %v2407_v48, %v2407_v48 }
 0x239   : > { %v3232_v51 = vsel %vm2902_vm13, %v2433_v60, -inf  ;;  %v2416_v7 = vcombine.high %v2414_v19, %v2414_v19  ;;  %v3183_v23 = vsel %vm2902_vm13, %v2407_v48, -inf  ;;  %v3197_v50 = vsel %vm2902_vm13, %v2414_v19, -inf  ;;  %v7609_v20 = vpop.permute.xlu1 %1345  ;;  %v7611_v45 = vpop.permute.xlu0 %1245 }
 0x23a   : > { %v3214_v16 = vrot.slane %v3213_v3, 2  ;;  %v3220_v57 = vmax.f32 %v3218_v6, %v3219_v9  ;;  %v3227_v56 = vmax.f32 %v3225_v29, %v3226_v63  ;;  %v3233_v61 = vrot.slane %v3232_v51, 4 }
 0x23b   : > { %v3184_v10 = vrot.slane %v3183_v23, 4  ;;  %v3190_v15 = vsel %vm2902_vm13, %v2415_v22, -inf  ;;  %v3198_v59 = vrot.slane %v3197_v50, 4  ;;  %v3204_v11 = vsel %vm2902_vm13, %v2416_v7, -inf }
 0x23c   : > { %v3215_v8 = vmax.f32 %v3213_v3, %v3214_v16  ;;  %v3221_v35 = vrot.slane %v3220_v57, 2  ;;  %v3228_v5 = vrot.slane %v3227_v56, 2  ;;  %v3234_v49 = vmax.f32 %v3232_v51, %v3233_v61 }
 0x23d   : > { %v3185_v0 = vmax.f32 %v3183_v23, %v3184_v10  ;;  %v3191_v21 = vrot.slane %v3190_v15, 4  ;;  %v3199_v54 = vmax.f32 %v3197_v50, %v3198_v59  ;;  %v3205_v41 = vrot.slane %v3204_v11, 4  ;;  %v7615_v47 = vpop.permute.xlu1 %1048  ;;  %v7617_v6 = vpop.permute.xlu0 %948 }
 0x23e   : > { %v3216_v46 = vrot.slane %v3215_v8, 1  ;;  %v3222_v53 = vmax.f32 %v3220_v57, %v3221_v35  ;;  %v3229_v48 = vmax.f32 %v3227_v56, %v3228_v5  ;;  %v3235_v60 = vrot.slane %v3234_v49, 2 }
 0x23f   : > { %v3186_v29 = vrot.slane %v3185_v0, 2  ;;  %v3192_v19 = vmax.f32 %v3190_v15, %v3191_v21  ;;  %v3200_v9 = vrot.slane %v3199_v54, 2  ;;  %v3206_v63 = vmax.f32 %v3204_v11, %v3205_v41 }
 0x240   : > { %v7620_v3 = vsel %vm1592_vm4, %v3133_v37, -inf  ;;  %v7623_v22 = vsel %vm1592_vm4, %v3147_v26, -inf  ;;  %v1617_v51 = vsel %vm1592_vm4, %v7573_v4, %v7477_v30  ;;  %v3236_v7 = vmax.f32 %v3234_v49, %v3235_v60  ;;  %v4671_v30 = vld [vmem:[%s8778_s4 + $0x78] sm:$0xff]  ;;  %v4670_v49 = vld [vmem:[%s8778_s4 + $0x70] sm:$0xff] }
 0x241   : > { %v3187_v23 = vmax.f32 %v3185_v0, %v3186_v29  ;;  %v3193_v50 = vrot.slane %v3192_v19, 2  ;;  %v3201_v16 = vmax.f32 %v3199_v54, %v3200_v9  ;;  %v3207_v57 = vrot.slane %v3206_v63, 2  ;;  %v1447_v56 = vpop.permute.xlu1 %1446  ;;  %4691 = vmatpush1.msra.mxu1 %v4671_v30 }
 0x242   : > { %v7629_v61 = vsel %vm1592_vm4, %v3140_v14, -inf  ;;  %v1585_v37 = vsel %vm8818_vm7, %v7585_v40, %v7479_v58  ;;  %v3217_v10 = vmax.f32 %v3215_v8, %v3216_v46  ;;  %v3223_v26 = vrot.slane %v3222_v53, 1  ;;  %v1348_v15 = vpop.permute.xlu0 %1347 }
 0x243   : > { %v3230_v4 = vrot.slane %v3229_v48, 1  ;;  %v3188_v59 = vrot.slane %v3187_v23, 1  ;;  %v3194_v11 = vmax.f32 %v3192_v19, %v3193_v50  ;;  %v3202_v35 = vrot.slane %v3201_v16, 1 }
 0x244   : > { %v7639_v14 = vsel %vm1592_vm4, %v7600_v55, -inf  ;;  %v1650_v5 = vsel %vm1625_vm8, %v1617_v51, %v7537_v2  ;;  %v3237_v58 = vrot.slane %v3236_v7, 1  ;;  %v3208_v40 = vmax.f32 %v3206_v63, %v3207_v57 }
 0x245   : > { %v8819_v8 = vmov 0.0   ;;  %v1618_v0 = vsel %vm1592_vm4, %v1585_v37, %v7521_v43  ;;  %v3189_v21 = vmax.f32 %v3187_v23, %v3188_v59  ;;  %v3195_v54 = vrot.slane %v3194_v11, 1  ;;  %v7651_v41 = vpop.permute.xlu1 %1050  ;;  %v4669_v43 = vld [vmem:[%s8778_s4 + $0x68] sm:$0xff] }
 0x246   : > { %4692 = vmatprep.subr.mxu1 %v8819_v8  ;;  %v1683_v55 = vsel %vm1658_vm9, %v1650_v5, %v7577_v12  ;;  %v3224_v2 = vmax.f32 %v3222_v53, %v3223_v26  ;;  %v3203_v46 = vmax.f32 %v3201_v16, %v3202_v35  ;;  %v3209_v60 = vrot.slane %v3208_v40, 1  ;;  %v7655_v19 = vpop.permute.xlu0 %675  ;;  %v4668_v16 = vld [vmem:[%s8778_s4 + $0x60] sm:$0xff] }
 0x247   : > { %4693 = vmatpush1.msra.mxu1 %v4670_v49  ;;  %v1651_v29 = vsel %vm1625_vm8, %v1618_v0, %v7579_v33  ;;  %v3231_v9 = vmax.f32 %v3229_v48, %v3230_v4  ;;  %v3860_v12 = vsel %vm1592_vm4, %v3217_v10, -inf  ;;  %v3196_v63 = vmax.f32 %v3194_v11, %v3195_v54 }
 0x248   : > { %4694 = vmatprep.subr.mxu1 %v8819_v8  ;;  %v3848_v51 = vsel %vm1592_vm4, %v3189_v21, -inf  ;;  %v3238_v53 = vmax.f32 %v3236_v7, %v3237_v58  ;;  %v3210_v23 = vmax.f32 %v3208_v40, %v3209_v60  ;;  %v3854_v50 = vsel %vm1592_vm4, %v3203_v46, -inf  ;;  %v4665_v60 = vld [vmem:[%s8778_s4 + $0x48] sm:$0xff] }
 0x249   : > { %4695 = vmatpush1.msra.mxu1 %v4669_v43  ;;  %v1716_v33 = vsel %vm1691_vm10, %v1683_v55, %v7609_v20  ;;  %v3851_v48 = vsel %vm1592_vm4, %v3196_v63, -inf  ;;  %v3855_v57 = vmax.f32 %v7623_v22, %v3854_v50  ;;  %v1684_v37 = vsel %vm1658_vm9, %v1651_v29, %v7611_v45  ;;  %v1449_v10 = vpop.permute.xlu1 %1448  ;;  %v4667_v45 = vld [vmem:[%s8778_s4 + $0x58] sm:$0xff]  ;;  %v4664_v63 = vld [vmem:[%s8778_s4 + $0x40] sm:$0xff] }
 0x24a   : > { %4696 = vmatprep.subr.mxu1 %v8819_v8  ;;  %v1749_v7 = vsel %vm1724_vm11, %v1716_v33, %v1447_v56  ;;  %v3849_v26 = vmax.f32 %v7620_v3, %v3848_v51  ;;  %v3852_v20 = vmax.f32 %v7629_v61, %v3851_v48  ;;  %v3857_v30 = vsel %vm1592_vm4, %v3210_v23, -inf  ;;  %v7680_v59 = vpop.permute.xlu0 %1149  ;;  %v4663_v48 = vld [vmem:[%s8778_s4 + $0x38] sm:$0xff] }
 0x24b   : > { %4697 = vmatpush1.msra.mxu1 %v4668_v16  ;;  %v1717_v4 = vsel %vm1691_vm10, %v1684_v37, %v1348_v15  ;;  %5588 = vmatprep.mubr.msk.f32.mxu0 %vm1762_vm12, %v1749_v7  ;;  %v3863_v22 = vsel %vm1592_vm4, %v3224_v2, -inf  ;;  %v3858_v3 = vmax.f32 %v7639_v14, %v3857_v30  ;;  %v3859_v61 = vsel %vm1592_vm4, %v7581_v62, -inf  ;;  %v4666_v14 = vld [vmem:[%s8778_s4 + $0x50] sm:$0xff] }
 0x24c   : > { %4698 = vmatprep.subr.mxu1 %v8819_v8  ;;  %v1750_v56 = vsel %vm1724_vm11, %v1717_v4, %v1449_v10  ;;  %v3862_v15 = vsel %vm1592_vm4, %v7587_v28, -inf  ;;  %v3866_v11 = vsel %vm1592_vm4, %v3231_v9, -inf  ;;  %v4076_v35 = vsel %vm4055_vm14, %v3852_v20, %v3849_v26  ;;  %v5572_v5 = vpop.f32.mrf.mxu0  ;;  %v4661_v26 = vld [vmem:[%s8778_s4 + $0x28] sm:$0xff] }
 0x24d   : > { %4699 = vmatpush1.msra.mxu1 %v4667_v45  ;;  %5589 = vmatmul.mubr.msk.f32.gmra.mxu0 %vm1762_vm12, %v1750_v56  ;;  %v3861_v58 = vmax.f32 %v3859_v61, %v3860_v12  ;;  %v3869_v40 = vsel %vm1592_vm4, %v3238_v53, -inf  ;;  %v4077_v62 = vsel %vm4057_vm15, %v3855_v57, %v4076_v35  ;;  %v2108_v28 = vmul.f32 %v7401_v39, %v5572_v5  ;;  %v7703_v49 = vpop.permute.xlu1 %852  ;;  %v4662_v57 = vld [vmem:[%s8778_s4 + $0x30] sm:$0xff]  ;;  %v4660_v56 = vld [vmem:[%s8778_s4 + $0x20] sm:$0xff] }
 0x24e   : > { %4700 = vmatprep.subr.mxu1 %v8819_v8  ;;  %v3865_v0 = vsel %vm1592_vm4, %v7590_v1, -inf  ;;  %v3868_v21 = vsel %vm1592_vm4, %v7592_v42, -inf  ;;  %v3864_v54 = vmax.f32 %v3862_v15, %v3863_v22  ;;  %v4078_v55 = vsel %vm8794_vm1, %v3858_v3, %v4077_v62  ;;  %v1989_v2 = vpop.f32.mrf.mxu0  ;;  %v7710_v46 = vpop.permute.xlu0 %677 }
 0x24f   : > { %4701 = vmatpush1.msra.mxu1 %v4666_v14  ;;  %v3867_v29 = vmax.f32 %v3865_v0, %v3866_v11  ;;  %v4079_v43 = vsel %vm8820_vm0, %v3861_v58, %v4078_v55  ;;  %v2147_v1 = vadd.f32 %v7417_v34, %v2108_v28  ;;  %v2107_v9 = vmul.f32 %v7401_v39, %v1989_v2  ;;  %v4659_v14 = vld [vmem:[%s8778_s4 + $0x18] sm:$0xff]  ;;  %v4658_v0 = vld [vmem:[%s8778_s4 + $0x10] sm:$0xff] }
 0x250   : > { %4702 = vmatprep.subr.mxu1 %v8819_v8  ;;  %v3870_v42 = vmax.f32 %v3868_v21, %v3869_v40  ;;  %v4080_v12 = vsel %vm8821_vm6, %v3864_v54, %v4079_v43  ;;  %vm8823_vm7 = vcmask 1047559   ;;  %vm8824_vm0 = vcmask 31744  }
 0x251   : > { %4703 = vmatpush1.msra.mxu1 %v4665_v60  ;;  %v4081_v51 = vsel %vm8822_vm5, %v3867_v29, %v4080_v12  ;;  %v2179_v53 = vmax.f32 %v2147_v1, 0.0  ;;  %v2146_v23 = vadd.f32 %v7417_v34, %v2107_v9  ;;  %v7726_v50 = vpop.permute.xlu1 %1247  ;;  %v4657_v60 = vld [vmem:[%s8778_s4 + $0x8] sm:$0xff]  ;;  %vm8825_vm6 = vcmask 64512   ;;  %vm8826_vm5 = vmmov %vm8824_vm0 }
 0x252   : > { %4704 = vmatprep.subr.mxu1 %v8819_v8  ;;  %v7729_v33 = vsel %vm8823_vm7, %v3870_v42, %v4081_v51  ;;  %v7731_v16 = vpop.permute.xlu0 %1151  ;;  %vm8827_vm7 = vcmask 97280  }
 0x253   : > { %4705 = vmatpush1.msra.mxu1 %v4664_v63  ;;  %4326 = vst.msk [vmem:[#allocation3 + $0x31] sm:$0xff] %vm1592_vm4, %v7729_v33  ;;  %v2451_v37 = vcombine.high %v2179_v53, %v2179_v53  ;;  %v2458_v7 = vrot.slane %v2179_v53, %v6773_v52  ;;  %v2178_v10 = vmax.f32 %v2146_v23, 0.0 }
 0x254   : > { %4706 = vmatprep.subr.mxu1 %v8819_v8 }
 0x255   : > { %4707 = vmatpush1.msra.mxu1 %v4663_v48  ;;  %v2465_v20 = vrot.slane %v2451_v37, %v6773_v52  ;;  %v2466_v30 = vcombine.high %v2458_v7, %v2458_v7  ;;  %v2434_v4 = vcombine.high %v2178_v10, %v2178_v10  ;;  %v7748_v45 = vpop.permute.xlu1 %950  ;;  %v2441_v22 = vrot.slane %v2178_v10, %v6773_v52  ;;  %v5759_v48 = vld [vmem:[#allocation2 + $0x138] sm:$0xff]  ;;  %v4656_v10 = vld [vmem:[%s8778_s4] sm:$0xff] }
 0x256   : > { %4708 = vmatprep.subr.mxu1 %v8819_v8  ;;  %v7751_v3 = vpop.permute.xlu0 %854  ;;  %v3267_v61 = vsel %vm2902_vm13, %v2458_v7, -inf }
 0x257   : > { %4709 = vmatpush1.msra.mxu1 %v4662_v57  ;;  %v2448_v15 = vrot.slane %v2434_v4, %v6773_v52  ;;  %v2467_v11 = vcombine.high %v2465_v20, %v2465_v20  ;;  %v3274_v35 = vsel %vm2902_vm13, %v2466_v30, -inf  ;;  %v3281_v5 = vsel %vm2902_vm13, %v2465_v20, -inf  ;;  %v5760_v20 = vld [vmem:[#allocation2 + $0x140] sm:$0xff] }
 0x258   : > { %4710 = vmatprep.subr.mxu1 %v8819_v8  ;;  %v3268_v40 = vrot.slane %v3267_v61, 4  ;;  %v2449_v62 = vcombine.high %v2441_v22, %v2441_v22  ;;  %v3275_v21 = vrot.slane %v3274_v35, 4  ;;  %v3282_v54 = vrot.slane %v3281_v5, 4 }
 0x259   : > { %4711 = vmatpush1.msra.mxu1 %v4661_v26  ;;  %v7765_v58 = vpop.permute.xlu1 %1349  ;;  %v2450_v55 = vcombine.high %v2448_v15, %v2448_v15  ;;  %v3288_v2 = vsel %vm2902_vm13, %v2467_v11, -inf  ;;  %v3239_v29 = vsel %vm2902_vm13, %v2441_v22, -inf  ;;  %v3253_v43 = vsel %vm2902_vm13, %v2448_v15, -inf }
 0x25a   : > { %4712 = vmatprep.subr.mxu1 %v8819_v8  ;;  %v7767_v28 = vpop.permute.xlu0 %1249  ;;  %v3269_v9 = vmax.f32 %v3267_v61, %v3268_v40  ;;  %v3246_v42 = vsel %vm2902_vm13, %v2449_v62, -inf  ;;  %v3276_v63 = vmax.f32 %v3274_v35, %v3275_v21  ;;  %v3283_v51 = vmax.f32 %v3281_v5, %v3282_v54  ;;  %v4339_v54 = vld [vmem:[#allocation3 + $0x38] sm:$0x3] }
 0x25b   : > { %4713 = vmatpush1.msra.mxu1 %v4660_v56  ;;  %v3289_v53 = vrot.slane %v3288_v2, 4  ;;  %v3260_v23 = vsel %vm2902_vm13, %v2450_v55, -inf  ;;  %v1520_v57 = vsel %vm8824_vm0, %v5759_v48, %v7523_v44  ;;  %v3240_v37 = vrot.slane %v3239_v29, 4  ;;  %vm8828_vm0 = vmmov %vm8825_vm6 }
 0x25c   : > { %4714 = vmatprep.subr.mxu1 %v8819_v8  ;;  %v3254_v7 = vrot.slane %v3253_v43, 4  ;;  %v1553_v26 = vsel %vm8825_vm6, %v1520_v57, %v7558_v36  ;;  %v1521_v30 = vsel %vm8826_vm5, %v5760_v20, %v7560_v27  ;;  %v3247_v4 = vrot.slane %v3246_v42, 4  ;;  %vm8829_vm6 = vmmov %vm8827_vm7 }
 0x25d   : > { %4715 = vmatpush1.msra.mxu1 %v4659_v14  ;;  %v7780_v1 = vpop.permute.xlu1 %1052  ;;  %v1586_v44 = vsel %vm8827_vm7, %v1553_v26, %v7596_v24  ;;  %v1554_v56 = vsel %vm8828_vm0, %v1521_v30, %v7598_v13  ;;  %v3261_v61 = vrot.slane %v3260_v23, 4  ;;  %v3270_v11 = vrot.slane %v3269_v9, 2  ;;  %v7802_v14 = vld [vmem:[#allocation3 + $0x30] sm:$0xff]  ;;  %vm8830_vm7 = vmmov %vm8828_vm0 }
 0x25e   : > { %4716 = vmatprep.subr.mxu1 %v8819_v8  ;;  %v7783_v12 = vpop.permute.xlu0 %952  ;;  %v3277_v35 = vrot.slane %v3276_v63, 2  ;;  %v3284_v36 = vrot.slane %v3283_v51, 2  ;;  %v3290_v5 = vmax.f32 %v3288_v2, %v3289_v53  ;;  %v1619_v27 = vsel %vm1592_vm4, %v1586_v44, %v7615_v47  ;;  %v4673_v2 = vld [vmem:[%s8778_s4 + $0x88] sm:$0xff]  ;;  %vm8831_vm0 = vmmov %vm8826_vm5 }
 0x25f   : > { %4717 = vmatpush1.msra.mxu1 %v4658_v0  ;;  %v1587_v40 = vsel %vm8829_vm6, %v1554_v56, %v7617_v6  ;;  %v3241_v24 = vmax.f32 %v3239_v29, %v3240_v37  ;;  %v3255_v62 = vmax.f32 %v3253_v43, %v3254_v7  ;;  %v1652_v0 = vsel %vm1625_vm8, %v1619_v27, %v7680_v59 }
 0x260   : > { %4718 = vmatprep.subr.mxu1 %v8819_v8  ;;  %v1620_v13 = vsel %vm1592_vm4, %v1587_v40, %v7651_v41  ;;  %v3248_v21 = vmax.f32 %v3246_v42, %v3247_v4  ;;  %v3262_v47 = vmax.f32 %v3260_v23, %v3261_v61  ;;  %v1685_v6 = vsel %vm1658_vm9, %v1652_v0, %v7726_v50  ;;  %v4672_v50 = vld [vmem:[%s8778_s4 + $0x80] sm:$0xff] }
 0x261   : > { %4719 = vmatpush1.msra.mxu1 %v4657_v60  ;;  %v1451_v22 = vpop.permute.xlu1 %1450  ;;  %v1653_v60 = vsel %vm1625_vm8, %v1620_v13, %v7731_v16  ;;  %v5649_v41 = vpack.i.bf16 %v7802_v14, %v7507_v31  ;;  %v3271_v59 = vmax.f32 %v3269_v9, %v3270_v11  ;;  %v3278_v43 = vmax.f32 %v3276_v63, %v3277_v35 }
 0x262   : > { %4720 = vmatprep.subr.mxu1 %v8819_v8  ;;  %v1352_v15 = vpop.permute.xlu0 %1351  ;;  %v7825_v42 = vmax.f32 %v3283_v51, %v3284_v36  ;;  %v3291_v53 = vrot.slane %v3290_v5, 2  ;;  %v3242_v23 = vrot.slane %v3241_v24, 2  ;;  %v3256_v48 = vrot.slane %v3255_v62, 2  ;;  %v5761_v36 = vld [vmem:[#allocation2 + $0x150] sm:$0xff] }
 0x263   : > { %4721 = vmatpush1.msra.mxu1 %v4656_v10  ;;  %5650 = vrot.lane.b32.xlu1 %v5649_v41, %s5797_s30  ;;  %v4377_v31 = vrot.slane %v7802_v14, 1  ;;  %v4378_v16 = vrot.slane %v4339_v54, 1  ;;  %v3249_v9 = vrot.slane %v3248_v21, 2  ;;  %v1718_v63 = vsel %vm1691_vm10, %v1685_v6, %v7765_v58  ;;  %v5762_v41 = vld [vmem:[#allocation2 + $0x158] sm:$0xff] }
 0x264   : > { %4750 = vmatprep.subr.mxu1 %v8819_v8  ;;  %v4425_v51 = vrot.slane %v7802_v14, 2  ;;  %v4426_v57 = vrot.slane %v4339_v54, 2  ;;  %v3263_v7 = vrot.slane %v3262_v47, 2  ;;  %v1686_v10 = vsel %vm1658_vm9, %v1653_v60, %v7767_v28 }
 0x265   : > { %v7812_v55 = vpop.permute.xlu1 %1054  ;;  %4751 = vmatpush2.msra.mxu1 %v4673_v2  ;;  %v7839_v26 = vsel %vm538_vm3, %v4377_v31, %v4378_v16  ;;  %v1751_v20 = vsel %vm1724_vm11, %v1718_v63, %v1451_v22  ;;  %v3292_v4 = vmax.f32 %v3290_v5, %v3291_v53  ;;  %v1719_v58 = vsel %vm1691_vm10, %v1686_v10, %v1352_v15 }
 0x266   : > { %v7823_v29 = vpop.permute.xlu0 %679  ;;  %4752 = vmatprep.subr.mxu1 %v8819_v8  ;;  %v5654_v44 = vpack.i.bf16 %v7839_v26, %v7554_v32  ;;  %5591 = vmatprep.mubr.msk.f32.mxu0 %vm1762_vm12, %v1751_v20  ;;  %v3243_v56 = vmax.f32 %v3241_v24, %v3242_v23  ;;  %v3257_v61 = vmax.f32 %v3255_v62, %v3256_v48  ;;  %v3272_v5 = vrot.slane %v3271_v59, 1 }
 0x267   : > { %4753 = vmatpush2.msra.mxu1 %v4672_v50  ;;  %v7849_v11 = vsel %vm715_vm2, %v4425_v51, %v4426_v57  ;;  %v1522_v22 = vsel %vm8826_vm5, %v5761_v36, %v7655_v19  ;;  %v3279_v27 = vrot.slane %v3278_v43, 1  ;;  %v3250_v40 = vmax.f32 %v3248_v21, %v3249_v9  ;;  %vm8832_vm5 = vmmov %vm8830_vm7 }
 0x268   : > { %5655 = vrot.lane.b32.xlu0 %v5654_v44, %s5798_s10  ;;  %5660 = vrot.lane.b32.xlu1 %v5654_v44, %s5788_s15  ;;  %v3264_v24 = vmax.f32 %v3262_v47, %v3263_v7  ;;  %v3286_v19 = vrot.slane %v7825_v42, 1  ;;  %v5664_v0 = vpack.i.bf16 %v7849_v11, %v7540_v38  ;;  %v3293_v6 = vrot.slane %v3292_v4, 1 }
 0x269   : > { %v1453_v37 = vpop.permute.xlu1 %1452  ;;  %v1555_v60 = vsel %vm8830_vm7, %v1522_v22, %v7703_v49  ;;  %v3244_v21 = vrot.slane %v3243_v56, 1  ;;  %v3258_v47 = vrot.slane %v3257_v61, 1  ;;  %v1523_v53 = vsel %vm8831_vm0, %v5762_v41, %v7710_v46  ;;  %vm8833_vm7 = vmmov %vm8829_vm6 }
 0x26a   : > { %v7842_v30 = vpop.permute.xlu0 %1153  ;;  %v1752_v28 = vsel %vm1724_vm11, %v1719_v58, %v1453_v37  ;;  %v7873_v50 = vsel %vm8829_vm6, %v1555_v60, %v7748_v45  ;;  %v7879_v48 = vmax.f32 %v3271_v59, %v3272_v5  ;;  %v7881_v49 = vmax.f32 %v3278_v43, %v3279_v27 }
 0x26b   : > { %5592 = vmatmul.mubr.msk.f32.gmra.mxu0 %vm1762_vm12, %v1752_v28  ;;  %v3251_v31 = vrot.slane %v3250_v40, 1  ;;  %v3265_v16 = vrot.slane %v3264_v24, 1  ;;  %v7886_v46 = vmax.f32 %v7825_v42, %v3286_v19  ;;  %v7889_v57 = vmax.f32 %v3292_v4, %v3293_v6 }
 0x26c   : > { %v5575_v35 = vpop.f32.mrf.mxu0  ;;  %5665 = vrot.lane.b32.xlu0 %v5664_v0, %s5792_s9  ;;  %v3259_v37 = vmax.f32 %v3257_v61, %v3258_v47  ;;  %v1556_v59 = vsel %vm8832_vm5, %v1523_v53, %v7751_v3  ;;  %vm8834_vm0 = vcmask 1044484   ;;  %vm8835_vm6 = vcmask 1045509  }
 0x26d   : > { %v2110_v32 = vmul.f32 %v7401_v39, %v5575_v35  ;;  %v7857_v15 = vpop.permute.xlu1 %856  ;;  %v3252_v42 = vmax.f32 %v3250_v40, %v3251_v31  ;;  %v3266_v58 = vmax.f32 %v3264_v24, %v3265_v16  ;;  %vm8836_vm5 = vcmask 1046534  }
 0x26e   : > { %v1999_v62 = vpop.f32.mrf.mxu0  ;;  %v7860_v13 = vpop.permute.xlu0 %681 }
 0x26f   : > { %v2149_v54 = vadd.f32 %v7417_v34, %v2110_v32  ;;  %v2109_v2 = vmul.f32 %v7401_v39, %v1999_v62 }
 0x271   : > { %v2181_v38 = vmax.f32 %v2149_v54, 0.0  ;;  %v2148_v23 = vadd.f32 %v7417_v34, %v2109_v2  ;;  %v7877_v39 = vpop.permute.xlu1 %1251  ;;  %v3245_v34 = vmax.f32 %v3243_v56, %v3244_v21 }
 0x272   : > { %v7883_v9 = vpop.permute.xlu0 %1155 }
 0x273   : > { %v2485_v45 = vcombine.high %v2181_v38, %v2181_v38  ;;  %v2492_v63 = vrot.slane %v2181_v38, %v6773_v52  ;;  %v2180_v51 = vmax.f32 %v2148_v23, 0.0 }
 0x275   : > { %v2499_v43 = vrot.slane %v2485_v45, %v6773_v52  ;;  %v2500_v7 = vcombine.high %v2492_v63, %v2492_v63  ;;  %v3323_v10 = vsel %vm2902_vm13, %v2492_v63, -inf  ;;  %v2468_v20 = vcombine.high %v2180_v51, %v2180_v51  ;;  %v7895_v44 = vpop.permute.xlu1 %954 }
 0x276   : > { %v3324_v28 = vrot.slane %v3323_v10, 4  ;;  %v2475_v35 = vrot.slane %v2180_v51, %v6773_v52  ;;  %v7898_v4 = vpop.permute.xlu0 %858 }
 0x277   : > { %v2501_v56 = vcombine.high %v2499_v43, %v2499_v43  ;;  %v3330_v61 = vsel %vm2902_vm13, %v2500_v7, -inf  ;;  %v3337_v3 = vsel %vm2902_vm13, %v2499_v43, -inf  ;;  %v2482_v36 = vrot.slane %v2468_v20, %v6773_v52 }
 0x278   : > { %v3325_v22 = vmax.f32 %v3323_v10, %v3324_v28  ;;  %v3331_v32 = vrot.slane %v3330_v61, 4  ;;  %v3338_v5 = vrot.slane %v3337_v3, 4  ;;  %v2483_v27 = vcombine.high %v2475_v35, %v2475_v35 }
 0x279   : > { %v3344_v62 = vsel %vm2902_vm13, %v2501_v56, -inf  ;;  %v2484_v40 = vcombine.high %v2482_v36, %v2482_v36  ;;  %v3295_v24 = vsel %vm2902_vm13, %v2475_v35, -inf  ;;  %v3309_v19 = vsel %vm2902_vm13, %v2482_v36, -inf  ;;  %v7906_v0 = vpop.permute.xlu1 %1353 }
 0x27a   : > { %v3326_v54 = vrot.slane %v3325_v22, 2  ;;  %v3332_v2 = vmax.f32 %v3330_v61, %v3331_v32  ;;  %v3339_v6 = vmax.f32 %v3337_v3, %v3338_v5  ;;  %v3345_v60 = vrot.slane %v3344_v62, 4  ;;  %v7908_v21 = vpop.permute.xlu0 %1253 }
 0x27b   : > { %v3296_v47 = vrot.slane %v3295_v24, 4  ;;  %v3302_v41 = vsel %vm2902_vm13, %v2483_v27, -inf  ;;  %v3310_v53 = vrot.slane %v3309_v19, 4  ;;  %v3316_v38 = vsel %vm2902_vm13, %v2484_v40, -inf }
 0x27c   : > { %v3327_v23 = vmax.f32 %v3325_v22, %v3326_v54  ;;  %v3333_v31 = vrot.slane %v3332_v2, 2  ;;  %v3340_v16 = vrot.slane %v3339_v6, 2  ;;  %v3346_v45 = vmax.f32 %v3344_v62, %v3345_v60 }
 0x27d   : > { %v3297_v63 = vmax.f32 %v3295_v24, %v3296_v47  ;;  %v3303_v51 = vrot.slane %v3302_v41, 4  ;;  %v3311_v43 = vmax.f32 %v3309_v19, %v3310_v53  ;;  %v3317_v7 = vrot.slane %v3316_v38, 4  ;;  %v7912_v10 = vpop.permute.xlu1 %1056 }
 0x27e   : > { %v3328_v20 = vrot.slane %v3327_v23, 1  ;;  %v3334_v28 = vmax.f32 %v3332_v2, %v3333_v31  ;;  %v3341_v35 = vmax.f32 %v3339_v6, %v3340_v16  ;;  %v3347_v56 = vrot.slane %v3346_v45, 2  ;;  %v7914_v61 = vpop.permute.xlu0 %956 }
 0x27f   : > { %v3298_v3 = vrot.slane %v3297_v63, 2  ;;  %v3304_v36 = vmax.f32 %v3302_v41, %v3303_v51  ;;  %v3312_v32 = vrot.slane %v3311_v43, 2  ;;  %v3318_v5 = vmax.f32 %v3316_v38, %v3317_v7 }
 0x280   : > { %v3871_v22 = vsel %vm1592_vm4, %v3245_v34, -inf  ;;  %v3877_v27 = vsel %vm1592_vm4, %v3259_v37, -inf  ;;  %v1621_v62 = vsel %vm1592_vm4, %v7873_v50, %v7780_v1  ;;  %v3348_v40 = vmax.f32 %v3346_v45, %v3347_v56 }
 0x281   : > { %v3299_v24 = vmax.f32 %v3297_v63, %v3298_v3  ;;  %v3305_v19 = vrot.slane %v3304_v36, 2  ;;  %v3313_v54 = vmax.f32 %v3311_v43, %v3312_v32  ;;  %v3319_v2 = vrot.slane %v3318_v5, 2  ;;  %v1455_v53 = vpop.permute.xlu1 %1454 }
 0x282   : > { %v3874_v6 = vsel %vm1592_vm4, %v3252_v42, -inf  ;;  %v1589_v60 = vsel %vm8833_vm7, %v1556_v59, %v7783_v12  ;;  %v3329_v47 = vmax.f32 %v3327_v23, %v3328_v20  ;;  %v3335_v41 = vrot.slane %v3334_v28, 1  ;;  %v1356_v34 = vpop.permute.xlu0 %1355 }
 0x283   : > { %v3342_v38 = vrot.slane %v3341_v35, 1  ;;  %v3300_v37 = vrot.slane %v3299_v24, 1  ;;  %v3306_v31 = vmax.f32 %v3304_v36, %v3305_v19  ;;  %v3314_v16 = vrot.slane %v3313_v54, 1 }
 0x284   : > { %v3880_v1 = vsel %vm1592_vm4, %v3266_v58, -inf  ;;  %v1654_v50 = vsel %vm1625_vm8, %v1621_v62, %v7842_v30  ;;  %v3349_v45 = vrot.slane %v3348_v40, 1  ;;  %v3320_v63 = vmax.f32 %v3318_v5, %v3319_v2 }
 0x285   : > { %v1622_v42 = vsel %vm1592_vm4, %v1589_v60, %v7812_v55  ;;  %v3301_v51 = vmax.f32 %v3299_v24, %v3300_v37  ;;  %v3307_v12 = vrot.slane %v3306_v31, 1  ;;  %v1687_v59 = vsel %vm1658_vm9, %v1654_v50, %v7877_v39 }
 0x286   : > { %v3336_v23 = vmax.f32 %v3334_v28, %v3335_v41  ;;  %v3315_v43 = vmax.f32 %v3313_v54, %v3314_v16  ;;  %v3321_v7 = vrot.slane %v3320_v63, 1  ;;  %v1655_v20 = vsel %vm1625_vm8, %v1622_v42, %v7883_v9  ;;  %v7933_v58 = vpop.permute.xlu0 %1058  ;;  %v7940_v28 = vpop.permute.xlu1 %1157 }
 0x287   : > { %v3343_v56 = vmax.f32 %v3341_v35, %v3342_v38  ;;  %v3884_v30 = vsel %vm1592_vm4, %v3329_v47, -inf  ;;  %v3308_v3 = vmax.f32 %v3306_v31, %v3307_v12  ;;  %v3872_v36 = vsel %vm1592_vm4, %v3301_v51, -inf  ;;  %v7963_v31 = vld [vmem:[%s8776_s2] ss:$0 sm:$0xff] }
 0x288   : > { %v3350_v55 = vmax.f32 %v3348_v40, %v3349_v45  ;;  %v3322_v32 = vmax.f32 %v3320_v63, %v3321_v7  ;;  %v3878_v5 = vsel %vm1592_vm4, %v3315_v43, -inf  ;;  %v1720_v39 = vsel %vm1691_vm10, %v1687_v59, %v7906_v0  ;;  %v7975_v12 = vld [vmem:[%s8777_s3] ss:$0 sm:$0xff] }
 0x289   : > { %v3873_v62 = vmax.f32 %v3871_v22, %v3872_v36  ;;  %v3875_v9 = vsel %vm1592_vm4, %v3308_v3, -inf  ;;  %v3879_v24 = vmax.f32 %v3877_v27, %v3878_v5  ;;  %v1688_v35 = vsel %vm1658_vm9, %v1655_v20, %v7908_v21 }
 0x28a   : > { %v3876_v19 = vmax.f32 %v3874_v6, %v3875_v9  ;;  %v3881_v54 = vsel %vm1592_vm4, %v3322_v32, -inf  ;;  %v1753_v40 = vsel %vm1724_vm11, %v1720_v39, %v1455_v53  ;;  %v1721_v2 = vsel %vm1691_vm10, %v1688_v35, %v1356_v34  ;;  %v1457_v60 = vpop.permute.xlu0 %1456  ;;  %v1160_v45 = vpop.permute.xlu1 %1159 }
 0x28b   : > { %v3887_v47 = vsel %vm1592_vm4, %v3336_v23, -inf  ;;  %v3882_v0 = vmax.f32 %v3880_v1, %v3881_v54  ;;  %5594 = vmatprep.mubr.msk.f32.mxu0 %vm1762_vm12, %v1753_v40  ;;  %v1754_v22 = vsel %vm1724_vm11, %v1721_v2, %v1457_v60  ;;  %v3883_v27 = vsel %vm1592_vm4, %v7879_v48, -inf  ;;  %v5766_v40 = vld [vmem:[#allocation2 + $0x170] sm:$0xff] }
 0x28c   : > { %v3886_v21 = vsel %vm1592_vm4, %v7881_v49, -inf  ;;  %v3890_v6 = vsel %vm1592_vm4, %v3343_v56, -inf  ;;  %v4083_v41 = vsel %vm4055_vm14, %v3876_v19, %v3873_v62  ;;  %v5578_v53 = vpop.f32.mrf.mxu0  ;;  %5595 = vmatmul.mubr.msk.f32.gmra.mxu0 %vm1762_vm12, %v1754_v22  ;;  %v3885_v34 = vmax.f32 %v3883_v27, %v3884_v30  ;;  %v5765_v19 = vld [vmem:[#allocation2 + $0x168] sm:$0xff] }
 0x28d   : > { %v3893_v38 = vsel %vm1592_vm4, %v3350_v55, -inf  ;;  %v4084_v37 = vsel %vm4057_vm15, %v3879_v24, %v4083_v41  ;;  %v2112_v48 = vmul.f32 %v7963_v31, %v5578_v53  ;;  %v3889_v49 = vsel %vm1592_vm4, %v7886_v46, -inf }
 0x28e   : > { %v3892_v16 = vsel %vm1592_vm4, %v7889_v57, -inf  ;;  %v3888_v1 = vmax.f32 %v3886_v21, %v3887_v47  ;;  %v4085_v50 = vsel %vm8794_vm1, %v3882_v0, %v4084_v37  ;;  %v2009_v63 = vpop.f32.mrf.mxu0  ;;  %v3891_v42 = vmax.f32 %v3889_v49, %v3890_v6  ;;  %v1258_v30 = vpop.permute.xlu1 %1257 }
 0x28f   : > { %v4086_v51 = vsel %vm8834_vm0, %v3885_v34, %v4085_v50  ;;  %v2151_v59 = vadd.f32 %v7975_v12, %v2112_v48  ;;  %v2111_v46 = vmul.f32 %v7963_v31, %v2009_v63  ;;  %v3894_v23 = vmax.f32 %v3892_v16, %v3893_v38  ;;  %v1256_v55 = vpop.permute.xlu0 %1255 }
 0x290   : > { %v4087_v57 = vsel %vm8835_vm6, %v3888_v1, %v4086_v51  ;;  %vm8837_vm7 = vcmask 1047559   ;;  %vm8838_vm0 = vcmask 31744   ;;  %vm8842_vm1 = vcmask 97280  }
 0x291   : > { %v4088_v43 = vsel %vm8836_vm5, %v3891_v42, %v4087_v57  ;;  %v2183_v7 = vmax.f32 %v2151_v59, 0.0  ;;  %v2150_v20 = vadd.f32 %v7975_v12, %v2111_v46  ;;  %v1524_v54 = vsel %vm8838_vm0, %v5765_v19, %v7823_v29  ;;  %vm8839_vm6 = vmmov %vm8838_vm0 }
 0x292   : > { %v7983_v56 = vsel %vm8837_vm7, %v3894_v23, %v4088_v43  ;;  %v1360_v9 = vpop.permute.xlu1 %1359  ;;  %v1525_v2 = vsel %vm8839_vm6, %v5766_v40, %v7860_v13  ;;  %vm8840_vm5 = vcmask 64512   ;;  %vm8843_vm0 = vmmov %vm8842_vm1  ;;  %vm4292_vm6 = vcmask 392192  }
 0x293   : > { %4327 = vst.msk [vmem:[#allocation3 + $0x41] sm:$0xff] %vm1592_vm4, %v7983_v56  ;;  %v2526_v3 = vrot.slane %v2183_v7, %v6773_v52  ;;  %v2182_v36 = vmax.f32 %v2150_v20, 0.0  ;;  %v2519_v32 = vcombine.high %v2183_v7, %v2183_v7  ;;  %v1358_v35 = vpop.permute.xlu0 %1357  ;;  %v1557_v0 = vsel %vm8840_vm5, %v1524_v54, %v7857_v15  ;;  %vm8841_vm7 = vmmov %vm8840_vm5 }
 0x294   : > { %v1558_v22 = vsel %vm8841_vm7, %v1525_v2, %v7898_v4  ;;  %v1590_v21 = vsel %vm8842_vm1, %v1557_v0, %v7895_v44  ;;  %vm8848_vm1 = vcmask 1047559   ;;  %vm4294_vm5 = vcmask 523264  }
 0x295   : > { %v3379_v5 = vsel %vm2902_vm13, %v2526_v3, -inf  ;;  %v2502_v39 = vcombine.high %v2182_v36, %v2182_v36  ;;  %v2534_v62 = vcombine.high %v2526_v3, %v2526_v3  ;;  %v2533_v24 = vrot.slane %v2519_v32, %v6773_v52 }
 0x296   : > { %v3380_v60 = vrot.slane %v3379_v5, 4  ;;  %v2509_v47 = vrot.slane %v2182_v36, %v6773_v52  ;;  %v1591_v29 = vsel %vm8843_vm0, %v1558_v22, %v7914_v61  ;;  %v1623_v13 = vsel %vm1592_vm4, %v1590_v21, %v7912_v10  ;;  %v1461_v37 = vpop.permute.xlu1 %1460 }
 0x297   : > { %v2516_v27 = vrot.slane %v2502_v39, %v6773_v52  ;;  %v3386_v6 = vsel %vm2902_vm13, %v2534_v62, -inf  ;;  %v1624_v41 = vsel %vm1592_vm4, %v1591_v29, %v7933_v58  ;;  %v2535_v15 = vcombine.high %v2533_v24, %v2533_v24  ;;  %v1459_v16 = vpop.permute.xlu0 %1458 }
 0x298   : > { %v3393_v53 = vsel %vm2902_vm13, %v2533_v24, -inf  ;;  %v1657_v4 = vsel %vm1625_vm8, %v1624_v41, %v1160_v45  ;;  %v3381_v34 = vmax.f32 %v3379_v5, %v3380_v60  ;;  %v2517_v38 = vcombine.high %v2509_v47, %v2509_v47 }
 0x299   : > { %v3351_v44 = vsel %vm2902_vm13, %v2509_v47, -inf  ;;  %v1656_v61 = vsel %vm1625_vm8, %v1623_v13, %v7940_v28  ;;  %v3387_v48 = vrot.slane %v3386_v6, 4  ;;  %v1690_v49 = vsel %vm1658_vm9, %v1657_v4, %v1258_v30 }
 0x29a   : > { %v3365_v10 = vsel %vm2902_vm13, %v2516_v27, -inf  ;;  %v3394_v58 = vrot.slane %v3393_v53, 4  ;;  %v2518_v1 = vcombine.high %v2516_v27, %v2516_v27  ;;  %v1689_v50 = vsel %vm1658_vm9, %v1656_v61, %v1256_v55  ;;  %v8021_v28 = vld [vmem:[#allocation3 + $0x40] sm:$0xff]  ;;  %v4341_v20 = vld [vmem:[#allocation3 + $0x48] sm:$0x3] }
 0x29b   : > { %v1723_v45 = vsel %vm1691_vm10, %v1690_v49, %v1360_v9  ;;  %v3400_v63 = vsel %vm2902_vm13, %v2535_v15, -inf  ;;  %v3352_v42 = vrot.slane %v3351_v44, 4  ;;  %v1722_v51 = vsel %vm1691_vm10, %v1689_v50, %v1358_v35 }
 0x29c   : > { %v1756_v59 = vsel %vm1724_vm11, %v1723_v45, %v1461_v37  ;;  %v3382_v46 = vrot.slane %v3381_v34, 2  ;;  %v3358_v23 = vsel %vm2902_vm13, %v2517_v38, -inf  ;;  %v3366_v57 = vrot.slane %v3365_v10, 4 }
 0x29d   : > { %v1755_v43 = vsel %vm1724_vm11, %v1722_v51, %v1459_v16  ;;  %v3388_v7 = vmax.f32 %v3386_v6, %v3387_v48  ;;  %v4126_v30 = vcombine.low %v7100_v17, %v7729_v33  ;;  %v4142_v3 = vcombine.low %v7433_v25, %v7983_v56 }
 0x29e   : > { %5597 = vmatprep.mubr.msk.f32.mxu0 %vm1762_vm12, %v1755_v43  ;;  %v3395_v36 = vmax.f32 %v3393_v53, %v3394_v58  ;;  %v3401_v55 = vrot.slane %v3400_v63, 4  ;;  %v3372_v32 = vsel %vm2902_vm13, %v2518_v1, -inf  ;;  %v5669_v5 = vpack.i.bf16 %v8021_v28, %v7802_v14 }
 0x29f   : > { %5598 = vmatmul.mubr.msk.f32.gmra.mxu0 %vm1762_vm12, %v1756_v59  ;;  %v3353_v39 = vmax.f32 %v3351_v44, %v3352_v42  ;;  %v3359_v62 = vrot.slane %v3358_v23, 4  ;;  %v4127_v9 = vcombine.high %v7100_v17, %v7729_v33  ;;  %v3383_v24 = vmax.f32 %v3381_v34, %v3382_v46 }
 0x2a0   : > { %v3367_v35 = vmax.f32 %v3365_v10, %v3366_v57  ;;  %5670 = vrot.lane.b32.xlu1 %v5669_v5, %s5794_s16  ;;  %v4380_v19 = vrot.slane %v8021_v28, 1  ;;  %v4381_v54 = vrot.slane %v4341_v20, 1  ;;  %v3389_v40 = vrot.slane %v3388_v7, 2 }
 0x2a1   : > { %v3373_v2 = vrot.slane %v3372_v32, 4  ;;  %v8039_v60 = vrot.slane %v4126_v30, %v6773_v52  ;;  %v8042_v47 = vrot.slane %v4142_v3, %v6773_v52  ;;  %v3396_v14 = vrot.slane %v3395_v36, 2 }
 0x2a2   : > { %v3402_v0 = vmax.f32 %v3400_v63, %v3401_v55  ;;  %v8045_v22 = vsel %vm538_vm3, %v4380_v19, %v4381_v54  ;;  %v4428_v17 = vrot.slane %v8021_v28, 2  ;;  %v3354_v33 = vrot.slane %v3353_v39, 2 }
 0x2a3   : > { %v3360_v27 = vmax.f32 %v3358_v23, %v3359_v62  ;;  %v5674_v21 = vpack.i.bf16 %v8045_v22, %v7839_v26  ;;  %v4429_v29 = vrot.slane %v4341_v20, 2  ;;  %v3384_v13 = vrot.slane %v3383_v24, 1 }
 0x2a4   : > { %v3368_v41 = vrot.slane %v3367_v35, 2  ;;  %v8051_v15 = vrot.slane %v4127_v9, %v6773_v52  ;;  %v4143_v53 = vcombine.high %v7433_v25, %v7983_v56  ;;  %v8055_v4 = vmax.f32 %v3388_v7, %v3389_v40 }
 0x2a5   : > { %v3374_v34 = vmax.f32 %v3372_v32, %v3373_v2  ;;  %5675 = vrot.lane.b32.xlu0 %v5674_v21, %s5795_s17  ;;  %v8059_v38 = vsel %vm715_vm2, %v4428_v17, %v4429_v29  ;;  %v8062_v37 = vmax.f32 %v3395_v36, %v3396_v14  ;;  %v3403_v61 = vrot.slane %v3402_v0, 2 }
 0x2a6   : > { %v5679_v48 = vpack.i.bf16 %v8059_v38, %v7849_v11  ;;  %v8067_v25 = vmax.f32 %v3353_v39, %v3354_v33  ;;  %v3361_v56 = vrot.slane %v3360_v27, 2  ;;  %v4190_v16 = vcombine.low %v8039_v60, %v8042_v47 }
 0x2a7   : > { %v8072_v58 = vmax.f32 %v3367_v35, %v3368_v41  ;;  %v4191_v50 = vcombine.high %v8039_v60, %v8042_v47  ;;  %v8079_v45 = vrot.slane %v4143_v53, %v6773_v52  ;;  %v8081_v63 = vmax.f32 %v3383_v24, %v3384_v13 }
 0x2a8   : > { %5680 = vrot.lane.b32.xlu1 %v5679_v48, %s5796_s21  ;;  %v3391_v42 = vrot.slane %v8055_v4, 1  ;;  %v3375_v51 = vrot.slane %v3374_v34, 2  ;;  %v3398_v46 = vrot.slane %v8062_v37, 1  ;;  %v8089_v7 = vmax.f32 %v3402_v0, %v3403_v61 }
 0x2a9   : > { %v4206_v57 = vcombine.low %v8051_v15, %v8079_v45  ;;  %v4207_v43 = vcombine.high %v8051_v15, %v8079_v45  ;;  %v3356_v20 = vrot.slane %v8067_v25, 1  ;;  %v3362_v36 = vmax.f32 %v3360_v27, %v3361_v56 }
 0x2aa   : > { %v3370_v55 = vrot.slane %v8072_v58, 1  ;;  %v3376_v39 = vmax.f32 %v3374_v34, %v3375_v51  ;;  %vm8844_vm8 = vcmask 1043459   ;;  %vm8845_vm9 = vcmask 1044484  }
 0x2ab   : > { %v5581_v6 = vpop.f32.mrf.mxu0  ;;  %vm8846_vm10 = vcmask 1045509   ;;  %vm8847_vm12 = vcmask 1046534   ;;  %vm4296_vm7 = vcmask 654336   ;;  %vm4298_vm0 = vcmask 785408  }
 0x2ac   : > { %v2114_v26 = vmul.f32 %v7963_v31, %v5581_v6 }
 0x2ad   : > { %v2019_v44 = vpop.f32.mrf.mxu0 }
 0x2ae   : > { %v2113_v49 = vmul.f32 %v7963_v31, %v2019_v44  ;;  %v2153_v10 = vadd.f32 %v7975_v12, %v2114_v26 }
 0x2b0   : > { %v2152_v1 = vadd.f32 %v7975_v12, %v2113_v49  ;;  %v2185_v59 = vmax.f32 %v2153_v10, 0.0 }
 0x2b2   : > { %v2184_v23 = vmax.f32 %v2152_v1, 0.0  ;;  %v2553_v30 = vcombine.high %v2185_v59, %v2185_v59  ;;  %v2560_v3 = vrot.slane %v2185_v59, %v6773_v52 }
 0x2b4   : > { %v2536_v32 = vcombine.high %v2184_v23, %v2184_v23  ;;  %v2543_v5 = vrot.slane %v2184_v23, %v6773_v52  ;;  %v2567_v62 = vrot.slane %v2553_v30, %v6773_v52  ;;  %v2568_v9 = vcombine.high %v2560_v3, %v2560_v3 }
 0x2b5   : > { %v3435_v24 = vsel %vm2902_vm13, %v2560_v3, -inf }
 0x2b6   : > { %v3436_v35 = vrot.slane %v3435_v24, 4  ;;  %v2550_v19 = vrot.slane %v2536_v32, %v6773_v52  ;;  %v2551_v54 = vcombine.high %v2543_v5, %v2543_v5  ;;  %v3407_v40 = vsel %vm2902_vm13, %v2543_v5, -inf }
 0x2b7   : > { %v2569_v2 = vcombine.high %v2567_v62, %v2567_v62  ;;  %v3442_v14 = vsel %vm2902_vm13, %v2568_v9, -inf  ;;  %v3449_v0 = vsel %vm2902_vm13, %v2567_v62, -inf  ;;  %v3408_v17 = vrot.slane %v3407_v40, 4 }
 0x2b8   : > { %v3437_v33 = vmax.f32 %v3435_v24, %v3436_v35  ;;  %v3443_v27 = vrot.slane %v3442_v14, 4  ;;  %v3450_v21 = vrot.slane %v3449_v0, 4  ;;  %v2552_v29 = vcombine.high %v2550_v19, %v2550_v19 }
 0x2b9   : > { %v3456_v6 = vsel %vm2902_vm13, %v2569_v2, -inf  ;;  %v3409_v13 = vmax.f32 %v3407_v40, %v3408_v17  ;;  %v3414_v41 = vsel %vm2902_vm13, %v2551_v54, -inf  ;;  %v3421_v53 = vsel %vm2902_vm13, %v2550_v19, -inf }
 0x2ba   : > { %v3438_v34 = vrot.slane %v3437_v33, 2  ;;  %v3444_v26 = vmax.f32 %v3442_v14, %v3443_v27  ;;  %v3451_v44 = vmax.f32 %v3449_v0, %v3450_v21  ;;  %v3457_v61 = vrot.slane %v3456_v6, 4 }
 0x2bb   : > { %v3410_v48 = vrot.slane %v3409_v13, 2  ;;  %v3415_v49 = vrot.slane %v3414_v41, 4  ;;  %v3422_v56 = vrot.slane %v3421_v53, 4  ;;  %v3428_v10 = vsel %vm2902_vm13, %v2552_v29, -inf }
 0x2bc   : > { %v3439_v1 = vmax.f32 %v3437_v33, %v3438_v34  ;;  %v3445_v51 = vrot.slane %v3444_v26, 2  ;;  %v3452_v59 = vrot.slane %v3451_v44, 2  ;;  %v3458_v23 = vmax.f32 %v3456_v6, %v3457_v61 }
 0x2bd   : > { %v3411_v30 = vmax.f32 %v3409_v13, %v3410_v48  ;;  %v3416_v3 = vmax.f32 %v3414_v41, %v3415_v49  ;;  %v3423_v32 = vmax.f32 %v3421_v53, %v3422_v56  ;;  %v3429_v5 = vrot.slane %v3428_v10, 4 }
 0x2be   : > { %v3363_v62 = vrot.slane %v3362_v36, 1  ;;  %v3446_v9 = vmax.f32 %v3444_v26, %v3445_v51  ;;  %v3453_v24 = vmax.f32 %v3451_v44, %v3452_v59  ;;  %v3459_v35 = vrot.slane %v3458_v23, 2 }
 0x2bf   : > { %v3412_v19 = vrot.slane %v3411_v30, 1  ;;  %v3417_v54 = vrot.slane %v3416_v3, 2  ;;  %v3424_v40 = vrot.slane %v3423_v32, 2  ;;  %v3430_v2 = vmax.f32 %v3428_v10, %v3429_v5 }
 0x2c0   : > { %v3357_v14 = vmax.f32 %v8067_v25, %v3356_v20  ;;  %v3377_v0 = vrot.slane %v3376_v39, 1  ;;  %v3440_v17 = vrot.slane %v3439_v1, 1  ;;  %v3460_v33 = vmax.f32 %v3458_v23, %v3459_v35 }
 0x2c1   : > { %v3413_v27 = vmax.f32 %v3411_v30, %v3412_v19  ;;  %v3418_v21 = vmax.f32 %v3416_v3, %v3417_v54  ;;  %v3425_v29 = vmax.f32 %v3423_v32, %v3424_v40  ;;  %v3431_v6 = vrot.slane %v3430_v2, 2 }
 0x2c2   : > { %v3364_v13 = vmax.f32 %v3362_v36, %v3363_v62  ;;  %v3371_v41 = vmax.f32 %v8072_v58, %v3370_v55  ;;  %v3447_v53 = vrot.slane %v3446_v9, 1  ;;  %v3454_v34 = vrot.slane %v3453_v24, 1 }
 0x2c3   : > { %v3461_v26 = vrot.slane %v3460_v33, 1  ;;  %v3419_v44 = vrot.slane %v3418_v21, 1  ;;  %v3426_v61 = vrot.slane %v3425_v29, 1  ;;  %v3432_v48 = vmax.f32 %v3430_v2, %v3431_v6 }
 0x2c4   : > { %v3392_v25 = vmax.f32 %v8055_v4, %v3391_v42  ;;  %v3405_v20 = vrot.slane %v8089_v7, 1  ;;  %v3378_v49 = vmax.f32 %v3376_v39, %v3377_v0  ;;  %v3895_v56 = vsel %vm1592_vm4, %v3357_v14, -inf }
 0x2c5   : > { %v3441_v10 = vmax.f32 %v3439_v1, %v3440_v17  ;;  %v3420_v51 = vmax.f32 %v3418_v21, %v3419_v44  ;;  %v3427_v36 = vmax.f32 %v3425_v29, %v3426_v61  ;;  %v3896_v58 = vsel %vm1592_vm4, %v3413_v27, -inf }
 0x2c6   : > { %v3898_v55 = vsel %vm1592_vm4, %v3364_v13, -inf  ;;  %v3901_v59 = vsel %vm1592_vm4, %v3371_v41, -inf  ;;  %v3448_v23 = vmax.f32 %v3446_v9, %v3447_v53  ;;  %v3433_v30 = vrot.slane %v3432_v48, 1 }
 0x2c7   : > { %v3455_v3 = vmax.f32 %v3453_v24, %v3454_v34  ;;  %v3462_v32 = vmax.f32 %v3460_v33, %v3461_v26  ;;  %v3899_v4 = vsel %vm1592_vm4, %v3420_v51, -inf  ;;  %v3902_v42 = vsel %vm1592_vm4, %v3427_v36, -inf }
 0x2c8   : > { %v3434_v39 = vmax.f32 %v3432_v48, %v3433_v30  ;;  %v3897_v5 = vmax.f32 %v3895_v56, %v3896_v58  ;;  %v3900_v62 = vmax.f32 %v3898_v55, %v3899_v4  ;;  %v3903_v1 = vmax.f32 %v3901_v59, %v3902_v42  ;;  %v5626_v56 = vpop.permute.xlu0 %5625 }
 0x2c9   : > { %v3399_v35 = vmax.f32 %v8062_v37, %v3398_v46  ;;  %v3406_v19 = vmax.f32 %v8089_v7, %v3405_v20  ;;  %v3908_v54 = vsel %vm1592_vm4, %v3441_v10, -inf  ;;  %v3904_v9 = vsel %vm1592_vm4, %v3378_v49, -inf }
 0x2ca   : > { %v3911_v24 = vsel %vm1592_vm4, %v3448_v23, -inf  ;;  %v3905_v40 = vsel %vm1592_vm4, %v3434_v39, -inf  ;;  %v4090_v2 = vsel %vm4055_vm14, %v3900_v62, %v3897_v5  ;;  %v3907_v14 = vsel %vm1592_vm4, %v8081_v63, -inf  ;;  %v5631_v23 = vpop.permute.xlu1 %5630 }
 0x2cb   : > { %v3914_v0 = vsel %vm1592_vm4, %v3455_v3, -inf  ;;  %v3906_v17 = vmax.f32 %v3904_v9, %v3905_v40  ;;  %v4091_v37 = vsel %vm4057_vm15, %v3903_v1, %v4090_v2  ;;  %v3910_v46 = vsel %vm1592_vm4, %v3392_v25, -inf }
 0x2cc   : > { %v3909_v7 = vmax.f32 %v3907_v14, %v3908_v54  ;;  %v3917_v33 = vsel %vm1592_vm4, %v3462_v32, -inf  ;;  %v5584_v27 = vpop.f32.mrf.mxu0  ;;  %v3913_v21 = vsel %vm1592_vm4, %v3399_v35, -inf  ;;  %v3912_v29 = vmax.f32 %v3910_v46, %v3911_v24  ;;  %v5636_v3 = vpop.permute.xlu0 %5635  ;;  %v5767_v14 = vld [vmem:[#allocation3 + $0x10] sm:$0xff] }
 0x2cd   : > { %v4092_v6 = vsel %vm8844_vm8, %v3906_v17, %v4091_v37  ;;  %v2116_v13 = vmul.f32 %v7963_v31, %v5584_v27  ;;  %v3916_v63 = vsel %vm1592_vm4, %v3406_v19, -inf  ;;  %v3915_v41 = vmax.f32 %v3913_v21, %v3914_v0  ;;  %v5768_v17 = vld [vmem:[#allocation3] sm:$0xff] }
 0x2ce   : > { %v4093_v53 = vsel %vm8845_vm9, %v3909_v7, %v4092_v6  ;;  %v2029_v34 = vpop.f32.mrf.mxu0  ;;  %v3918_v26 = vmax.f32 %v3916_v63, %v3917_v33  ;;  %v5628_v42 = vunpack.i.h.bf16 %v5626_v56  ;;  %v5627_v39 = vunpack.i.l.bf16 %v5626_v56  ;;  %v5641_v40 = vpop.permute.xlu1 %5640 }
 0x2cf   : > { %v4094_v44 = vsel %vm8846_vm10, %v3912_v29, %v4093_v53  ;;  %v2155_v61 = vadd.f32 %v7975_v12, %v2116_v13  ;;  %v2115_v25 = vmul.f32 %v7963_v31, %v2029_v34  ;;  %v5633_v9 = vunpack.i.h.bf16 %v5631_v23 }
 0x2d0   : > { %v4095_v48 = vsel %vm8847_vm12, %v3915_v41, %v4094_v44  ;;  %v5632_v24 = vunpack.i.l.bf16 %v5631_v23  ;;  %v4601_v0 = vsel %vm1592_vm4, %v5767_v14, %v5628_v42  ;;  %v4600_v37 = vsel %vm1592_vm4, %v5768_v17, %v5627_v39  ;;  %v5646_v7 = vpop.permute.xlu0 %5645 }
 0x2d1   : > { %v8142_v20 = vsel %vm8848_vm1, %v3918_v26, %v4095_v48  ;;  %v2187_v49 = vmax.f32 %v2155_v61, 0.0  ;;  %v2154_v36 = vadd.f32 %v7975_v12, %v2115_v25  ;;  %v5638_v46 = vunpack.i.h.bf16 %v5636_v3 }
 0x2d2   : > { %4328 = vst.msk [vmem:[#allocation3 + $0x51] sm:$0xff] %vm1592_vm4, %v8142_v20  ;;  %v5637_v27 = vunpack.i.l.bf16 %v5636_v3  ;;  %v5643_v13 = vunpack.i.h.bf16 %v5641_v40  ;;  %v5642_v53 = vunpack.i.l.bf16 %v5641_v40  ;;  %v4608_v34 = vsel %vm1724_vm11, %v4600_v37, %v5632_v24 }
 0x2d3   : > { %v2587_v10 = vcombine.high %v2187_v49, %v2187_v49  ;;  %v2594_v51 = vrot.slane %v2187_v49, %v6773_v52  ;;  %v2186_v30 = vmax.f32 %v2154_v36, 0.0  ;;  %v4609_v48 = vsel %vm1724_vm11, %v4601_v0, %v5633_v9 }
 0x2d4   : > { %v5648_v25 = vunpack.i.h.bf16 %v5646_v7  ;;  %v5647_v49 = vunpack.i.l.bf16 %v5646_v7  ;;  %v4617_v36 = vsel %vm4292_vm6, %v4609_v48, %v5638_v46  ;;  %vm8795_vm8 = vcmask 916480  }
 0x2d5   : > { %v2602_v58 = vcombine.high %v2594_v51, %v2594_v51  ;;  %v3491_v55 = vsel %vm2902_vm13, %v2594_v51, -inf  ;;  %v2601_v59 = vrot.slane %v2587_v10, %v6773_v52  ;;  %v2570_v1 = vcombine.high %v2186_v30, %v2186_v30  ;;  %v5651_v26 = vpop.permute.xlu1 %5650 }
 0x2d6   : > { %v3492_v32 = vrot.slane %v3491_v55, 4  ;;  %v2577_v35 = vrot.slane %v2186_v30, %v6773_v52  ;;  %v4616_v51 = vsel %vm4292_vm6, %v4608_v34, %v5637_v27  ;;  %vm8849_vm9 = vcmask 1043459  }
 0x2d7   : > { %v3498_v4 = vsel %vm2902_vm13, %v2602_v58, -inf  ;;  %v2603_v5 = vcombine.high %v2601_v59, %v2601_v59  ;;  %v3505_v62 = vsel %vm2902_vm13, %v2601_v59, -inf  ;;  %v2584_v21 = vrot.slane %v2570_v1, %v6773_v52 }
 0x2d8   : > { %v3493_v19 = vmax.f32 %v3491_v55, %v3492_v32  ;;  %v3499_v54 = vrot.slane %v3498_v4, 4  ;;  %v3506_v2 = vrot.slane %v3505_v62, 4  ;;  %v2585_v29 = vcombine.high %v2577_v35, %v2577_v35 }
 0x2d9   : > { %v3512_v33 = vsel %vm2902_vm13, %v2603_v5, -inf  ;;  %v3463_v6 = vsel %vm2902_vm13, %v2577_v35, -inf  ;;  %v2586_v58 = vcombine.high %v2584_v21, %v2584_v21  ;;  %v5652_v59 = vunpack.i.l.bf16 %v5651_v26  ;;  %v4343_v17 = vld [vmem:[#allocation3 + $0x58] sm:$0x3] }
 0x2da   : > { %v3494_v63 = vrot.slane %v3493_v19, 2  ;;  %v3500_v41 = vmax.f32 %v3498_v4, %v3499_v54  ;;  %v3507_v44 = vmax.f32 %v3505_v62, %v3506_v2  ;;  %v3513_v61 = vrot.slane %v3512_v33, 4  ;;  %v5656_v10 = vpop.permute.xlu0 %5655 }
 0x2db   : > { %v3464_v56 = vrot.slane %v3463_v6, 4  ;;  %v3470_v55 = vsel %vm2902_vm13, %v2585_v29, -inf  ;;  %v3477_v3 = vsel %vm2902_vm13, %v2584_v21, -inf  ;;  %v5657_v42 = vunpack.i.l.bf16 %v5656_v10 }
 0x2dc   : > { %v3495_v23 = vmax.f32 %v3493_v19, %v3494_v63  ;;  %v3501_v30 = vrot.slane %v3500_v41, 2  ;;  %v3508_v32 = vrot.slane %v3507_v44, 2  ;;  %v3514_v4 = vmax.f32 %v3512_v33, %v3513_v61  ;;  %v8168_v19 = vld [vmem:[#allocation3 + $0x50] sm:$0xff] }
 0x2dd   : > { %v3465_v39 = vmax.f32 %v3463_v6, %v3464_v56  ;;  %v3471_v5 = vrot.slane %v3470_v55, 4  ;;  %v4624_v62 = vsel %vm4294_vm5, %v4616_v51, %v5642_v53  ;;  %v4625_v1 = vsel %vm4294_vm5, %v4617_v36, %v5643_v13 }
 0x2de   : > { %v5653_v35 = vunpack.i.h.bf16 %v5651_v26  ;;  %v3478_v54 = vrot.slane %v3477_v3, 4  ;;  %v4632_v9 = vsel %vm4296_vm7, %v4624_v62, %v5647_v49  ;;  %v4633_v24 = vsel %vm4296_vm7, %v4625_v1, %v5648_v25 }
 0x2df   : > { %v3496_v40 = vrot.slane %v3495_v23, 1  ;;  %v3502_v2 = vmax.f32 %v3500_v41, %v3501_v30  ;;  %v3484_v14 = vsel %vm2902_vm13, %v2586_v58, -inf  ;;  %v4640_v0 = vsel %vm4298_vm0, %v4632_v9, %v5652_v59 }
 0x2e0   : > { %v8172_v37 = vmax.f32 %v3507_v44, %v3508_v32  ;;  %v3515_v46 = vrot.slane %v3514_v4, 2  ;;  %v5658_v7 = vunpack.i.h.bf16 %v5656_v10  ;;  %v4648_v33 = vsel %vm8795_vm8, %v4640_v0, %v5657_v42 }
 0x2e1   : > { %v3466_v27 = vrot.slane %v3465_v39, 2  ;;  %v3472_v21 = vmax.f32 %v3470_v55, %v3471_v5  ;;  %4755 = vmatmul.mubr.f32.vlgmr.msra.gmra.mxu1 %v4648_v33  ;;  %v5684_v29 = vpack.i.bf16 %v8168_v19, %v8021_v28  ;;  %v4383_v6 = vrot.slane %v8168_v19, 1 }
 0x2e2   : > { %5493 = vmatprep.mubr.msk.f32.mxu1 %vm1592_vm4, %v7849_v11  ;;  %v4384_v63 = vrot.slane %v4343_v17, 1  ;;  %v4431_v41 = vrot.slane %v8168_v19, 2  ;;  %v4432_v53 = vrot.slane %v4343_v17, 2  ;;  %v3503_v26 = vrot.slane %v3502_v2, 1 }
 0x2e3   : > { %v3479_v44 = vmax.f32 %v3477_v3, %v3478_v54  ;;  %v3485_v61 = vrot.slane %v3484_v14, 4  ;;  %v4641_v48 = vsel %vm4298_vm0, %v4633_v24, %v5653_v35  ;;  %5685 = vrot.lane.b32.xlu0 %v5684_v29, %s5797_s30  ;;  %v8190_v10 = vmax.f32 %v3465_v39, %v3466_v27 }
 0x2e4   : > { %v4649_v25 = vsel %vm8795_vm8, %v4641_v48, %v5658_v7  ;;  %v8186_v49 = vsel %vm538_vm3, %v4383_v6, %v4384_v63  ;;  %v3473_v51 = vrot.slane %v3472_v21, 2  ;;  %v8197_v58 = vsel %vm715_vm2, %v4431_v41, %v4432_v53 }
 0x2e5   : > { %4760 = vmatmul.mubr.f32.gmra.mxu1 %v4649_v25  ;;  %v5689_v36 = vpack.i.bf16 %v8186_v49, %v8045_v22  ;;  %v8200_v30 = vmax.f32 %v3495_v23, %v3496_v40  ;;  %v3510_v3 = vrot.slane %v8172_v37, 1  ;;  %v3480_v32 = vrot.slane %v3479_v44, 2 }
 0x2e6   : > { %5494 = vmatprep.mubr.msk.f32.mxu1 %vm1592_vm4, %v8059_v38  ;;  %v3486_v42 = vmax.f32 %v3484_v14, %v3485_v61  ;;  %v8205_v22 = vmax.f32 %v3514_v4, %v3515_v46  ;;  %v8208_v1 = vmax.f32 %v3502_v2, %v3503_v26  ;;  %v3468_v35 = vrot.slane %v8190_v10, 1 }
 0x2e7   : > { %5690 = vrot.lane.b32.xlu1 %v5689_v36, %s5798_s10  ;;  %5695 = vrot.lane.b32.xlu0 %v5689_v36, %s5788_s15  ;;  %v3474_v23 = vmax.f32 %v3472_v21, %v3473_v51  ;;  %v5699_v54 = vpack.i.bf16 %v8197_v58, %v8059_v38  ;;  %v3481_v4 = vmax.f32 %v3479_v44, %v3480_v32  ;;  %vm8850_vm10 = vcmask 1044484  }
 0x2e8   : > { %v3487_v0 = vrot.slane %v3486_v42, 2  ;;  %vm8851_vm12 = vcmask 1045509   ;;  %vm8852_vm1 = vcmask 1046534   ;;  %vm8853_vm8 = vcmask 1047559  }
 0x2eb   : > { %v5587_v13 = vpop.f32.mrf.mxu0  ;;  %5700 = vrot.lane.b32.xlu1 %v5699_v54, %s5792_s9 }
 0x2ec   : > { %v2118_v34 = vmul.f32 %v7963_v31, %v5587_v13 }
 0x2ed   : > { %v2039_v28 = vpop.f32.mrf.mxu0 }
 0x2ee   : > { %v2157_v11 = vadd.f32 %v7975_v12, %v2118_v34  ;;  %v2117_v56 = vmul.f32 %v7963_v31, %v2039_v28 }
 0x2f0   : > { %v2189_v55 = vmax.f32 %v2157_v11, 0.0  ;;  %v2156_v59 = vadd.f32 %v7975_v12, %v2117_v56  ;;  %v3488_v56 = vmax.f32 %v3486_v42, %v3487_v0 }
 0x2f2   : > { %v2621_v39 = vcombine.high %v2189_v55, %v2189_v55  ;;  %v2628_v5 = vrot.slane %v2189_v55, %v6773_v52  ;;  %v2188_v62 = vmax.f32 %v2156_v59, 0.0 }
 0x2f4   : > { %v2635_v9 = vrot.slane %v2621_v39, %v6773_v52  ;;  %v2636_v24 = vcombine.high %v2628_v5, %v2628_v5  ;;  %v3547_v40 = vsel %vm2902_vm13, %v2628_v5, -inf  ;;  %v2604_v14 = vcombine.high %v2188_v62, %v2188_v62 }
 0x2f5   : > { %v3548_v17 = vrot.slane %v3547_v40, 4  ;;  %v2611_v2 = vrot.slane %v2188_v62, %v6773_v52  ;;  %v3475_v62 = vrot.slane %v3474_v23, 1 }
 0x2f6   : > { %v2637_v46 = vcombine.high %v2635_v9, %v2635_v9  ;;  %v3554_v7 = vsel %vm2902_vm13, %v2636_v24, -inf  ;;  %v3561_v33 = vsel %vm2902_vm13, %v2635_v9, -inf  ;;  %v2618_v38 = vrot.slane %v2604_v14, %v6773_v52 }
 0x2f7   : > { %v3549_v27 = vmax.f32 %v3547_v40, %v3548_v17  ;;  %v3555_v21 = vrot.slane %v3554_v7, 4  ;;  %v3562_v29 = vrot.slane %v3561_v33, 4  ;;  %v2619_v6 = vcombine.high %v2611_v2, %v2611_v2 }
 0x2f8   : > { %v3568_v13 = vsel %vm2902_vm13, %v2637_v46, -inf  ;;  %v2620_v63 = vcombine.high %v2618_v38, %v2618_v38  ;;  %v3519_v41 = vsel %vm2902_vm13, %v2611_v2, -inf  ;;  %v3533_v53 = vsel %vm2902_vm13, %v2618_v38, -inf }
 0x2f9   : > { %v3550_v34 = vrot.slane %v3549_v27, 2  ;;  %v3556_v26 = vmax.f32 %v3554_v7, %v3555_v21  ;;  %v3563_v44 = vmax.f32 %v3561_v33, %v3562_v29  ;;  %v3569_v61 = vrot.slane %v3568_v13, 4 }
 0x2fa   : > { %v3520_v48 = vrot.slane %v3519_v41, 4  ;;  %v3526_v28 = vsel %vm2902_vm13, %v2619_v6, -inf  ;;  %v3534_v25 = vrot.slane %v3533_v53, 4  ;;  %v3540_v11 = vsel %vm2902_vm13, %v2620_v63, -inf }
 0x2fb   : > { %v3557_v51 = vrot.slane %v3556_v26, 2  ;;  %v3564_v36 = vrot.slane %v3563_v44, 2  ;;  %v3570_v55 = vmax.f32 %v3568_v13, %v3569_v61  ;;  %v3527_v32 = vrot.slane %v3526_v28, 4 }
 0x2fc   : > { %v3521_v59 = vmax.f32 %v3519_v41, %v3520_v48  ;;  %v3535_v39 = vmax.f32 %v3533_v53, %v3534_v25  ;;  %v3541_v5 = vrot.slane %v3540_v11, 4  ;;  %v3551_v54 = vmax.f32 %v3549_v27, %v3550_v34 }
 0x2fd   : > { %v3558_v9 = vmax.f32 %v3556_v26, %v3557_v51  ;;  %v3571_v24 = vrot.slane %v3570_v55, 2  ;;  %v3528_v14 = vmax.f32 %v3526_v28, %v3527_v32  ;;  %v3482_v46 = vrot.slane %v3481_v4, 1 }
 0x2fe   : > { %v3522_v40 = vrot.slane %v3521_v59, 2  ;;  %v3536_v17 = vrot.slane %v3535_v39, 2  ;;  %v3542_v2 = vmax.f32 %v3540_v11, %v3541_v5  ;;  %v3489_v7 = vrot.slane %v3488_v56, 1 }
 0x2ff   : > { %v3565_v33 = vmax.f32 %v3563_v44, %v3564_v36  ;;  %v3572_v38 = vmax.f32 %v3570_v55, %v3571_v24  ;;  %v3529_v0 = vrot.slane %v3528_v14, 2  ;;  %v3511_v6 = vmax.f32 %v8172_v37, %v3510_v3 }
 0x300   : > { %v3523_v42 = vmax.f32 %v3521_v59, %v3522_v40  ;;  %v3537_v21 = vmax.f32 %v3535_v39, %v3536_v17  ;;  %v3543_v29 = vrot.slane %v3542_v2, 2  ;;  %v3469_v27 = vmax.f32 %v8190_v10, %v3468_v35 }
 0x301   : > { %v3476_v13 = vmax.f32 %v3474_v23, %v3475_v62  ;;  %v3552_v63 = vrot.slane %v3551_v54, 1  ;;  %v3559_v41 = vrot.slane %v3558_v9, 1  ;;  %v3530_v34 = vmax.f32 %v3528_v14, %v3529_v0 }
 0x302   : > { %v3524_v53 = vrot.slane %v3523_v42, 1  ;;  %v3538_v26 = vrot.slane %v3537_v21, 1  ;;  %v3517_v61 = vrot.slane %v8205_v22, 1  ;;  %v3483_v44 = vmax.f32 %v3481_v4, %v3482_v46 }
 0x303   : > { %v3566_v48 = vrot.slane %v3565_v33, 1  ;;  %v3544_v28 = vmax.f32 %v3542_v2, %v3543_v29  ;;  %v3490_v25 = vmax.f32 %v3488_v56, %v3489_v7  ;;  %v3573_v11 = vrot.slane %v3572_v38, 1 }
 0x304   : > { %v3525_v51 = vmax.f32 %v3523_v42, %v3524_v53  ;;  %v3531_v36 = vrot.slane %v3530_v34, 1  ;;  %v3919_v55 = vsel %vm1592_vm4, %v3469_v27, -inf  ;;  %v3553_v37 = vmax.f32 %v3551_v54, %v3552_v63 }
 0x305   : > { %v3539_v3 = vmax.f32 %v3537_v21, %v3538_v26  ;;  %v3545_v10 = vrot.slane %v3544_v28, 1  ;;  %v3922_v35 = vsel %vm1592_vm4, %v3476_v13, -inf  ;;  %v3560_v23 = vmax.f32 %v3558_v9, %v3559_v41 }
 0x306   : > { %v3532_v59 = vmax.f32 %v3530_v34, %v3531_v36  ;;  %v3920_v32 = vsel %vm1592_vm4, %v3525_v51, -inf  ;;  %v3925_v39 = vsel %vm1592_vm4, %v3483_v44, -inf  ;;  %v3567_v4 = vmax.f32 %v3565_v33, %v3566_v48 }
 0x307   : > { %v3546_v5 = vmax.f32 %v3544_v28, %v3545_v10  ;;  %v3926_v56 = vsel %vm1592_vm4, %v3539_v3, -inf  ;;  %v3928_v62 = vsel %vm1592_vm4, %v3490_v25, -inf  ;;  %v3574_v24 = vmax.f32 %v3572_v38, %v3573_v11 }
 0x308   : > { %v3923_v40 = vsel %vm1592_vm4, %v3532_v59, -inf  ;;  %v3927_v54 = vmax.f32 %v3925_v39, %v3926_v56  ;;  %v3932_v14 = vsel %vm1592_vm4, %v3553_v37, -inf  ;;  %v3921_v17 = vmax.f32 %v3919_v55, %v3920_v32 }
 0x309   : > { %v3924_v2 = vmax.f32 %v3922_v35, %v3923_v40  ;;  %v3929_v9 = vsel %vm1592_vm4, %v3546_v5, -inf  ;;  %v3518_v46 = vmax.f32 %v8205_v22, %v3517_v61  ;;  %v3935_v7 = vsel %vm1592_vm4, %v3560_v23, -inf }
 0x30a   : > { %v3930_v33 = vmax.f32 %v3928_v62, %v3929_v9  ;;  %v3931_v42 = vsel %vm1592_vm4, %v8200_v30, -inf  ;;  %v3938_v0 = vsel %vm1592_vm4, %v3567_v4, -inf  ;;  %v3934_v21 = vsel %vm1592_vm4, %v8208_v1, -inf }
 0x30b   : > { %v4097_v38 = vsel %vm4055_vm14, %v3924_v2, %v3921_v17  ;;  %v3933_v29 = vmax.f32 %v3931_v42, %v3932_v14  ;;  %v3941_v27 = vsel %vm1592_vm4, %v3574_v24, -inf  ;;  %v3937_v22 = vsel %vm1592_vm4, %v3511_v6, -inf }
 0x30c   : > { %v4098_v13 = vsel %vm4057_vm15, %v3927_v54, %v4097_v38  ;;  %v3936_v41 = vmax.f32 %v3934_v21, %v3935_v7  ;;  %v3940_v34 = vsel %vm1592_vm4, %v3518_v46, -inf  ;;  %v3939_v26 = vmax.f32 %v3937_v22, %v3938_v0 }
 0x30d   : > { %v5590_v63 = vpop.f32.mrf.mxu0  ;;  %v4099_v53 = vsel %vm8849_vm9, %v3930_v33, %v4098_v13  ;;  %v3942_v44 = vmax.f32 %v3940_v34, %v3941_v27 }
 0x30e   : > { %v2120_v30 = vmul.f32 %v7963_v31, %v5590_v63  ;;  %v4100_v61 = vsel %vm8850_vm10, %v3933_v29, %v4099_v53 }
 0x30f   : > { %v4101_v1 = vsel %vm8851_vm12, %v3936_v41, %v4100_v61  ;;  %v2049_v25 = vpop.f32.mrf.mxu0 }
 0x310   : > { %v2159_v48 = vadd.f32 %v7975_v12, %v2120_v30  ;;  %v4102_v28 = vsel %vm8852_vm1, %v3939_v26, %v4101_v1  ;;  %v2119_v51 = vmul.f32 %v7963_v31, %v2049_v25 }
 0x311   : > { %v8258_v6 = vsel %vm8853_vm8, %v3942_v44, %v4102_v28  ;;  %vm8854_vm8 = vmmov %vm8849_vm9 }
 0x312   : > { %4329 = vst.msk [vmem:[#allocation3 + $0x61] sm:$0xff] %vm1592_vm4, %v8258_v6  ;;  %v2191_v11 = vmax.f32 %v2159_v48, 0.0  ;;  %v2158_v37 = vadd.f32 %v7975_v12, %v2119_v51  ;;  %vm8855_vm9 = vmmov %vm8850_vm10 }
 0x313   : > { %vm8856_vm10 = vmmov %vm8851_vm12 }
 0x314   : > { %v2655_v36 = vcombine.high %v2191_v11, %v2191_v11  ;;  %v2662_v55 = vrot.slane %v2191_v11, %v6773_v52  ;;  %v2190_v35 = vmax.f32 %v2158_v37, 0.0  ;;  %vm8857_vm12 = vmmov %vm8852_vm1  ;;  %vm8858_vm1 = vcmask 1047559  }
 0x316   : > { %v2669_v3 = vrot.slane %v2655_v36, %v6773_v52  ;;  %v2670_v10 = vcombine.high %v2662_v55, %v2662_v55  ;;  %v3603_v23 = vsel %vm2902_vm13, %v2662_v55, -inf  ;;  %v2638_v39 = vcombine.high %v2190_v35, %v2190_v35 }
 0x317   : > { %v2645_v4 = vrot.slane %v2190_v35, %v6773_v52  ;;  %v3604_v5 = vrot.slane %v3603_v23, 4 }
 0x318   : > { %v2671_v59 = vcombine.high %v2669_v3, %v2669_v3  ;;  %v3610_v32 = vsel %vm2902_vm13, %v2670_v10, -inf  ;;  %v3617_v31 = vsel %vm2902_vm13, %v2669_v3, -inf  ;;  %v2652_v12 = vrot.slane %v2638_v39, %v6773_v52  ;;  %v8306_v39 = vld [vmem:[%s8777_s3] ss:$0 sm:$0xff] }
 0x319   : > { %v3611_v56 = vrot.slane %v3610_v32, 4  ;;  %v2653_v24 = vcombine.high %v2645_v4, %v2645_v4  ;;  %v3575_v40 = vsel %vm2902_vm13, %v2645_v4, -inf  ;;  %v3605_v54 = vmax.f32 %v3603_v23, %v3604_v5  ;;  %v8273_v9 = vld [vmem:[#allocation3 + $0x60] sm:$0xff]  ;;  %v4345_v7 = vld [vmem:[#allocation3 + $0x68] sm:$0x3] }
 0x31a   : > { %v3624_v62 = vsel %vm2902_vm13, %v2671_v59, -inf  ;;  %v3618_v17 = vrot.slane %v3617_v31, 4  ;;  %v3576_v46 = vrot.slane %v3575_v40, 4  ;;  %v2654_v33 = vcombine.high %v2652_v12, %v2652_v12 }
 0x31b   : > { %v3612_v14 = vmax.f32 %v3610_v32, %v3611_v56  ;;  %v3625_v2 = vrot.slane %v3624_v62, 4  ;;  %v3582_v42 = vsel %vm2902_vm13, %v2653_v24, -inf  ;;  %v3606_v0 = vrot.slane %v3605_v54, 2 }
 0x31c   : > { %v3589_v38 = vsel %vm2902_vm13, %v2652_v12, -inf  ;;  %v5704_v21 = vpack.i.bf16 %v8273_v9, %v8168_v19  ;;  %v4386_v29 = vrot.slane %v8273_v9, 1  ;;  %v3619_v13 = vmax.f32 %v3617_v31, %v3618_v17 }
 0x31d   : > { %v3613_v27 = vrot.slane %v3612_v14, 2  ;;  %v3626_v63 = vmax.f32 %v3624_v62, %v3625_v2  ;;  %v4387_v22 = vrot.slane %v4345_v7, 1  ;;  %v3577_v41 = vmax.f32 %v3575_v40, %v3576_v46 }
 0x31e   : > { %v3583_v53 = vrot.slane %v3582_v42, 4  ;;  %5705 = vrot.lane.b32.xlu0 %v5704_v21, %s5794_s16  ;;  %v4434_v30 = vrot.slane %v8273_v9, 2  ;;  %v4435_v34 = vrot.slane %v4345_v7, 2  ;;  %v3607_v61 = vmax.f32 %v3605_v54, %v3606_v0 }
 0x31f   : > { %v8283_v26 = vsel %vm538_vm3, %v4386_v29, %v4387_v22  ;;  %v3590_v44 = vrot.slane %v3589_v38, 4  ;;  %v3620_v48 = vrot.slane %v3619_v13, 2  ;;  %v3596_v28 = vsel %vm2902_vm13, %v2654_v33, -inf }
 0x320   : > { %v5709_v19 = vpack.i.bf16 %v8283_v26, %v8186_v49  ;;  %v8288_v1 = vsel %vm715_vm2, %v4434_v30, %v4435_v34  ;;  %v3614_v11 = vmax.f32 %v3612_v14, %v3613_v27  ;;  %v3627_v51 = vrot.slane %v3626_v63, 2  ;;  %v8298_v49 = vld [vmem:[%s8776_s2] ss:$0 sm:$0xff] }
 0x321   : > { %v5714_v25 = vpack.i.bf16 %v8288_v1, %v8197_v58  ;;  %v3578_v36 = vrot.slane %v3577_v41, 2  ;;  %v3584_v55 = vmax.f32 %v3582_v42, %v3583_v53  ;;  %v3608_v10 = vrot.slane %v3607_v61, 1 }
 0x322   : > { %5710 = vrot.lane.b32.xlu1 %v5709_v19, %s5795_s17  ;;  %v3591_v35 = vmax.f32 %v3589_v38, %v3590_v44  ;;  %v3597_v23 = vrot.slane %v3596_v28, 4  ;;  %v8301_v32 = vmax.f32 %v3619_v13, %v3620_v48  ;;  %v3615_v56 = vrot.slane %v3614_v11, 1 }
 0x323   : > { %5715 = vrot.lane.b32.xlu0 %v5714_v25, %s5796_s21  ;;  %v8310_v31 = vmax.f32 %v3626_v63, %v3627_v51  ;;  %v8312_v62 = vmax.f32 %v3577_v41, %v3578_v36  ;;  %v3585_v12 = vrot.slane %v3584_v55, 2  ;;  %v8315_v54 = vmax.f32 %v3607_v61, %v3608_v10 }
 0x324   : > { %v3592_v14 = vrot.slane %v3591_v35, 2  ;;  %v3598_v17 = vmax.f32 %v3596_v28, %v3597_v23  ;;  %v3622_v2 = vrot.slane %v8301_v32, 1  ;;  %v8319_v42 = vmax.f32 %v3614_v11, %v3615_v56 }
 0x325   : > { %v3629_v0 = vrot.slane %v8310_v31, 1  ;;  %v3580_v38 = vrot.slane %v8312_v62, 1  ;;  %v3586_v21 = vmax.f32 %v3584_v55, %v3585_v12 }
 0x326   : > { %v3593_v22 = vmax.f32 %v3591_v35, %v3592_v14  ;;  %v3599_v41 = vrot.slane %v3598_v17, 2 }
 0x32b   : > { %v5593_v37 = vpop.f32.mrf.mxu0 }
 0x32c   : > { %v2122_v3 = vmul.f32 %v8298_v49, %v5593_v37 }
 0x32d   : > { %v2059_v59 = vpop.f32.mrf.mxu0 }
 0x32e   : > { %v2161_v4 = vadd.f32 %v8306_v39, %v2122_v3  ;;  %v2121_v5 = vmul.f32 %v8298_v49, %v2059_v59 }
 0x330   : > { %v2193_v24 = vmax.f32 %v2161_v4, 0.0  ;;  %v2160_v40 = vadd.f32 %v8306_v39, %v2121_v5 }
 0x332   : > { %v2689_v46 = vcombine.high %v2193_v24, %v2193_v24  ;;  %v2696_v7 = vrot.slane %v2193_v24, %v6773_v52  ;;  %v2192_v33 = vmax.f32 %v2160_v40, 0.0 }
 0x334   : > { %v2703_v29 = vrot.slane %v2689_v46, %v6773_v52  ;;  %v2704_v27 = vcombine.high %v2696_v7, %v2696_v7  ;;  %v3659_v13 = vsel %vm2902_vm13, %v2696_v7, -inf  ;;  %v2672_v63 = vcombine.high %v2192_v33, %v2192_v33 }
 0x335   : > { %v3660_v53 = vrot.slane %v3659_v13, 4  ;;  %v2679_v30 = vrot.slane %v2192_v33, %v6773_v52 }
 0x336   : > { %v2705_v34 = vcombine.high %v2703_v29, %v2703_v29  ;;  %v3666_v61 = vsel %vm2902_vm13, %v2704_v27, -inf  ;;  %v3673_v44 = vsel %vm2902_vm13, %v2703_v29, -inf  ;;  %v2686_v19 = vrot.slane %v2672_v63, %v6773_v52 }
 0x337   : > { %v3661_v48 = vmax.f32 %v3659_v13, %v3660_v53  ;;  %v3667_v28 = vrot.slane %v3666_v61, 4  ;;  %v3674_v25 = vrot.slane %v3673_v44, 4  ;;  %v2687_v11 = vcombine.high %v2679_v30, %v2679_v30 }
 0x338   : > { %v3680_v51 = vsel %vm2902_vm13, %v2705_v34, -inf  ;;  %v2688_v36 = vcombine.high %v2686_v19, %v2686_v19  ;;  %v3631_v55 = vsel %vm2902_vm13, %v2679_v30, -inf  ;;  %v3645_v37 = vsel %vm2902_vm13, %v2686_v19, -inf }
 0x339   : > { %v3662_v3 = vrot.slane %v3661_v48, 2  ;;  %v3668_v10 = vmax.f32 %v3666_v61, %v3667_v28  ;;  %v3675_v35 = vmax.f32 %v3673_v44, %v3674_v25  ;;  %v3681_v23 = vrot.slane %v3680_v51, 4 }
 0x33a   : > { %v3632_v59 = vrot.slane %v3631_v55, 4  ;;  %v3638_v4 = vsel %vm2902_vm13, %v2687_v11, -inf  ;;  %v3646_v5 = vrot.slane %v3645_v37, 4  ;;  %v3652_v56 = vsel %vm2902_vm13, %v2688_v36, -inf }
 0x33b   : > { %v3663_v12 = vmax.f32 %v3661_v48, %v3662_v3  ;;  %v3669_v24 = vrot.slane %v3668_v10, 2  ;;  %v3676_v40 = vrot.slane %v3675_v35, 2  ;;  %v3682_v14 = vmax.f32 %v3680_v51, %v3681_v23 }
 0x33c   : > { %v3633_v46 = vmax.f32 %v3631_v55, %v3632_v59  ;;  %v3639_v7 = vrot.slane %v3638_v4, 4  ;;  %v3647_v33 = vmax.f32 %v3645_v37, %v3646_v5  ;;  %v3653_v29 = vrot.slane %v3652_v56, 4 }
 0x33d   : > { %v3587_v27 = vrot.slane %v3586_v21, 1  ;;  %v3600_v13 = vmax.f32 %v3598_v17, %v3599_v41  ;;  %v3670_v63 = vmax.f32 %v3668_v10, %v3669_v24  ;;  %v3683_v53 = vrot.slane %v3682_v14, 2 }
 0x33e   : > { %v3634_v30 = vrot.slane %v3633_v46, 2  ;;  %v3640_v34 = vmax.f32 %v3638_v4, %v3639_v7  ;;  %v3648_v61 = vrot.slane %v3647_v33, 2  ;;  %v3654_v44 = vmax.f32 %v3652_v56, %v3653_v29 }
 0x33f   : > { %v3594_v19 = vrot.slane %v3593_v22, 1  ;;  %v3664_v28 = vrot.slane %v3663_v12, 1  ;;  %v3677_v25 = vmax.f32 %v3675_v35, %v3676_v40  ;;  %v3684_v11 = vmax.f32 %v3682_v14, %v3683_v53 }
 0x340   : > { %v3635_v48 = vmax.f32 %v3633_v46, %v3634_v30  ;;  %v3641_v36 = vrot.slane %v3640_v34, 2  ;;  %v3649_v3 = vmax.f32 %v3647_v33, %v3648_v61  ;;  %v3655_v51 = vrot.slane %v3654_v44, 2 }
 0x341   : > { %v3623_v55 = vmax.f32 %v8301_v32, %v3622_v2  ;;  %v3581_v37 = vmax.f32 %v8312_v62, %v3580_v38  ;;  %v3588_v23 = vmax.f32 %v3586_v21, %v3587_v27  ;;  %v3601_v17 = vrot.slane %v3600_v13, 1 }
 0x342   : > { %v3671_v41 = vrot.slane %v3670_v63, 1  ;;  %v3636_v10 = vrot.slane %v3635_v48, 1  ;;  %v3642_v59 = vmax.f32 %v3640_v34, %v3641_v36  ;;  %v3650_v4 = vrot.slane %v3649_v3, 1 }
 0x343   : > { %v3630_v5 = vmax.f32 %v8310_v31, %v3629_v0  ;;  %v3595_v35 = vmax.f32 %v3593_v22, %v3594_v19  ;;  %v3678_v56 = vrot.slane %v3677_v25, 1  ;;  %v3656_v24 = vmax.f32 %v3654_v44, %v3655_v51 }
 0x344   : > { %v3665_v40 = vmax.f32 %v3663_v12, %v3664_v28  ;;  %v3685_v14 = vrot.slane %v3684_v11, 1  ;;  %v3637_v46 = vmax.f32 %v3635_v48, %v3636_v10  ;;  %v3643_v7 = vrot.slane %v3642_v59, 1 }
 0x345   : > { %v3602_v32 = vmax.f32 %v3600_v13, %v3601_v17  ;;  %v3943_v62 = vsel %vm1592_vm4, %v3581_v37, -inf  ;;  %v3651_v2 = vmax.f32 %v3649_v3, %v3650_v4  ;;  %v3657_v38 = vrot.slane %v3656_v24, 1 }
 0x346   : > { %v3946_v21 = vsel %vm1592_vm4, %v3588_v23, -inf  ;;  %v3672_v33 = vmax.f32 %v3670_v63, %v3671_v41  ;;  %v3644_v29 = vmax.f32 %v3642_v59, %v3643_v7  ;;  %v3944_v27 = vsel %vm1592_vm4, %v3637_v46, -inf }
 0x347   : > { %v3949_v31 = vsel %vm1592_vm4, %v3595_v35, -inf  ;;  %v3679_v0 = vmax.f32 %v3677_v25, %v3678_v56  ;;  %v3658_v22 = vmax.f32 %v3656_v24, %v3657_v38  ;;  %v3950_v12 = vsel %vm1592_vm4, %v3651_v2, -inf }
 0x348   : > { %v3686_v53 = vmax.f32 %v3684_v11, %v3685_v14  ;;  %v3956_v30 = vsel %vm1592_vm4, %v3665_v40, -inf  ;;  %v3947_v13 = vsel %vm1592_vm4, %v3644_v29, -inf  ;;  %v3951_v34 = vmax.f32 %v3949_v31, %v3950_v12 }
 0x349   : > { %v3952_v61 = vsel %vm1592_vm4, %v3602_v32, -inf  ;;  %v3945_v44 = vmax.f32 %v3943_v62, %v3944_v27  ;;  %v3948_v19 = vmax.f32 %v3946_v21, %v3947_v13  ;;  %v3953_v63 = vsel %vm1592_vm4, %v3658_v22, -inf  ;;  %v5661_v21 = vpop.permute.xlu1 %5660 }
 0x34a   : > { %v3955_v48 = vsel %vm1592_vm4, %v8315_v54, -inf  ;;  %v3959_v25 = vsel %vm1592_vm4, %v3672_v33, -inf  ;;  %v3954_v36 = vmax.f32 %v3952_v61, %v3953_v63  ;;  %v3958_v3 = vsel %vm1592_vm4, %v8319_v42, -inf }
 0x34b   : > { %v3957_v51 = vmax.f32 %v3955_v48, %v3956_v30  ;;  %v3962_v37 = vsel %vm1592_vm4, %v3679_v0, -inf  ;;  %v4104_v23 = vsel %vm4055_vm14, %v3948_v19, %v3945_v44  ;;  %v3965_v41 = vsel %vm1592_vm4, %v3686_v53, -inf  ;;  %v5666_v0 = vpop.permute.xlu0 %5665 }
 0x34c   : > { %v5596_v28 = vpop.f32.mrf.mxu0  ;;  %v4105_v10 = vsel %vm4057_vm15, %v3951_v34, %v4104_v23  ;;  %v3961_v4 = vsel %vm1592_vm4, %v3623_v55, -inf  ;;  %v3964_v35 = vsel %vm1592_vm4, %v3630_v5, -inf  ;;  %v3960_v56 = vmax.f32 %v3958_v3, %v3959_v25 }
 0x34d   : > { %v2124_v11 = vmul.f32 %v8298_v49, %v5596_v28  ;;  %v4106_v42 = vsel %vm8854_vm8, %v3954_v36, %v4105_v10  ;;  %v3963_v24 = vmax.f32 %v3961_v4, %v3962_v37  ;;  %v3966_v7 = vmax.f32 %v3964_v35, %v3965_v41  ;;  %v5671_v30 = vpop.permute.xlu1 %5670 }
 0x34e   : > { %v2069_v17 = vpop.f32.mrf.mxu0  ;;  %v4107_v40 = vsel %vm8855_vm9, %v3957_v51, %v4106_v42  ;;  %v5663_v53 = vunpack.i.h.bf16 %v5661_v21  ;;  %v5662_v19 = vunpack.i.l.bf16 %v5661_v21  ;;  %v5668_v25 = vunpack.i.h.bf16 %v5666_v0  ;;  %v5771_v51 = vld [vmem:[#allocation3 + $0x30] sm:$0xff] }
 0x34f   : > { %v2163_v54 = vadd.f32 %v8306_v39, %v2124_v11  ;;  %v2123_v59 = vmul.f32 %v8298_v49, %v2069_v17  ;;  %v4108_v32 = vsel %vm8856_vm10, %v3960_v56, %v4107_v40  ;;  %v5676_v63 = vpop.permute.xlu0 %5675  ;;  %v5667_v23 = vunpack.i.l.bf16 %v5666_v0  ;;  %v5772_v40 = vld [vmem:[#allocation3 + $0x20] sm:$0xff] }
 0x350   : > { %v4109_v62 = vsel %vm8857_vm12, %v3963_v24, %v4108_v32  ;;  %v4603_v37 = vsel %vm1592_vm4, %v5771_v51, %v5663_v53  ;;  %v5673_v17 = vunpack.i.h.bf16 %v5671_v30  ;;  %v5672_v41 = vunpack.i.l.bf16 %v5671_v30 }
 0x351   : > { %v2195_v14 = vmax.f32 %v2163_v54, 0.0  ;;  %v2162_v46 = vadd.f32 %v8306_v39, %v2123_v59  ;;  %v8369_v5 = vsel %vm8858_vm1, %v3966_v7, %v4109_v62  ;;  %v5678_v10 = vunpack.i.h.bf16 %v5676_v63  ;;  %v5681_v4 = vpop.permute.xlu1 %5680 }
 0x352   : > { %4330 = vst.msk [vmem:[#allocation3 + $0x71] sm:$0xff] %vm1592_vm4, %v8369_v5  ;;  %v5683_v30 = vunpack.i.h.bf16 %v5681_v4  ;;  %vm8859_vm8 = vcmask 916480   ;;  %vm8862_vm10 = vcmask 1044484   ;;  %vm8863_vm12 = vcmask 1045509  }
 0x353   : > { %v2723_v2 = vcombine.high %v2195_v14, %v2195_v14  ;;  %v2730_v38 = vrot.slane %v2195_v14, %v6773_v52  ;;  %v2194_v55 = vmax.f32 %v2162_v46, 0.0  ;;  %v4602_v14 = vsel %vm1592_vm4, %v5772_v40, %v5662_v19  ;;  %vm8860_vm9 = vmmov %vm8859_vm8 }
 0x354   : > { %v4611_v46 = vsel %vm1724_vm11, %v4603_v37, %v5668_v25  ;;  %v4610_v62 = vsel %vm1724_vm11, %v4602_v14, %v5667_v23  ;;  %vm8864_vm1 = vcmask 1046534  }
 0x355   : > { %v2737_v33 = vrot.slane %v2723_v2, %v6773_v52  ;;  %v2738_v29 = vcombine.high %v2730_v38, %v2730_v38  ;;  %v3715_v27 = vsel %vm2902_vm13, %v2730_v38, -inf  ;;  %v2713_v31 = vrot.slane %v2194_v55, %v6773_v52 }
 0x356   : > { %v3716_v22 = vrot.slane %v3715_v27, 4  ;;  %v2706_v12 = vcombine.high %v2194_v55, %v2194_v55  ;;  %v5677_v2 = vunpack.i.l.bf16 %v5676_v63  ;;  %v4618_v21 = vsel %vm4292_vm6, %v4610_v62, %v5672_v41 }
 0x357   : > { %v3722_v13 = vsel %vm2902_vm13, %v2738_v29, -inf  ;;  %v3729_v34 = vsel %vm2902_vm13, %v2737_v33, -inf  ;;  %v2739_v61 = vcombine.high %v2737_v33, %v2737_v33  ;;  %v2721_v44 = vcombine.high %v2713_v31, %v2713_v31  ;;  %v5686_v29 = vpop.permute.xlu0 %5685 }
 0x358   : > { %v3717_v28 = vmax.f32 %v3715_v27, %v3716_v22  ;;  %v2720_v48 = vrot.slane %v2706_v12, %v6773_v52  ;;  %v3723_v36 = vrot.slane %v3722_v13, 4  ;;  %v3730_v11 = vrot.slane %v3729_v34, 4 }
 0x359   : > { %v3687_v3 = vsel %vm2902_vm13, %v2713_v31, -inf  ;;  %v3736_v54 = vsel %vm2902_vm13, %v2739_v61, -inf  ;;  %v3694_v59 = vsel %vm2902_vm13, %v2721_v44, -inf  ;;  %v4619_v33 = vsel %vm4292_vm6, %v4611_v46, %v5673_v17  ;;  %v5691_v53 = vpop.permute.xlu1 %5690 }
 0x35a   : > { %v3718_v35 = vrot.slane %v3717_v28, 2  ;;  %v2722_v56 = vcombine.high %v2720_v48, %v2720_v48  ;;  %v3688_v42 = vrot.slane %v3687_v3, 4  ;;  %v3701_v24 = vsel %vm2902_vm13, %v2720_v48, -inf }
 0x35b   : > { %v3724_v7 = vmax.f32 %v3722_v13, %v3723_v36  ;;  %v3731_v32 = vmax.f32 %v3729_v34, %v3730_v11  ;;  %v3737_v38 = vrot.slane %v3736_v54, 4  ;;  %v3695_v55 = vrot.slane %v3694_v59, 4 }
 0x35c   : > { %v3702_v27 = vrot.slane %v3701_v24, 4  ;;  %v4627_v31 = vsel %vm4294_vm5, %v4619_v33, %v5678_v10  ;;  %v3719_v0 = vmax.f32 %v3717_v28, %v3718_v35  ;;  %v3689_v22 = vmax.f32 %v3687_v3, %v3688_v42  ;;  %v8398_v10 = vld [vmem:[#allocation3 + $0x70] sm:$0xff]  ;;  %v4347_v42 = vld [vmem:[#allocation3 + $0x78] sm:$0x3] }
 0x35d   : > { %v3708_v12 = vsel %vm2902_vm13, %v2722_v56, -inf  ;;  %v5682_v13 = vunpack.i.l.bf16 %v5681_v4  ;;  %v3725_v34 = vrot.slane %v3724_v7, 2  ;;  %v3732_v61 = vrot.slane %v3731_v32, 2 }
 0x35e   : > { %v4626_v44 = vsel %vm4294_vm5, %v4618_v21, %v5677_v2  ;;  %v3738_v19 = vmax.f32 %v3736_v54, %v3737_v38  ;;  %v5687_v63 = vunpack.i.l.bf16 %v5686_v29  ;;  %v3696_v48 = vmax.f32 %v3694_v59, %v3695_v55 }
 0x35f   : > { %v3703_v25 = vmax.f32 %v3701_v24, %v3702_v27  ;;  %v3709_v36 = vrot.slane %v3708_v12, 4  ;;  %v5692_v11 = vunpack.i.l.bf16 %v5691_v53  ;;  %v5599_v51 = vpop.f32.mrf.mxu0  ;;  %v3720_v37 = vrot.slane %v3719_v0, 1 }
 0x360   : > { %v3690_v23 = vrot.slane %v3689_v22, 2  ;;  %v8392_v28 = vmax.f32 %v3724_v7, %v3725_v34  ;;  %v8394_v3 = vmax.f32 %v3731_v32, %v3732_v61  ;;  %v4634_v17 = vsel %vm4296_vm7, %v4626_v44, %v5682_v13 }
 0x361   : > { %v4635_v41 = vsel %vm4296_vm7, %v4627_v31, %v5683_v30  ;;  %v3739_v4 = vrot.slane %v3738_v19, 2  ;;  %v5688_v54 = vunpack.i.h.bf16 %v5686_v29  ;;  %v3697_v35 = vrot.slane %v3696_v48, 2  ;;  %v2079_v56 = vpop.f32.mrf.mxu0 }
 0x362   : > { %v4642_v59 = vsel %vm4298_vm0, %v4634_v17, %v5687_v63  ;;  %v3704_v24 = vrot.slane %v3703_v25, 2  ;;  %v3710_v40 = vmax.f32 %v3708_v12, %v3709_v36  ;;  %v5693_v14 = vunpack.i.h.bf16 %v5691_v53 }
 0x363   : > { %v4650_v46 = vsel %vm8859_vm8, %v4642_v59, %v5692_v11  ;;  %v8402_v7 = vmax.f32 %v3719_v0, %v3720_v37  ;;  %v8404_v32 = vmax.f32 %v3689_v22, %v3690_v23  ;;  %v2126_v62 = vmul.f32 %v8298_v49, %v5599_v51 }
 0x364   : > { %4765 = vmatmul.mubr.f32.gmra.mxu1 %v4650_v46  ;;  %v5719_v2 = vpack.i.bf16 %v8398_v10, %v8273_v9  ;;  %v2125_v38 = vmul.f32 %v8298_v49, %v2079_v56  ;;  %v4389_v55 = vrot.slane %v8398_v10, 1  ;;  %v4390_v21 = vrot.slane %v4347_v42, 1 }
 0x365   : > { %5495 = vmatprep.mubr.msk.f32.mxu1 %vm1592_vm4, %v8197_v58  ;;  %v4437_v33 = vrot.slane %v8398_v10, 2  ;;  %v8414_v29 = vmax.f32 %v3696_v48, %v3697_v35  ;;  %v4643_v27 = vsel %vm4298_vm0, %v4635_v41, %v5688_v54  ;;  %v2165_v31 = vadd.f32 %v8306_v39, %v2126_v62 }
 0x366   : > { %5720 = vrot.lane.b32.xlu1 %v5719_v2, %s5797_s30  ;;  %v4438_v0 = vrot.slane %v4347_v42, 2  ;;  %v3711_v9 = vrot.slane %v3710_v40, 2  ;;  %v4651_v22 = vsel %vm8860_vm9, %v4643_v27, %v5693_v14  ;;  %v2164_v58 = vadd.f32 %v8306_v39, %v2125_v38 }
 0x367   : > { %v8422_v49 = vsel %vm538_vm3, %v4389_v55, %v4390_v21  ;;  %v3727_v12 = vrot.slane %v8392_v28, 1  ;;  %v2197_v53 = vmax.f32 %v2165_v31, 0.0  ;;  %v3734_v13 = vrot.slane %v8394_v3, 1 }
 0x368   : > { %4770 = vmatmul.mubr.f32.gmra.mxu1 %v4651_v22  ;;  %v5724_v30 = vpack.i.bf16 %v8422_v49, %v8283_v26  ;;  %v8428_v34 = vmax.f32 %v3738_v19, %v3739_v4  ;;  %v2196_v61 = vmax.f32 %v2164_v58, 0.0  ;;  %v8433_v39 = vsel %vm715_vm2, %v4437_v33, %v4438_v0 }
 0x369   : > { %5496 = vmatprep.mubr.msk.f32.mxu1 %vm1592_vm4, %v8288_v1  ;;  %v3692_v44 = vrot.slane %v8404_v32, 1  ;;  %v8436_v63 = vmax.f32 %v3703_v25, %v3704_v24  ;;  %v2757_v48 = vcombine.high %v2197_v53, %v2197_v53  ;;  %v2764_v36 = vrot.slane %v2197_v53, %v6773_v52 }
 0x36a   : > { %5725 = vrot.lane.b32.xlu0 %v5724_v30, %s5798_s10  ;;  %5730 = vrot.lane.b32.xlu1 %v5724_v30, %s5788_s15  ;;  %v3699_v26 = vrot.slane %v8414_v29, 1  ;;  %v8442_v19 = vmax.f32 %v3710_v40, %v3711_v9  ;;  %v2740_v11 = vcombine.high %v2196_v61, %v2196_v61  ;;  %v2747_v51 = vrot.slane %v2196_v61, %v6773_v52 }
 0x36b   : > { %v2771_v37 = vrot.slane %v2757_v48, %v6773_v52  ;;  %v2772_v23 = vcombine.high %v2764_v36, %v2764_v36  ;;  %v3771_v25 = vsel %vm2902_vm13, %v2764_v36, -inf  ;;  %v5734_v17 = vpack.i.bf16 %v8433_v39, %v8288_v1 }
 0x36c   : > { %v3772_v41 = vrot.slane %v3771_v25, 4  ;;  %v2754_v4 = vrot.slane %v2740_v11, %v6773_v52  ;;  %v2755_v54 = vcombine.high %v2747_v51, %v2747_v51  ;;  %v3743_v35 = vsel %vm2902_vm13, %v2747_v51, -inf }
 0x36d   : > { %v2773_v59 = vcombine.high %v2771_v37, %v2771_v37  ;;  %v3778_v56 = vsel %vm2902_vm13, %v2772_v23, -inf  ;;  %v3785_v42 = vsel %vm2902_vm13, %v2771_v37, -inf  ;;  %v3744_v24 = vrot.slane %v3743_v35, 4 }
 0x36e   : > { %5735 = vrot.lane.b32.xlu0 %v5734_v17, %s5792_s9  ;;  %v3773_v40 = vmax.f32 %v3771_v25, %v3772_v41  ;;  %v3779_v14 = vrot.slane %v3778_v56, 4  ;;  %v3786_v46 = vrot.slane %v3785_v42, 4  ;;  %v2756_v62 = vcombine.high %v2754_v4, %v2754_v4 }
 0x36f   : > { %v3792_v1 = vsel %vm2902_vm13, %v2773_v59, -inf  ;;  %v3745_v2 = vmax.f32 %v3743_v35, %v3744_v24  ;;  %v3750_v38 = vsel %vm2902_vm13, %v2755_v54, -inf  ;;  %v3757_v55 = vsel %vm2902_vm13, %v2754_v4, -inf }
 0x370   : > { %v3774_v21 = vrot.slane %v3773_v40, 2  ;;  %v3780_v33 = vmax.f32 %v3778_v56, %v3779_v14  ;;  %v3787_v27 = vmax.f32 %v3785_v42, %v3786_v46  ;;  %v3793_v31 = vrot.slane %v3792_v1, 4 }
 0x371   : > { %v3746_v0 = vrot.slane %v3745_v2, 2  ;;  %v3751_v9 = vrot.slane %v3750_v38, 4  ;;  %v3758_v22 = vrot.slane %v3757_v55, 4  ;;  %v3764_v58 = vsel %vm2902_vm13, %v2756_v62, -inf }
 0x372   : > { %v3775_v53 = vmax.f32 %v3773_v40, %v3774_v21  ;;  %v3781_v30 = vrot.slane %v3780_v33, 2  ;;  %v3788_v61 = vrot.slane %v3787_v27, 2  ;;  %v3794_v48 = vmax.f32 %v3792_v1, %v3793_v31 }
 0x373   : > { %v3747_v36 = vmax.f32 %v3745_v2, %v3746_v0  ;;  %v3752_v11 = vmax.f32 %v3750_v38, %v3751_v9  ;;  %v3759_v51 = vmax.f32 %v3757_v55, %v3758_v22  ;;  %v3765_v37 = vrot.slane %v3764_v58, 4 }
 0x374   : > { %v3706_v23 = vrot.slane %v8436_v63, 1  ;;  %v3782_v25 = vmax.f32 %v3780_v33, %v3781_v30  ;;  %v3789_v17 = vmax.f32 %v3787_v27, %v3788_v61  ;;  %v3795_v41 = vrot.slane %v3794_v48, 2 }
 0x375   : > { %v3748_v4 = vrot.slane %v3747_v36, 1  ;;  %v3753_v54 = vrot.slane %v3752_v11, 2  ;;  %v3760_v35 = vrot.slane %v3759_v51, 2  ;;  %v3766_v59 = vmax.f32 %v3764_v58, %v3765_v37 }
 0x376   : > { %v3693_v56 = vmax.f32 %v8404_v32, %v3692_v44  ;;  %v3713_v42 = vrot.slane %v8442_v19, 1  ;;  %v3776_v24 = vrot.slane %v3775_v53, 1  ;;  %v3796_v40 = vmax.f32 %v3794_v48, %v3795_v41 }
 0x377   : > { %v3749_v14 = vmax.f32 %v3747_v36, %v3748_v4  ;;  %v3754_v46 = vmax.f32 %v3752_v11, %v3753_v54  ;;  %v3761_v62 = vmax.f32 %v3759_v51, %v3760_v35  ;;  %v3767_v1 = vrot.slane %v3766_v59, 2 }
 0x378   : > { %v3700_v2 = vmax.f32 %v8414_v29, %v3699_v26  ;;  %v3707_v38 = vmax.f32 %v8436_v63, %v3706_v23  ;;  %v3783_v55 = vrot.slane %v3782_v25, 1  ;;  %v3790_v21 = vrot.slane %v3789_v17, 1 }
 0x379   : > { %v3797_v33 = vrot.slane %v3796_v40, 1  ;;  %v3755_v27 = vrot.slane %v3754_v46, 1  ;;  %v3762_v31 = vrot.slane %v3761_v62, 1  ;;  %v3768_v0 = vmax.f32 %v3766_v59, %v3767_v1 }
 0x37a   : > { %v3728_v32 = vmax.f32 %v8392_v28, %v3727_v12  ;;  %v3741_v44 = vrot.slane %v8428_v34, 1  ;;  %v3714_v9 = vmax.f32 %v8442_v19, %v3713_v42  ;;  %v3967_v22 = vsel %vm1592_vm4, %v3693_v56, -inf }
 0x37b   : > { %v3777_v58 = vmax.f32 %v3775_v53, %v3776_v24  ;;  %v3756_v29 = vmax.f32 %v3754_v46, %v3755_v27  ;;  %v3763_v26 = vmax.f32 %v3761_v62, %v3762_v31  ;;  %v3968_v63 = vsel %vm1592_vm4, %v3749_v14, -inf }
 0x37c   : > { %v3970_v30 = vsel %vm1592_vm4, %v3700_v2, -inf  ;;  %v3973_v61 = vsel %vm1592_vm4, %v3707_v38, -inf  ;;  %v3784_v48 = vmax.f32 %v3782_v25, %v3783_v55  ;;  %v3769_v36 = vrot.slane %v3768_v0, 1 }
 0x37d   : > { %v3791_v11 = vmax.f32 %v3789_v17, %v3790_v21  ;;  %v3798_v51 = vmax.f32 %v3796_v40, %v3797_v33  ;;  %v3971_v28 = vsel %vm1592_vm4, %v3756_v29, -inf  ;;  %v3974_v12 = vsel %vm1592_vm4, %v3763_v26, -inf }
 0x37e   : > { %v3770_v19 = vmax.f32 %v3768_v0, %v3769_v36  ;;  %v3969_v37 = vmax.f32 %v3967_v22, %v3968_v63  ;;  %v3972_v23 = vmax.f32 %v3970_v30, %v3971_v28  ;;  %v3975_v53 = vmax.f32 %v3973_v61, %v3974_v12 }
 0x37f   : > { %v3735_v41 = vmax.f32 %v8394_v3, %v3734_v13  ;;  %v3742_v4 = vmax.f32 %v8428_v34, %v3741_v44  ;;  %v3980_v54 = vsel %vm1592_vm4, %v3777_v58, -inf  ;;  %v3976_v25 = vsel %vm1592_vm4, %v3714_v9, -inf }
 0x380   : > { %v3983_v17 = vsel %vm1592_vm4, %v3784_v48, -inf  ;;  %v3977_v35 = vsel %vm1592_vm4, %v3770_v19, -inf  ;;  %v4111_v59 = vsel %vm4055_vm14, %v3972_v23, %v3969_v37  ;;  %v3979_v56 = vsel %vm1592_vm4, %v8402_v7, -inf }
 0x381   : > { %v3986_v42 = vsel %vm1592_vm4, %v3791_v11, -inf  ;;  %v3978_v24 = vmax.f32 %v3976_v25, %v3977_v35  ;;  %v4112_v3 = vsel %vm4057_vm15, %v3975_v53, %v4111_v59  ;;  %v3982_v13 = vsel %vm1592_vm4, %v3728_v32, -inf  ;;  %v8555_v35 = vld [vmem:[#allocation3 + $0x98] sm:$0x3] }
 0x382   : > { %v3981_v34 = vmax.f32 %v3979_v56, %v3980_v54  ;;  %v3989_v40 = vsel %vm1592_vm4, %v3798_v51, -inf  ;;  %v3985_v14 = vsel %vm1592_vm4, %v3735_v41, -inf  ;;  %v3984_v46 = vmax.f32 %v3982_v13, %v3983_v17  ;;  %v8572_v13 = vld [vmem:[%s8779_s5] ss:$0 sm:$0xff] }
 0x383   : > { %vm8861_vm13 = vcmask 1043459   ;;  %v5799_v1 = vmov 1934713408   ;;  %v3988_v38 = vsel %vm1592_vm4, %v3742_v4, -inf  ;;  %v3987_v7 = vmax.f32 %v3985_v14, %v3986_v42 }
 0x384   : > { %v4113_v62 = vsel %vm8861_vm13, %v3978_v24, %v4112_v3  ;;  %v4193_v2 = vunpack.c.l.s4 %v5799_v1  ;;  %v3990_v21 = vmax.f32 %v3988_v38, %v3989_v40  ;;  %v4158_v31 = vcombine.low %v8142_v20, %v8369_v5  ;;  %v8579_v40 = vld [vmem:[%s8780_s6] ss:$0 sm:$0xff]  ;;  %vm8866_vm9 = vmmov %vm8861_vm13 }
 0x385   : > { %v4114_v55 = vsel %vm8862_vm10, %v3981_v34, %v4113_v62  ;;  %v4159_v0 = vcombine.high %v8142_v20, %v8369_v5  ;;  %vm8865_vm8 = vcmask 1047559   ;;  %v4571_v42 = vrot.slane %v8555_v35, 1 }
 0x386   : > { %v4115_v33 = vsel %vm8863_vm12, %v3984_v46, %v4114_v55  ;;  %v4194_v44 = vunpack.c.0.s8 %v4193_v2  ;;  %v4166_v58 = vrot.slane %v4158_v31, %v6773_v52  ;;  %vm8867_vm13 = vcmask 916480  }
 0x387   : > { %v4116_v27 = vsel %vm8864_vm1, %v3987_v7, %v4115_v33  ;;  %v4173_v26 = vrot.slane %v4159_v0, %v6773_v52  ;;  %vm8868_vm10 = vmmov %vm8867_vm13 }
 0x388   : > { %v4117_v32 = vsel %vm8865_vm8, %v3990_v21, %v4116_v27  ;;  %v8508_v30 = vsub.s32 %v4194_v44, %v6754_v18  ;;  %vm8869_vm12 = vmmov %vm8868_vm10 }
 0x389   : > { %4331 = vst.msk [vmem:[#allocation3 + $0x81] sm:$0xff] %vm1592_vm4, %v4117_v32  ;;  %v4174_v9 = vcombine.low %v8258_v6, %v4117_v32  ;;  %v4175_v22 = vcombine.high %v8258_v6, %v4117_v32 }
 0x38a   : > { %v8522_v18 = vrot.slane %v4190_v16, %v8508_v30  ;;  %v4205_v19 = vrot.slane %v4191_v50, %v8508_v30  ;;  %v4214_v37 = vrot.slane %v4206_v57, %v8508_v30  ;;  %v8537_v16 = vrot.slane %v4207_v43, %v8508_v30  ;;  %v8553_v43 = vld [vmem:[#allocation3 + $0x90] sm:$0xff] }
 0x38b   : > { %v4182_v29 = vrot.slane %v4174_v9, %v6773_v52  ;;  %v4189_v63 = vrot.slane %v4175_v22, %v6773_v52 }
 0x38d   : > { %v4222_v20 = vcombine.low %v4166_v58, %v4182_v29  ;;  %v4223_v5 = vcombine.high %v4166_v58, %v4182_v29  ;;  %v4238_v61 = vcombine.low %v4173_v26, %v4189_v63  ;;  %v4239_v48 = vcombine.high %v4173_v26, %v4189_v63 }
 0x38f   : > { %v8511_v36 = vrot.slane %v4222_v20, %v8508_v30  ;;  %v4237_v6 = vrot.slane %v4223_v5, %v8508_v30  ;;  %v4246_v11 = vrot.slane %v4238_v61, %v8508_v30  ;;  %v8516_v51 = vrot.slane %v4239_v48, %v8508_v30 }
 0x390   : > { %v4348_v28 = vld [vmem:[#allocation3 + $0x80] sm:$0xff]  ;;  %v4349_v12 = vld [vmem:[#allocation3 + $0x88] sm:$0x3] }
 0x391   : > { %v5739_v23 = vpack.i.bf16 %v4348_v28, %v8398_v10  ;;  %v4490_v53 = vrot.slane %v4348_v28, 1  ;;  %v4491_v41 = vrot.slane %v4349_v12, 1  ;;  %v4255_v4 = vcombine.high %v8522_v18, %v8511_v36 }
 0x392   : > { %v4256_v60 = vcombine.low %v4205_v19, %v4237_v6  ;;  %v4257_v47 = vcombine.high %v4205_v19, %v4237_v6  ;;  %v4258_v57 = vcombine.low %v4214_v37, %v4246_v11  ;;  %v4259_v54 = vcombine.high %v4214_v37, %v4246_v11 }
 0x393   : > { %5740 = vrot.lane.b32.xlu1 %v5739_v23, %s5794_s16  ;;  %v4492_v50 = vsel %vm538_vm3, %v4490_v53, %v4491_v41  ;;  %v4260_v25 = vcombine.low %v8537_v16, %v8516_v51  ;;  %v4261_v15 = vcombine.high %v8537_v16, %v8516_v51  ;;  %v4254_v45 = vcombine.low %v8522_v18, %v8511_v36 }
 0x394   : > { %v5744_v17 = vpack.i.bf16 %v4492_v50, %v8422_v49  ;;  %v4517_v59 = vrot.slane %v4348_v28, 2  ;;  %v4518_v56 = vrot.slane %v4349_v12, 2  ;;  %v4570_v49 = vrot.slane %v8553_v43, 1 }
 0x396   : > { %5745 = vrot.lane.b32.xlu0 %v5744_v17, %s5795_s17  ;;  %v8562_v24 = vsel %vm715_vm2, %v4517_v59, %v4518_v56  ;;  %v4572_v3 = vsel %vm538_vm3, %v4570_v49, %v4571_v42  ;;  %vm5009_vm3 = vcmask 254976  }
 0x397   : > { %4532 = vrot.lane.b32.xlu1 %v8433_v39, %s5796_s21 }
 0x39a   : > { %4557 = vrot.lane.b32.xlu0 %v4348_v28, %s5797_s30 }
 0x39b   : > { %4585 = vrot.lane.b32.xlu1 %v4492_v50, %s5798_s10 }
 0x39e   : > { %4534 = vrot.lane.b32.xlu0 %v8562_v24, %s5796_s21 }
 0x39f   : > { %4559 = vrot.lane.b32.xlu1 %v8553_v43, %s5797_s30 }
 0x3a1   : > { %v4756_v34 = vpop.f32.mrf.mxu1 }
 0x3a2   : > { %4587 = vrot.lane.b32.xlu0 %v4572_v3, %s5798_s10  ;;  %v4802_v14 = vmul.f32 %v8572_v13, %v4756_v34 }
 0x3a3   : > { %4263 = vrot.lane.b32.xlu1 %v4255_v4, %s5788_s15  ;;  %v4758_v46 = vpop.f32.mrf.mxu1  ;;  %s5455_s15 = sshll.u32 %s8876_s28, 3 }
 0x3a4   : > { %v4817_v62 = vadd.f32 %v8579_v40, %v4802_v14  ;;  %s310_s29 = scalar_lea.vmem %s8781_s7, %s5455_s15 }
 0x3a5   : > { %v4761_v1 = vpop.f32.mrf.mxu1 }
 0x3a6   : > { %4267 = vrot.lane.b32.xlu0 %v4256_v60, %s5792_s9  ;;  %v4825_v2 = vmax.f32 %v4817_v62, 0.0  ;;  %v4803_v38 = vmul.f32 %v8572_v13, %v4761_v1 }
 0x3a7   : > { %4271 = vrot.lane.b32.xlu1 %v4257_v47, %s5794_s16  ;;  %v4763_v7 = vpop.f32.mrf.mxu1 }
 0x3a8   : > { %v4841_v55 = vcombine.high %v4825_v2, %v4825_v2  ;;  %v4848_v21 = vrot.slane %v4825_v2, %v6773_v52  ;;  %v4818_v33 = vadd.f32 %v8579_v40, %v4803_v38 }
 0x3aa   : > { %4275 = vrot.lane.b32.xlu0 %v4258_v57, %s5795_s17  ;;  %v4855_v27 = vrot.slane %v4841_v55, %v6773_v52  ;;  %v4856_v31 = vcombine.high %v4848_v21, %v4848_v21  ;;  %v5010_v0 = vsel %vm5009_vm3, %v4848_v21, -inf  ;;  %v4826_v32 = vmax.f32 %v4818_v33, 0.0 }
 0x3ab   : > { %4279 = vrot.lane.b32.xlu1 %v4259_v54, %s5796_s21  ;;  %v5011_v44 = vrot.slane %v5010_v0, 4 }
 0x3ac   : > { %v4857_v9 = vcombine.high %v4855_v27, %v4855_v27  ;;  %v5017_v22 = vsel %vm5009_vm3, %v4856_v31, -inf  ;;  %v5024_v58 = vsel %vm5009_vm3, %v4855_v27, -inf  ;;  %v4858_v29 = vcombine.high %v4826_v32, %v4826_v32 }
 0x3ad   : > { %v5012_v26 = vmax.f32 %v5010_v0, %v5011_v44  ;;  %v5018_v63 = vrot.slane %v5017_v22, 4  ;;  %v5025_v20 = vrot.slane %v5024_v58, 4  ;;  %v4865_v5 = vrot.slane %v4826_v32, %v6773_v52 }
 0x3ae   : > { %v5031_v61 = vsel %vm5009_vm3, %v4857_v9, -inf  ;;  %v4872_v48 = vrot.slane %v4858_v29, %v6773_v52 }
 0x3af   : > { %4283 = vrot.lane.b32.xlu1 %v4260_v25, %s5797_s30  ;;  %v5013_v6 = vrot.slane %v5012_v26, 2  ;;  %v5019_v11 = vmax.f32 %v5017_v22, %v5018_v63  ;;  %v5026_v51 = vmax.f32 %v5024_v58, %v5025_v20  ;;  %v5032_v28 = vrot.slane %v5031_v61, 4 }
 0x3b0   : > { %v4873_v12 = vcombine.high %v4865_v5, %v4865_v5  ;;  %v4874_v19 = vcombine.high %v4872_v48, %v4872_v48  ;;  %v5038_v37 = vsel %vm5009_vm3, %v4865_v5, -inf  ;;  %v5052_v23 = vsel %vm5009_vm3, %v4872_v48, -inf }
 0x3b1   : > { %v5014_v53 = vmax.f32 %v5012_v26, %v5013_v6  ;;  %v5020_v41 = vrot.slane %v5019_v11, 2  ;;  %v5027_v16 = vrot.slane %v5026_v51, 2  ;;  %v5033_v4 = vmax.f32 %v5031_v61, %v5032_v28 }
 0x3b2   : > { %v5039_v60 = vrot.slane %v5038_v37, 4  ;;  %v5045_v47 = vsel %vm5009_vm3, %v4873_v12, -inf  ;;  %v5053_v50 = vrot.slane %v5052_v23, 4  ;;  %v5059_v57 = vsel %vm5009_vm3, %v4874_v19, -inf }
 0x3b3   : > { %4287 = vrot.lane.b32.xlu1 %v4261_v15, %s5798_s10  ;;  %v5021_v54 = vmax.f32 %v5019_v11, %v5020_v41  ;;  %v5028_v25 = vmax.f32 %v5026_v51, %v5027_v16  ;;  %v5034_v17 = vrot.slane %v5033_v4, 2  ;;  %v5046_v56 = vrot.slane %v5045_v47, 4  ;;  %s5456_s10 = sshll.u32 %s8876_s28, 2 }
 0x3b4   : > { %v5040_v59 = vmax.f32 %v5038_v37, %v5039_v60  ;;  %v5054_v49 = vmax.f32 %v5052_v23, %v5053_v50  ;;  %v5060_v42 = vrot.slane %v5059_v57, 4  ;;  %v5015_v3 = vrot.slane %v5014_v53, 1  ;;  %v5696_v50 = vpop.permute.xlu0 %5695  ;;  %s314_s19 = scalar_lea.vmem %s8782_s8, %s5456_s10 }
 0x3b5   : > { %v5029_v34 = vrot.slane %v5028_v25, 1  ;;  %v5035_v15 = vmax.f32 %v5033_v4, %v5034_v17  ;;  %v5047_v46 = vmax.f32 %v5045_v47, %v5046_v56  ;;  %v5022_v2 = vrot.slane %v5021_v54, 1 }
 0x3b6   : > { %v5041_v14 = vrot.slane %v5040_v59, 2  ;;  %v5055_v62 = vrot.slane %v5054_v49, 2  ;;  %v5061_v1 = vmax.f32 %v5059_v57, %v5060_v42  ;;  %v5016_v27 = vmax.f32 %v5014_v53, %v5015_v3  ;;  %v5701_v57 = vpop.permute.xlu1 %5700 }
 0x3b7   : > { %v5036_v38 = vrot.slane %v5035_v15, 1  ;;  %v5048_v55 = vrot.slane %v5047_v46, 2  ;;  %v5030_v31 = vmax.f32 %v5028_v25, %v5029_v34  ;;  %v5023_v22 = vmax.f32 %v5021_v54, %v5022_v2  ;;  %v5773_v34 = vld [vmem:[#allocation3 + $0x40] sm:$0xff] }
 0x3b8   : > { %v5042_v7 = vmax.f32 %v5040_v59, %v5041_v14  ;;  %v5056_v21 = vmax.f32 %v5054_v49, %v5055_v62  ;;  %v5062_v33 = vrot.slane %v5061_v1, 2  ;;  %v5234_v5 = vsel %vm1724_vm11, %v5016_v27, -inf  ;;  %v5706_v54 = vpop.permute.xlu0 %5705 }
 0x3b9   : > { %v5049_v32 = vmax.f32 %v5047_v46, %v5048_v55  ;;  %v5037_v58 = vmax.f32 %v5035_v15, %v5036_v38  ;;  %v5240_v61 = vsel %vm1724_vm11, %v5030_v31, -inf  ;;  %v5237_v19 = vsel %vm1724_vm11, %v5023_v22, -inf }
 0x3ba   : > { %v5043_v0 = vrot.slane %v5042_v7, 1  ;;  %v5057_v44 = vrot.slane %v5056_v21, 1  ;;  %v5063_v9 = vmax.f32 %v5061_v1, %v5062_v33  ;;  %v5697_v25 = vunpack.i.l.bf16 %v5696_v50  ;;  %v5711_v17 = vpop.permute.xlu1 %5710  ;;  %v5774_v33 = vld [vmem:[#allocation3 + $0x50] sm:$0xff] }
 0x3bb   : > { %v5050_v26 = vrot.slane %v5049_v32, 1  ;;  %v5243_v37 = vsel %vm1724_vm11, %v5037_v58, -inf  ;;  %v5702_v59 = vunpack.i.l.bf16 %v5701_v57  ;;  %v5707_v56 = vunpack.i.l.bf16 %v5706_v54 }
 0x3bc   : > { %v5044_v29 = vmax.f32 %v5042_v7, %v5043_v0  ;;  %v5058_v63 = vmax.f32 %v5056_v21, %v5057_v44  ;;  %v5064_v20 = vrot.slane %v5063_v9, 1  ;;  %v5712_v49 = vunpack.i.l.bf16 %v5711_v17  ;;  %v5716_v42 = vpop.permute.xlu0 %5715 }
 0x3bd   : > { %v5051_v48 = vmax.f32 %v5049_v32, %v5050_v26  ;;  %v5698_v3 = vunpack.i.h.bf16 %v5696_v50  ;;  %v4604_v15 = vsel %vm1592_vm4, %v5773_v34, %v5697_v25  ;;  %v5703_v14 = vunpack.i.h.bf16 %v5701_v57 }
 0x3be   : > { %v5065_v6 = vmax.f32 %v5063_v9, %v5064_v20  ;;  %v5235_v11 = vsel %vm1724_vm11, %v5044_v29, -inf  ;;  %v5241_v51 = vsel %vm1724_vm11, %v5058_v63, -inf  ;;  %v4612_v46 = vsel %vm1724_vm11, %v4604_v15, %v5702_v59 }
 0x3bf   : > { %v5236_v28 = vmax.f32 %v5234_v5, %v5235_v11  ;;  %v5242_v12 = vmax.f32 %v5240_v61, %v5241_v51  ;;  %v5238_v23 = vsel %vm1724_vm11, %v5051_v48, -inf  ;;  %v5708_v1 = vunpack.i.h.bf16 %v5706_v54 }
 0x3c0   : > { %v5244_v53 = vsel %vm1724_vm11, %v5065_v6, -inf  ;;  %v5239_v41 = vmax.f32 %v5237_v19, %v5238_v23  ;;  %v4620_v2 = vsel %vm4292_vm6, %v4612_v46, %v5707_v56  ;;  %v5717_v38 = vunpack.i.l.bf16 %v5716_v42  ;;  %v5775_v23 = vld [vmem:[#allocation3 + $0x60] sm:$0xff] }
 0x3c1   : > { %v5245_v16 = vmax.f32 %v5243_v37, %v5244_v53  ;;  %v5713_v7 = vunpack.i.h.bf16 %v5711_v17  ;;  %v4628_v55 = vsel %vm4294_vm5, %v4620_v2, %v5712_v49  ;;  %v4605_v27 = vsel %vm1592_vm4, %v5774_v33, %v5698_v3 }
 0x3c2   : > { %v5298_v4 = vsel %vm4055_vm14, %v5239_v41, %v5236_v28  ;;  %v4613_v31 = vsel %vm1724_vm11, %v4605_v27, %v5703_v14  ;;  %v5718_v44 = vunpack.i.h.bf16 %v5716_v42  ;;  %v4636_v22 = vsel %vm4296_vm7, %v4628_v55, %v5717_v38 }
 0x3c3   : > { %v5299_v60 = vsel %vm4057_vm15, %v5242_v12, %v5298_v4  ;;  %v4621_v32 = vsel %vm4292_vm6, %v4613_v31, %v5708_v1  ;;  %v4597_v37 = vrot.slane %v8553_v43, 2  ;;  %v4598_v50 = vrot.slane %v8555_v35, 2 }
 0x3c4   : > { %v8614_v47 = vsel %vm8866_vm9, %v5245_v16, %v5299_v60  ;;  %v4629_v58 = vsel %vm4294_vm5, %v4621_v32, %v5713_v7 }
 0x3c5   : > { %v4637_v5 = vsel %vm4296_vm7, %v4629_v58, %v5718_v44  ;;  %v4599_v3 = vsel %vm715_vm2, %v4597_v37, %v4598_v50  ;;  %vm8870_vm2 = vmmov %vm8868_vm10 }
 0x3d8   : > { %v5721_v62 = vpop.permute.xlu1 %5720 }
 0x3d9   : > { %v5722_v21 = vunpack.i.l.bf16 %v5721_v62  ;;  %v5723_v29 = vunpack.i.h.bf16 %v5721_v62 }
 0x3db   : > { %v4644_v26 = vsel %vm4298_vm0, %v4636_v22, %v5722_v21  ;;  %v4645_v61 = vsel %vm4298_vm0, %v4637_v5, %v5723_v29 }
 0x3dc   : > { %v5726_v0 = vpop.permute.xlu0 %5725  ;;  %v5731_v6 = vpop.permute.xlu1 %5730 }
 0x3dd   : > { %v5727_v9 = vunpack.i.l.bf16 %v5726_v0  ;;  %v5728_v63 = vunpack.i.h.bf16 %v5726_v0  ;;  %v5732_v51 = vunpack.i.l.bf16 %v5731_v6  ;;  %v5733_v41 = vunpack.i.h.bf16 %v5731_v6 }
 0x3df   : > { %v4652_v20 = vsel %vm8867_vm13, %v4644_v26, %v5727_v9  ;;  %v4653_v48 = vsel %vm8868_vm10, %v4645_v61, %v5728_v63  ;;  %v4607_v56 = vsel %vm1592_vm4, %v8398_v10, %v5733_v41 }
 0x3e0   : > { %4775 = vmatmul.mubr.f32.gmra.mxu1 %v4652_v20  ;;  %v5736_v11 = vpop.permute.xlu0 %5735 }
 0x3e1   : > { %5497 = vmatprep.mubr.msk.f32.mxu1 %vm1592_vm4, %v8433_v39  ;;  %v5737_v28 = vunpack.i.l.bf16 %v5736_v11  ;;  %v4606_v39 = vsel %vm1592_vm4, %v5775_v23, %v5732_v51 }
 0x3e3   : > { %v4614_v16 = vsel %vm1724_vm11, %v4606_v39, %v5737_v28 }
 0x3e4   : > { %4780 = vmatmul.mubr.f32.gmra.mxu1 %v4653_v48 }
 0x3e5   : > { %5498 = vmatprep.mubr.msk.f32.mxu1 %vm1592_vm4, %v8562_v24  ;;  %v5738_v24 = vunpack.i.h.bf16 %v5736_v11 }
 0x3e7   : > { %v4615_v35 = vsel %vm1724_vm11, %v4607_v56, %v5738_v24 }
 0x405   : > { %v5741_v12 = vpop.permute.xlu1 %5740 }
 0x406   : > { %v5742_v19 = vunpack.i.l.bf16 %v5741_v12  ;;  %v5743_v54 = vunpack.i.h.bf16 %v5741_v12 }
 0x408   : > { %v5746_v53 = vpop.permute.xlu0 %5745  ;;  %v4622_v57 = vsel %vm4292_vm6, %v4614_v16, %v5742_v19  ;;  %v4623_v15 = vsel %vm4292_vm6, %v4615_v35, %v5743_v54 }
 0x409   : > { %v5747_v4 = vunpack.i.l.bf16 %v5746_v53  ;;  %v4533_v60 = vpop.permute.xlu1 %4532  ;;  %v5748_v17 = vunpack.i.h.bf16 %v5746_v53 }
 0x40b   : > { %v4630_v25 = vsel %vm4294_vm5, %v4622_v57, %v5747_v4  ;;  %v4631_v46 = vsel %vm4294_vm5, %v4623_v15, %v5748_v17 }
 0x40c   : > { %v4638_v43 = vsel %vm4296_vm7, %v4630_v25, %v4533_v60  ;;  %v4558_v59 = vpop.permute.xlu0 %4557 }
 0x40d   : > { %v4646_v49 = vsel %vm4298_vm0, %v4638_v43, %v4558_v59  ;;  %v4586_v42 = vpop.permute.xlu1 %4585 }
 0x40e   : > { %v4654_v34 = vsel %vm8869_vm12, %v4646_v49, %v4586_v42 }
 0x40f   : > { %4785 = vmatmul.mubr.f32.gmra.mxu1 %v4654_v34 }
 0x410   : > { %v4535_v14 = vpop.permute.xlu0 %4534  ;;  %5499 = vmatprep.mubr.msk.f32.mxu1 %vm1592_vm4, %v4599_v3 }
 0x411   : > { %v4639_v62 = vsel %vm4296_vm7, %v4631_v46, %v4535_v14  ;;  %v4560_v10 = vpop.permute.xlu1 %4559 }
 0x412   : > { %v4647_v1 = vsel %vm4298_vm0, %v4639_v62, %v4560_v10 }
 0x414   : > { %v4588_v2 = vpop.permute.xlu0 %4587 }
 0x415   : > { %v4264_v38 = vpop.permute.xlu1 %4263  ;;  %v4655_v7 = vsel %vm8870_vm2, %v4647_v1, %v4588_v2 }
 0x416   : > { %4790 = vmatmul.mubr.f32.gmra.mxu1 %v4655_v7  ;;  %v4290_v33 = vsel %vm1592_vm4, %v4254_v45, %v4264_v38  ;;  %vm8871_vm4 = vmmov %vm8870_vm2 }
 0x418   : > { %v4268_v55 = vpop.permute.xlu0 %4267 }
 0x419   : > { %v4272_v21 = vpop.permute.xlu1 %4271  ;;  %v4291_v27 = vsel %vm1724_vm11, %v4290_v33, %v4268_v55 }
 0x41a   : > { %v4293_v32 = vsel %vm4292_vm6, %v4291_v27, %v4272_v21  ;;  %vm8872_vm6 = vmmov %vm8866_vm9 }
 0x41b   : > { %vm8874_vm1 = vmmov %vm8872_vm6 }
 0x41c   : > { %v4276_v0 = vpop.permute.xlu0 %4275 }
 0x41d   : > { %v4280_v31 = vpop.permute.xlu1 %4279  ;;  %v4295_v44 = vsel %vm4294_vm5, %v4293_v32, %v4276_v0 }
 0x41e   : > { %v4297_v22 = vsel %vm4296_vm7, %v4295_v44, %v4280_v31  ;;  %vm8873_vm7 = vmmov %vm8872_vm6 }
 0x421   : > { %v4284_v9 = vpop.permute.xlu1 %4283 }
 0x422   : > { %v4299_v18 = vsel %vm4298_vm0, %v4297_v22, %v4284_v9 }
 0x424   : > { %v4766_v58 = vpop.f32.mrf.mxu1 }
 0x425   : > { %v4804_v36 = vmul.f32 %v8572_v13, %v4766_v58  ;;  %v4288_v45 = vpop.permute.xlu1 %4287 }
 0x426   : > { %v4768_v29 = vpop.f32.mrf.mxu1  ;;  %v4301_v26 = vsel %vm8871_vm4, %v4299_v18, %v4288_v45 }
 0x427   : > { %v4819_v63 = vadd.f32 %v8579_v40, %v4804_v36  ;;  %4302 = vst [vmem:[%s310_s29] sm:$0xff] %v4301_v26 }
 0x428   : > { %v4771_v20 = vpop.f32.mrf.mxu1 }
 0x429   : > { %v4827_v5 = vmax.f32 %v4819_v63, 0.0  ;;  %v4805_v61 = vmul.f32 %v8572_v13, %v4771_v20 }
 0x42a   : > { %v4773_v48 = vpop.f32.mrf.mxu1 }
 0x42b   : > { %v4875_v6 = vcombine.high %v4827_v5, %v4827_v5  ;;  %v4882_v11 = vrot.slane %v4827_v5, %v6773_v52  ;;  %v4820_v51 = vadd.f32 %v8579_v40, %v4805_v61 }
 0x42d   : > { %v4889_v28 = vrot.slane %v4875_v6, %v6773_v52  ;;  %v4890_v12 = vcombine.high %v4882_v11, %v4882_v11  ;;  %v5066_v19 = vsel %vm5009_vm3, %v4882_v11, -inf  ;;  %v4828_v37 = vmax.f32 %v4820_v51, 0.0 }
 0x42e   : > { %v5067_v23 = vrot.slane %v5066_v19, 4 }
 0x42f   : > { %v4891_v39 = vcombine.high %v4889_v28, %v4889_v28  ;;  %v5073_v53 = vsel %vm5009_vm3, %v4890_v12, -inf  ;;  %v5080_v41 = vsel %vm5009_vm3, %v4889_v28, -inf  ;;  %v4892_v16 = vcombine.high %v4828_v37, %v4828_v37 }
 0x430   : > { %v5068_v4 = vmax.f32 %v5066_v19, %v5067_v23  ;;  %v5074_v60 = vrot.slane %v5073_v53, 4  ;;  %v5081_v50 = vrot.slane %v5080_v41, 4  ;;  %v4899_v24 = vrot.slane %v4828_v37, %v6773_v52 }
 0x431   : > { %v5087_v57 = vsel %vm5009_vm3, %v4891_v39, -inf  ;;  %v4906_v54 = vrot.slane %v4892_v16, %v6773_v52 }
 0x432   : > { %v5069_v25 = vrot.slane %v5068_v4, 2  ;;  %v5075_v17 = vmax.f32 %v5073_v53, %v5074_v60  ;;  %v5082_v43 = vmax.f32 %v5080_v41, %v5081_v50  ;;  %v5088_v59 = vrot.slane %v5087_v57, 4 }
 0x433   : > { %v4907_v56 = vcombine.high %v4899_v24, %v4899_v24  ;;  %v4908_v49 = vcombine.high %v4906_v54, %v4906_v54  ;;  %v5094_v42 = vsel %vm5009_vm3, %v4899_v24, -inf  ;;  %v5108_v3 = vsel %vm5009_vm3, %v4906_v54, -inf }
 0x434   : > { %v5070_v35 = vmax.f32 %v5068_v4, %v5069_v25  ;;  %v5076_v34 = vrot.slane %v5075_v17, 2  ;;  %v5083_v15 = vrot.slane %v5082_v43, 2  ;;  %v5089_v14 = vmax.f32 %v5087_v57, %v5088_v59 }
 0x435   : > { %v5095_v46 = vrot.slane %v5094_v42, 4  ;;  %v5101_v62 = vsel %vm5009_vm3, %v4907_v56, -inf  ;;  %v5109_v10 = vrot.slane %v5108_v3, 4  ;;  %v5115_v1 = vsel %vm5009_vm3, %v4908_v49, -inf }
 0x436   : > { %v5077_v2 = vmax.f32 %v5075_v17, %v5076_v34  ;;  %v5084_v38 = vmax.f32 %v5082_v43, %v5083_v15  ;;  %v5090_v7 = vrot.slane %v5089_v14, 2  ;;  %v5102_v21 = vrot.slane %v5101_v62, 4 }
 0x437   : > { %v5096_v55 = vmax.f32 %v5094_v42, %v5095_v46  ;;  %v5110_v33 = vmax.f32 %v5108_v3, %v5109_v10  ;;  %v5116_v27 = vrot.slane %v5115_v1, 4  ;;  %v5071_v31 = vrot.slane %v5070_v35, 1 }
 0x438   : > { %v5085_v0 = vrot.slane %v5084_v38, 1  ;;  %v5091_v32 = vmax.f32 %v5089_v14, %v5090_v7  ;;  %v5103_v9 = vmax.f32 %v5101_v62, %v5102_v21  ;;  %v5078_v36 = vrot.slane %v5077_v2, 1 }
 0x439   : > { %v5097_v44 = vrot.slane %v5096_v55, 2  ;;  %v5111_v22 = vrot.slane %v5110_v33, 2  ;;  %v5117_v58 = vmax.f32 %v5115_v1, %v5116_v27  ;;  %v5072_v20 = vmax.f32 %v5070_v35, %v5071_v31 }
 0x43a   : > { %v5092_v18 = vrot.slane %v5091_v32, 1  ;;  %v5104_v29 = vrot.slane %v5103_v9, 2  ;;  %v5086_v5 = vmax.f32 %v5084_v38, %v5085_v0  ;;  %v5079_v51 = vmax.f32 %v5077_v2, %v5078_v36 }
 0x43b   : > { %v5098_v45 = vmax.f32 %v5096_v55, %v5097_v44  ;;  %v5112_v26 = vmax.f32 %v5110_v33, %v5111_v22  ;;  %v5118_v63 = vrot.slane %v5117_v58, 2  ;;  %v5246_v39 = vsel %vm1724_vm11, %v5072_v20, -inf }
 0x43c   : > { %v5105_v48 = vmax.f32 %v5103_v9, %v5104_v29  ;;  %v5093_v28 = vmax.f32 %v5091_v32, %v5092_v18  ;;  %v5252_v53 = vsel %vm1724_vm11, %v5086_v5, -inf  ;;  %v5249_v57 = vsel %vm1724_vm11, %v5079_v51, -inf }
 0x43d   : > { %v5099_v61 = vrot.slane %v5098_v45, 1  ;;  %v5113_v6 = vrot.slane %v5112_v26, 1  ;;  %v5119_v11 = vmax.f32 %v5117_v58, %v5118_v63 }
 0x43e   : > { %v5106_v19 = vrot.slane %v5105_v48, 1  ;;  %v5255_v54 = vsel %vm1724_vm11, %v5093_v28, -inf }
 0x43f   : > { %v5100_v12 = vmax.f32 %v5098_v45, %v5099_v61  ;;  %v5114_v37 = vmax.f32 %v5112_v26, %v5113_v6  ;;  %v5120_v23 = vrot.slane %v5119_v11, 1 }
 0x440   : > { %v5107_v41 = vmax.f32 %v5105_v48, %v5106_v19 }
 0x441   : > { %v5121_v16 = vmax.f32 %v5119_v11, %v5120_v23  ;;  %v5247_v4 = vsel %vm1724_vm11, %v5100_v12, -inf  ;;  %v5253_v60 = vsel %vm1724_vm11, %v5114_v37, -inf }
 0x442   : > { %v5248_v50 = vmax.f32 %v5246_v39, %v5247_v4  ;;  %v5254_v24 = vmax.f32 %v5252_v53, %v5253_v60  ;;  %v5250_v25 = vsel %vm1724_vm11, %v5107_v41, -inf }
 0x443   : > { %v5256_v17 = vsel %vm1724_vm11, %v5121_v16, -inf  ;;  %v5251_v43 = vmax.f32 %v5249_v57, %v5250_v25 }
 0x444   : > { %v5257_v59 = vmax.f32 %v5255_v54, %v5256_v17 }
 0x445   : > { %v5301_v56 = vsel %vm4055_vm14, %v5251_v43, %v5248_v50 }
 0x446   : > { %v5302_v49 = vsel %vm4057_vm15, %v5254_v24, %v5301_v56 }
 0x447   : > { %v8694_v42 = vsel %vm8872_vm6, %v5257_v59, %v5302_v49 }
 0x4a0   : > { %v4776_v3 = vpop.f32.mrf.mxu1 }
 0x4a1   : > { %v4806_v14 = vmul.f32 %v8572_v13, %v4776_v3 }
 0x4a2   : > { %v4778_v35 = vpop.f32.mrf.mxu1 }
 0x4a3   : > { %v4821_v46 = vadd.f32 %v8579_v40, %v4806_v14 }
 0x4a4   : > { %v4781_v34 = vpop.f32.mrf.mxu1 }
 0x4a5   : > { %v4807_v62 = vmul.f32 %v8572_v13, %v4781_v34  ;;  %v4829_v10 = vmax.f32 %v4821_v46, 0.0 }
 0x4a6   : > { %v4783_v15 = vpop.f32.mrf.mxu1 }
 0x4a7   : > { %v4822_v1 = vadd.f32 %v8579_v40, %v4807_v62  ;;  %v4916_v2 = vrot.slane %v4829_v10, %v6773_v52  ;;  %v4909_v38 = vcombine.high %v4829_v10, %v4829_v10 }
 0x4a9   : > { %v4830_v7 = vmax.f32 %v4822_v1, 0.0  ;;  %v4924_v55 = vcombine.high %v4916_v2, %v4916_v2  ;;  %v4923_v21 = vrot.slane %v4909_v38, %v6773_v52  ;;  %v5122_v33 = vsel %vm5009_vm3, %v4916_v2, -inf }
 0x4aa   : > { %v5123_v9 = vrot.slane %v5122_v33, 4 }
 0x4ab   : > { %v4933_v27 = vrot.slane %v4830_v7, %v6773_v52  ;;  %v5129_v31 = vsel %vm5009_vm3, %v4924_v55, -inf  ;;  %v4925_v0 = vcombine.high %v4923_v21, %v4923_v21  ;;  %v5136_v32 = vsel %vm5009_vm3, %v4923_v21, -inf }
 0x4ac   : > { %v4926_v44 = vcombine.high %v4830_v7, %v4830_v7  ;;  %v5130_v22 = vrot.slane %v5129_v31, 4  ;;  %v5137_v36 = vrot.slane %v5136_v32, 4  ;;  %v5124_v29 = vmax.f32 %v5122_v33, %v5123_v9 }
 0x4ad   : > { %v4941_v58 = vcombine.high %v4933_v27, %v4933_v27  ;;  %v5143_v18 = vsel %vm5009_vm3, %v4925_v0, -inf  ;;  %v5150_v61 = vsel %vm5009_vm3, %v4933_v27, -inf }
 0x4ae   : > { %v4940_v45 = vrot.slane %v4926_v44, %v6773_v52  ;;  %v5131_v26 = vmax.f32 %v5129_v31, %v5130_v22  ;;  %v5138_v20 = vmax.f32 %v5136_v32, %v5137_v36  ;;  %v5144_v5 = vrot.slane %v5143_v18, 4 }
 0x4af   : > { %v5157_v63 = vsel %vm5009_vm3, %v4941_v58, -inf  ;;  %v5125_v6 = vrot.slane %v5124_v29, 2  ;;  %v5151_v12 = vrot.slane %v5150_v61, 4 }
 0x4b0   : > { %v5164_v48 = vsel %vm5009_vm3, %v4940_v45, -inf  ;;  %v4942_v11 = vcombine.high %v4940_v45, %v4940_v45  ;;  %v5158_v51 = vrot.slane %v5157_v63, 4  ;;  %v5132_v28 = vrot.slane %v5131_v26, 2 }
 0x4b1   : > { %v5139_v19 = vrot.slane %v5138_v20, 2  ;;  %v5145_v37 = vmax.f32 %v5143_v18, %v5144_v5  ;;  %v5165_v23 = vrot.slane %v5164_v48, 4  ;;  %v5126_v39 = vmax.f32 %v5124_v29, %v5125_v6 }
 0x4b2   : > { %v5159_v53 = vmax.f32 %v5157_v63, %v5158_v51  ;;  %v5171_v41 = vsel %vm5009_vm3, %v4942_v11, -inf  ;;  %v5133_v16 = vmax.f32 %v5131_v26, %v5132_v28  ;;  %v5152_v4 = vmax.f32 %v5150_v61, %v5151_v12 }
 0x4b3   : > { %v5140_v60 = vmax.f32 %v5138_v20, %v5139_v19  ;;  %v5146_v50 = vrot.slane %v5145_v37, 2  ;;  %v5166_v24 = vmax.f32 %v5164_v48, %v5165_v23  ;;  %v5172_v54 = vrot.slane %v5171_v41, 4 }
 0x4b4   : > { %v5127_v17 = vrot.slane %v5126_v39, 1  ;;  %v5160_v43 = vrot.slane %v5159_v53, 2  ;;  %v5134_v56 = vrot.slane %v5133_v16, 1  ;;  %v5153_v49 = vrot.slane %v5152_v4, 2 }
 0x4b5   : > { %v5141_v35 = vrot.slane %v5140_v60, 1  ;;  %v5147_v34 = vmax.f32 %v5145_v37, %v5146_v50  ;;  %v5167_v15 = vrot.slane %v5166_v24, 2  ;;  %v5173_v14 = vmax.f32 %v5171_v41, %v5172_v54 }
 0x4b6   : > { %v5128_v62 = vmax.f32 %v5126_v39, %v5127_v17  ;;  %v5161_v10 = vmax.f32 %v5159_v53, %v5160_v43  ;;  %v5135_v1 = vmax.f32 %v5133_v16, %v5134_v56  ;;  %v5154_v2 = vmax.f32 %v5152_v4, %v5153_v49 }
 0x4b7   : > { %v5142_v21 = vmax.f32 %v5140_v60, %v5141_v35  ;;  %v5148_v33 = vrot.slane %v5147_v34, 1  ;;  %v5168_v27 = vmax.f32 %v5166_v24, %v5167_v15  ;;  %v5174_v0 = vrot.slane %v5173_v14, 2 }
 0x4b8   : > { %v8719_v58 = vsel %vm1724_vm11, %v5128_v62, -inf  ;;  %v5162_v36 = vrot.slane %v5161_v10, 1  ;;  %v5155_v29 = vrot.slane %v5154_v2, 1 }
 0x4b9   : > { %v5149_v6 = vmax.f32 %v5147_v34, %v5148_v33  ;;  %v5169_v11 = vrot.slane %v5168_v27, 1  ;;  %v5175_v51 = vmax.f32 %v5173_v14, %v5174_v0  ;;  %v5264_v24 = vsel %vm1724_vm11, %v5142_v21, -inf }
 0x4ba   : > { %v5163_v12 = vmax.f32 %v5161_v10, %v5162_v36  ;;  %v5156_v39 = vmax.f32 %v5154_v2, %v5155_v29 }
 0x4bb   : > { %v5170_v17 = vmax.f32 %v5168_v27, %v5169_v11  ;;  %v5176_v43 = vrot.slane %v5175_v51, 1 }
 0x4bc   : > { %v5259_v15 = vsel %vm1724_vm11, %v5156_v39, -inf }
 0x4bd   : > { %v5265_v21 = vsel %vm1724_vm11, %v5170_v17, -inf }
 0x4cf   : > { %v4786_v57 = vpop.f32.mrf.mxu1 }
 0x4d0   : > { %v4808_v25 = vmul.f32 %v8572_v13, %v4786_v57 }
 0x4d1   : > { %v4788_v59 = vpop.f32.mrf.mxu1 }
 0x4d2   : > { %v4823_v3 = vadd.f32 %v8579_v40, %v4808_v25  ;;  %v5262_v59 = vsel %vm1724_vm11, %v5163_v12, -inf }
 0x4d4   : > { %v4831_v46 = vmax.f32 %v4823_v3, 0.0 }
 0x4d6   : > { %v4943_v38 = vcombine.high %v4831_v46, %v4831_v46  ;;  %v4950_v7 = vrot.slane %v4831_v46, %v6773_v52  ;;  %v4791_v55 = vpop.f32.mrf.mxu1 }
 0x4d7   : > { %v4809_v31 = vmul.f32 %v8572_v13, %v4791_v55 }
 0x4d8   : > { %v4957_v32 = vrot.slane %v4943_v38, %v6773_v52  ;;  %v4958_v44 = vcombine.high %v4950_v7, %v4950_v7  ;;  %v5178_v9 = vsel %vm5009_vm3, %v4950_v7, -inf  ;;  %v4793_v22 = vpop.f32.mrf.mxu1  ;;  %v5177_v7 = vmax.f32 %v5175_v51, %v5176_v43 }
 0x4d9   : > { %v5179_v18 = vrot.slane %v5178_v9, 4  ;;  %v4824_v45 = vadd.f32 %v8579_v40, %v4809_v31  ;;  %v5261_v40 = vsel %vm1724_vm11, %v5135_v1, -inf }
 0x4da   : > { %v4959_v26 = vcombine.high %v4957_v32, %v4957_v32  ;;  %v5185_v63 = vsel %vm5009_vm3, %v4958_v44, -inf  ;;  %v5192_v13 = vsel %vm5009_vm3, %v4957_v32, -inf  ;;  %v5263_v55 = vmax.f32 %v5261_v40, %v5262_v59 }
 0x4db   : > { %v5180_v20 = vmax.f32 %v5178_v9, %v5179_v18  ;;  %v5186_v5 = vrot.slane %v5185_v63, 4  ;;  %v5193_v61 = vrot.slane %v5192_v13, 4  ;;  %v4832_v48 = vmax.f32 %v4824_v45, 0.0 }
 0x4dc   : > { %v5199_v28 = vsel %vm5009_vm3, %v4959_v26, -inf  ;;  %v5260_v44 = vmax.f32 %v8719_v58, %v5259_v15 }
 0x4dd   : > { %v5187_v19 = vmax.f32 %v5185_v63, %v5186_v5  ;;  %v5194_v37 = vmax.f32 %v5192_v13, %v5193_v61  ;;  %v5200_v23 = vrot.slane %v5199_v28, 4  ;;  %v4960_v53 = vcombine.high %v4832_v48, %v4832_v48 }
 0x4de   : > { %v4967_v41 = vrot.slane %v4832_v48, %v6773_v52  ;;  %v5181_v16 = vrot.slane %v5180_v20, 2  ;;  %v5266_v63 = vmax.f32 %v5264_v24, %v5265_v21  ;;  %v5268_v13 = vsel %vm1724_vm11, %v5177_v7, -inf }
 0x4df   : > { %v5188_v4 = vrot.slane %v5187_v19, 2  ;;  %v5195_v60 = vrot.slane %v5194_v37, 2  ;;  %v5201_v50 = vmax.f32 %v5199_v28, %v5200_v23  ;;  %v4974_v57 = vrot.slane %v4960_v53, %v6773_v52 }
 0x4e0   : > { %v4975_v54 = vcombine.high %v4967_v41, %v4967_v41  ;;  %v5206_v25 = vsel %vm5009_vm3, %v4967_v41, -inf  ;;  %v5182_v14 = vmax.f32 %v5180_v20, %v5181_v16  ;;  %v5304_v5 = vsel %vm4055_vm14, %v5263_v55, %v5260_v44 }
 0x4e1   : > { %v5202_v56 = vrot.slane %v5201_v50, 2  ;;  %v4976_v49 = vcombine.high %v4974_v57, %v4974_v57  ;;  %v5207_v3 = vrot.slane %v5206_v25, 4  ;;  %v5220_v34 = vsel %vm5009_vm3, %v4974_v57, -inf }
 0x4e2   : > { %v5213_v35 = vsel %vm5009_vm3, %v4975_v54, -inf  ;;  %v5189_v46 = vmax.f32 %v5187_v19, %v5188_v4  ;;  %v5196_v62 = vmax.f32 %v5194_v37, %v5195_v60  ;;  %v5221_v2 = vrot.slane %v5220_v34, 4 }
 0x4e3   : > { %v5208_v10 = vmax.f32 %v5206_v25, %v5207_v3  ;;  %v5214_v1 = vrot.slane %v5213_v35, 4  ;;  %v5227_v38 = vsel %vm5009_vm3, %v4976_v49, -inf  ;;  %v5203_v33 = vmax.f32 %v5201_v50, %v5202_v56 }
 0x4e4   : > { %v5222_v0 = vmax.f32 %v5220_v34, %v5221_v2  ;;  %v5228_v32 = vrot.slane %v5227_v38, 4  ;;  %v5183_v9 = vrot.slane %v5182_v14, 1  ;;  %v5190_v22 = vrot.slane %v5189_v46, 1 }
 0x4e5   : > { %v5209_v27 = vrot.slane %v5208_v10, 2  ;;  %v5215_v31 = vmax.f32 %v5213_v35, %v5214_v1  ;;  %v5197_v36 = vrot.slane %v5196_v62, 1  ;;  %v5204_v20 = vrot.slane %v5203_v33, 1 }
 0x4e6   : > { %v5223_v29 = vrot.slane %v5222_v0, 2  ;;  %v5229_v26 = vmax.f32 %v5227_v38, %v5228_v32  ;;  %v5267_v28 = vsel %vm1724_vm11, %v5149_v6, -inf  ;;  %v5184_v58 = vmax.f32 %v5182_v14, %v5183_v9 }
 0x4e7   : > { %v5210_v18 = vmax.f32 %v5208_v10, %v5209_v27  ;;  %v5216_v45 = vrot.slane %v5215_v31, 2  ;;  %v5191_v12 = vmax.f32 %v5189_v46, %v5190_v22  ;;  %v5198_v19 = vmax.f32 %v5196_v62, %v5197_v36 }
 0x4e8   : > { %v5224_v11 = vmax.f32 %v5222_v0, %v5223_v29  ;;  %v5230_v51 = vrot.slane %v5229_v26, 2  ;;  %v5205_v53 = vmax.f32 %v5203_v33, %v5204_v20  ;;  %v5269_v41 = vmax.f32 %v5267_v28, %v5268_v13 }
 0x4e9   : > { %v5211_v61 = vrot.slane %v5210_v18, 1  ;;  %v5217_v48 = vmax.f32 %v5215_v31, %v5216_v45  ;;  %v5305_v16 = vsel %vm4057_vm15, %v5266_v63, %v5304_v5  ;;  %v5270_v57 = vsel %vm1724_vm11, %v5184_v58, -inf }
 0x4ea   : > { %v5225_v40 = vrot.slane %v5224_v11, 1  ;;  %v5231_v39 = vmax.f32 %v5229_v26, %v5230_v51  ;;  %v5273_v6 = vsel %vm1724_vm11, %v5191_v12, -inf  ;;  %v5276_v54 = vsel %vm1724_vm11, %v5198_v19, -inf }
 0x4eb   : > { %v5212_v37 = vmax.f32 %v5210_v18, %v5211_v61  ;;  %v5218_v23 = vrot.slane %v5217_v48, 1  ;;  %v5306_v3 = vsel %vm8873_vm7, %v5269_v41, %v5305_v16  ;;  %v5279_v35 = vsel %vm1724_vm11, %v5205_v53, -inf }
 0x4ec   : > { %v5226_v60 = vmax.f32 %v5224_v11, %v5225_v40  ;;  %v5232_v50 = vrot.slane %v5231_v39, 1  ;;  %v5314_v62 = vcombine.low %v8614_v47, %v5306_v3 }
 0x4ed   : > { %v5219_v4 = vmax.f32 %v5217_v48, %v5218_v23  ;;  %v5271_v24 = vsel %vm1724_vm11, %v5212_v37, -inf }
 0x4ee   : > { %v5233_v25 = vmax.f32 %v5231_v39, %v5232_v50  ;;  %v5277_v43 = vsel %vm1724_vm11, %v5226_v60, -inf  ;;  %v5272_v59 = vmax.f32 %v5270_v57, %v5271_v24  ;;  %v5321_v2 = vrot.slane %v5314_v62, %v6773_v52 }
 0x4ef   : > { %v5274_v17 = vsel %vm1724_vm11, %v5219_v4, -inf  ;;  %v5278_v49 = vmax.f32 %v5276_v54, %v5277_v43 }
 0x4f0   : > { %v5275_v56 = vmax.f32 %v5273_v6, %v5274_v17  ;;  %v5280_v34 = vsel %vm1724_vm11, %v5233_v25, -inf }
 0x4f1   : > { %v5281_v15 = vmax.f32 %v5279_v35, %v5280_v34 }
 0x4f2   : > { %v5307_v14 = vsel %vm4055_vm14, %v5275_v56, %v5272_v59 }
 0x4f3   : > { %v5308_v46 = vsel %vm4057_vm15, %v5278_v49, %v5307_v14 }
 0x4f4   : > { %v5309_v10 = vsel %vm8874_vm1, %v5281_v15, %v5308_v46 }
 0x4f5   : > { %v5322_v1 = vcombine.low %v8694_v42, %v5309_v10 }
 0x4f7   : > { %v5329_v38 = vrot.slane %v5322_v1, %v6773_v52 }
 0x4f9   : > { %v5331_v7 = vcombine.high %v5321_v2, %v5329_v38  ;;  %v5330_v55 = vcombine.low %v5321_v2, %v5329_v38 }
 0x4fb   : > { %v5345_v21 = vrot.slane %v5331_v7, %v8508_v30  ;;  %v5338_v33 = vrot.slane %v5330_v55, %v8508_v30 }
 0x4fd   : > { %5353 = vrot.lane.b32.xlu0 %v5345_v21, %s5795_s17  ;;  %v5346_v27 = vcombine.high %v5338_v33, %v8819_v8  ;;  %v5347_v47 = vcombine.high %v5345_v21, %v8819_v8 }
 0x501   : > { %5349 = vrot.lane.b32.xlu0 %v5346_v27, %s5792_s9 }
 0x505   : > { %5357 = vrot.lane.b32.xlu0 %v5347_v47, %s5797_s30 }
 0x56f   : > { %v5354_v42 = vpop.permute.xlu0 %5353 }
 0x573   : > { %v5350_v31 = vpop.permute.xlu0 %5349 }
 0x574   : > { %v5360_v52 = vsel %vm1724_vm11, %v5338_v33, %v5350_v31 }
 0x575   : > { %v5361_v30 = vsel %vm4294_vm5, %v5360_v52, %v5354_v42 }
 0x577   : > { %v5358_v0 = vpop.permute.xlu0 %5357 }
 0x578   : > { %v5362_v32 = vsel %vm4298_vm0, %v5361_v30, %v5358_v0 }
 0x579   : > { %5363 = vst [vmem:[%s314_s19] sm:$0xf] %v5362_v32 }
 0x57a PF: > { %s19_s27 = sadd.s32 1, %s5782_s27  }
 0x57b   : > { %p16_p4 = scmp.ge.s32.totalorder %s19_s27, 4  }
 0x57d   :  { %18 = sbr.rel (!%p16_p4) target bundleno = 1 (0x1), region = 92 }

</bundles_post_ra>
